<compile_context>
chip_gen: v7x
topology: tpu7x:2x2x1
jax: 0.10.0
libtpu: 0.0.40
codegen_flags: <defaults>
</compile_context>

<pallas_src>
import functools

import jax
import jax.numpy as jnp
from jax.experimental import pallas as pl
from jax.experimental.pallas import tpu as pltpu

TILE_M = 1024                     # flattened N*Ho*Wo columns per grid step


def _round_up(x, m):
    return (x + m - 1) // m * m


def _vmem_limit(block_bytes):
    """Actual need + generous headroom; bounded well below v7x's 64 MiB VMEM."""
    return int(min(32 << 20, max(16 << 20, 4 * int(block_bytes))))


def _full_spec(shape):
    """Whole array as a single VMEM-resident block (used with grid=(1,))."""
    return pl.BlockSpec(shape, lambda i: (0,) * len(shape))


# ----------------------------------------------------------------------------
# Parameter folding
# ----------------------------------------------------------------------------
def _fold_conv_bn(prm, extra_scale=1.0, eps=1e-5):
    """Fold inference-mode BN (and an optional residual scale) into the weights.

    Returns a (Cout, K) bf16 weight matrix laid out tap-major (matching the
    im2col patch order) and an f32 (Cout, 1) bias.  The fold happens in f32
    BEFORE the bf16 cast so rounding does not compound.
    """
    w = prm["w"].astype(jnp.float32)
    cout, cin, kh, kw = w.shape
    s_bn = prm["gamma"] / jnp.sqrt(prm["var"] + eps)
    bias = (prm["beta"] - prm["mean"] * s_bn) * extra_scale
    w2 = jnp.transpose(w, (0, 2, 3, 1)).reshape(cout, kh * kw * cin)
    w2 = w2 * (s_bn * extra_scale)[:, None]
    return w2.astype(jnp.bfloat16), bias.astype(jnp.float32)[:, None]


def _stack_convbn(prms):
    """Stack several conv+BN parameter sets along the output-channel axis."""
    return {k: jnp.concatenate([p[k] for p in prms], axis=0)
            for k in ("w", "gamma", "beta", "mean", "var")}


# ----------------------------------------------------------------------------
# Fully fused BasicRFB kernel (stride == 1): one pallas_call for the block
# ----------------------------------------------------------------------------
def _rfb_fused_kernel(x_ref, mask_ref,
                      wst_ref, bst_ref,
                      w01_ref, b01_ref, w11_ref, b11_ref, w12_ref, b12_ref,
                      w21_ref, b21_ref, w22_ref, b22_ref, w23_ref, b23_ref,
                      wl_ref, bl_ref, wsh_ref, bsh_ref,
                      o_ref, *, wc, mcp, inter, dil_b0, dil_b1, dil_b2):
    """Whole BasicRFB on a zero-ring canvas (C, Mcp) resident in VMEM."""
    mask = mask_ref[...]                    # (1, Mcp): 1 = valid pixel, 0 = ring
    x_bf = x_ref[...]                       # (Cin, Mcp) bf16

    def affine(w_ref, b_ref, rhs_bf16):     # folded-BN conv == one MXU matmul
        return jnp.dot(w_ref[...], rhs_bf16,
                       preferred_element_type=jnp.float32) + b_ref[...]

    def conv3x3(w_ref, b_ref, xin_f32, dil, relu):
        # In-VMEM im2col: 9 lane-rolled copies of the canvas -> one K=9*Cin dot.
        taps = []
        for dy in (-1, 0, 1):
            for dx in (-1, 0, 1):
                delta = (dy * wc + dx) * dil
                taps.append(xin_f32 if delta == 0
                            else pltpu.roll(xin_f32, (-delta) % mcp, axis=1))
        patches = jnp.concatenate(taps, axis=0).astype(jnp.bfloat16)
        y = affine(w_ref, b_ref, patches)
        if relu:
            y = jnp.maximum(y, 0.0)
        return y * mask                     # keep the zero ring exact

    # Fused 1x1 stems (b0_0 | b1_0 | b2_0 stacked along Cout), single matmul.
    stem = jnp.maximum(affine(wst_ref, bst_ref, x_bf), 0.0) * mask

    # branch0
    x0 = conv3x3(w01_ref, b01_ref, stem[0:2 * inter], dil_b0, relu=False)
    # branch1
    x1 = conv3x3(w11_ref, b11_ref, stem[2 * inter:3 * inter], 1, relu=True)
    x1 = conv3x3(w12_ref, b12_ref, x1, dil_b1, relu=False)
    # branch2
    x2 = conv3x3(w21_ref, b21_ref, stem[3 * inter:4 * inter], 1, relu=True)
    x2 = conv3x3(w22_ref, b22_ref, x2, 1, relu=True)
    x2 = conv3x3(w23_ref, b23_ref, x2, dil_b2, relu=False)

    # ConvLinear over the (never materialized in HBM) channel concat,
    # shortcut, residual (scale folded into wl/bl) and final ReLU.
    cat = jnp.concatenate([x0, x1, x2], axis=0).astype(jnp.bfloat16)
    lin = affine(wl_ref, bl_ref, cat)
    short = affine(wsh_ref, bsh_ref, x_bf)
    o_ref[...] = jnp.maximum(lin + short, 0.0).astype(o_ref.dtype)


def basic_rfb_fused(x_nchw, params, scale, *, visual=1):
    """BasicRFB forward, stride==1, as a single Pallas kernel."""
    n, cin, h, w = x_nchw.shape
    inter = params["b1_0"]["w"].shape[0]
    cout = params["lin"]["w"].shape[0]
    ring = 2 * visual + 1                   # >= max dilation used in the block
    hc, wc = h + 2 * ring, w + 2 * ring
    mc = n * hc * wc
    mcp = _round_up(mc, 128)                # lane-dense canvas width

    # Zero-ring canvas, bf16 BEFORE it ever reaches the kernel.
    x = jnp.transpose(x_nchw, (1, 0, 2, 3)).astype(jnp.float32)    # (C, N, H, W)
    xc = jnp.pad(x, ((0, 0), (0, 0), (ring, ring), (ring, ring)))
    xc = jnp.pad(xc.reshape(cin, mc), ((0, 0), (0, mcp - mc))).astype(jnp.bfloat16)

    mask = jnp.pad(jnp.ones((1, n, h, w), jnp.float32),
                   ((0, 0), (0, 0), (ring, ring), (ring, ring)))
    mask = jnp.pad(mask.reshape(1, mc), ((0, 0), (0, mcp - mc)))

    # Folded-BN weights (stems stacked: b0_0 | b1_0 | b2_0).
    w_st, b_st = _fold_conv_bn(_stack_convbn(
        [params["b0_0"], params["b1_0"], params["b2_0"]]))
    w01, b01 = _fold_conv_bn(params["b0_1"])
    w11, b11 = _fold_conv_bn(params["b1_1"])
    w12, b12 = _fold_conv_bn(params["b1_2"])
    w21, b21 = _fold_conv_bn(params["b2_1"])
    w22, b22 = _fold_conv_bn(params["b2_2"])
    w23, b23 = _fold_conv_bn(params["b2_3"])
    wl, bl = _fold_conv_bn(params["lin"], extra_scale=scale)   # residual scale folded in
    wsh, bsh = _fold_conv_bn(params["short"])

    operands = (xc, mask, w_st, b_st, w01, b01, w11, b11, w12, b12,
                w21, b21, w22, b22, w23, b23, wl, bl, wsh, bsh)
    weights = (w_st, w01, w11, w12, w21, w22, w23, wl, wsh)
    flops = 2 * mcp * sum(int(a.shape[0]) * int(a.shape[1]) for a in weights)
    out_bytes = cout * mcp * 4
    bytes_accessed = sum(int(a.size) * a.dtype.itemsize for a in operands) + out_bytes

    kernel = functools.partial(
        _rfb_fused_kernel, wc=wc, mcp=mcp, inter=inter,
        dil_b0=visual, dil_b1=visual + 1, dil_b2=2 * visual + 1)

    out = pl.pallas_call(
        kernel,
        out_shape=jax.ShapeDtypeStruct((cout, mcp), jnp.float32),
        grid=(1,),
        in_specs=[_full_spec(a.shape) for a in operands],
        out_specs=_full_spec((cout, mcp)),
        compiler_params=pltpu.CompilerParams(
            vmem_limit_bytes=_vmem_limit(bytes_accessed)),
        cost_estimate=pl.CostEstimate(flops=flops, transcendentals=0,
                                      bytes_accessed=bytes_accessed),
    )(*operands)

    out = out[:, :mc].reshape(cout, n, hc, wc)[:, :, ring:ring + h, ring:ring + w]
    return jnp.transpose(out, (1, 0, 2, 3))


# ----------------------------------------------------------------------------
# Fallback tiled im2col path (used when stride != 1)
# ----------------------------------------------------------------------------
def _matmul_bias_act_kernel(w_ref, x_ref, b_ref, o_ref, *, relu):
    """out = act(W @ X + b) for one lane-dense column tile (BN folded into W)."""
    y = jnp.dot(w_ref[...], x_ref[...], preferred_element_type=jnp.float32) + b_ref[...]
    if relu:
        y = jnp.maximum(y, 0.0)
    o_ref[...] = y.astype(o_ref.dtype)


def _head_kernel(wl_ref, wsh_ref, xc_ref, xs_ref, bl_ref, bsh_ref, o_ref):
    """relu(ConvLinear(cat)*scale + shortcut(x)); scales folded into wl/bl."""
    lin = jnp.dot(wl_ref[...], xc_ref[...], preferred_element_type=jnp.float32) + bl_ref[...]
    sh = jnp.dot(wsh_ref[...], xs_ref[...], preferred_element_type=jnp.float32) + bsh_ref[...]
    o_ref[...] = jnp.maximum(lin + sh, 0.0).astype(o_ref.dtype)


def _extract_patches(x_cnhw, kh, kw, stride, padding, dilation):
    """(C, N, H, W) -> im2col patches (kh*kw*C, N*Ho*Wo); K index = tap*C + c."""
    c, n, h, w = x_cnhw.shape
    if padding:
        x_cnhw = jnp.pad(x_cnhw, ((0, 0), (0, 0),
                                  (padding, padding), (padding, padding)))
    hp, wp = h + 2 * padding, w + 2 * padding
    ho = (hp - dilation * (kh - 1) - 1) // stride + 1
    wo = (wp - dilation * (kw - 1) - 1) // stride + 1
    taps = []
    for iy in range(kh):
        for ix in range(kw):
            y0, x0 = iy * dilation, ix * dilation
            taps.append(jax.lax.slice(
                x_cnhw,
                (0, 0, y0, x0),
                (c, n, y0 + (ho - 1) * stride + 1, x0 + (wo - 1) * stride + 1),
                (1, 1, stride, stride)))
    patches = taps[0] if len(taps) == 1 else jnp.concatenate(taps, axis=0)
    return patches.reshape(kh * kw * c, n * ho * wo), (n, ho, wo)


def conv_bn(x_cnhw, prm, *, stride=1, padding=0, dilation=1, relu=True,
            tm=TILE_M, out_dtype=jnp.bfloat16):
    """RFBBasicConv (conv + folded BN + optional ReLU), channels-first in/out."""
    cout, cin, kh, kw = prm["w"].shape
    x_cnhw = x_cnhw.astype(jnp.bfloat16)          # bf16 BEFORE the im2col expansion
    patches, (n, ho, wo) = _extract_patches(x_cnhw, kh, kw, stride, padding, dilation)
    k, m = patches.shape
    tm_eff = min(tm, _round_up(m, 128))
    mpad = _round_up(m, tm_eff)
    if mpad != m:
        patches = jnp.pad(patches, ((0, 0), (0, mpad - m)))
    w2, bias = _fold_conv_bn(prm)

    out_isz = jnp.dtype(out_dtype).itemsize
    block_bytes = w2.size * 2 + k * tm_eff * 2 + cout * 4 + cout * tm_eff * out_isz
    out = pl.pallas_call(
        functools.partial(_matmul_bias_act_kernel, relu=relu),
        out_shape=jax.ShapeDtypeStruct((cout, mpad), out_dtype),
        grid=(mpad // tm_eff,),
        in_specs=[
            pl.BlockSpec((cout, k), lambda i: (0, 0)),        # folded weights (resident)
            pl.BlockSpec((k, tm_eff), lambda i: (0, i)),      # im2col patch tile
            pl.BlockSpec((cout, 1), lambda i: (0, 0)),        # folded BN bias
        ],
        out_specs=pl.BlockSpec((cout, tm_eff), lambda i: (0, i)),
        compiler_params=pltpu.CompilerParams(
            dimension_semantics=("parallel",),
            vmem_limit_bytes=_vmem_limit(block_bytes)),
        cost_estimate=pl.CostEstimate(
            flops=2 * cout * k * mpad, transcendentals=0,
            bytes_accessed=w2.size * 2 + patches.size * 2 + cout * 4
                           + cout * mpad * out_isz),
    )(w2, patches, bias)
    return out[:, :m].reshape(cout, n, ho, wo)


def rfb_head(x0, x1, x2, x_cnhw, lin_prm, sh_prm, *, stride, res_scale, tm=TILE_M):
    """Fused ConvLinear(cat) + shortcut + residual scale + final ReLU."""
    cat = jnp.concatenate([x0, x1, x2], axis=0)   # one K = 6*inter matmul
    ccat = cat.shape[0]
    xs = x_cnhw[:, :, ::stride, ::stride]         # 1x1 shortcut conv, stride s
    cin_s, n, hs, wsp = xs.shape
    m = n * hs * wsp
    tm_eff = min(tm, _round_up(m, 128))
    mpad = _round_up(m, tm_eff)

    def prep(a):
        a = a.reshape(a.shape[0], m).astype(jnp.bfloat16)
        return jnp.pad(a, ((0, 0), (0, mpad - m))) if mpad != m else a

    fc, fs = prep(cat), prep(xs)
    wl, bl = _fold_conv_bn(lin_prm, extra_scale=res_scale)     # residual scale folded in
    wsh, bsh = _fold_conv_bn(sh_prm)
    cout = wl.shape[0]

    block_bytes = ((wl.size + wsh.size) * 2 + (ccat + cin_s) * tm_eff * 2
                   + cout * 8 + cout * tm_eff * 4)
    out = pl.pallas_call(
        _head_kernel,
        out_shape=jax.ShapeDtypeStruct((cout, mpad), jnp.float32),
        grid=(mpad // tm_eff,),
        in_specs=[
            pl.BlockSpec((cout, ccat), lambda i: (0, 0)),
            pl.BlockSpec((cout, cin_s), lambda i: (0, 0)),
            pl.BlockSpec((ccat, tm_eff), lambda i: (0, i)),
            pl.BlockSpec((cin_s, tm_eff), lambda i: (0, i)),
            pl.BlockSpec((cout, 1), lambda i: (0, 0)),
            pl.BlockSpec((cout, 1), lambda i: (0, 0)),
        ],
        out_specs=pl.BlockSpec((cout, tm_eff), lambda i: (0, i)),
        compiler_params=pltpu.CompilerParams(
            dimension_semantics=("parallel",),
            vmem_limit_bytes=_vmem_limit(block_bytes)),
        cost_estimate=pl.CostEstimate(
            flops=2 * cout * (ccat + cin_s) * mpad, transcendentals=0,
            bytes_accessed=(wl.size + wsh.size) * 2 + (fc.size + fs.size) * 2
                           + cout * 8 + cout * mpad * 4),
    )(wl, wsh, fc, fs, bl, bsh)
    return out[:, :m].reshape(cout, n, hs, wsp)


def basic_rfb_general(x_nchw, params, scale, *, stride=1, visual=1):
    """BasicRFB forward via the tiled im2col path (any stride)."""
    x = jnp.transpose(x_nchw, (1, 0, 2, 3)).astype(jnp.float32)
    inter = params["b1_0"]["w"].shape[0]

    # branch0's stem carries the stride; branch1/branch2 stems share x at
    # stride 1, so they are fused into one stacked 1x1 conv.
    x0 = conv_bn(x, params["b0_0"], stride=stride, relu=True)
    stem = conv_bn(x, _stack_convbn([params["b1_0"], params["b2_0"]]), relu=True)
    x1, x2 = stem[:inter], stem[inter:]

    x0 = conv_bn(x0, params["b0_1"], padding=visual, dilation=visual, relu=False)
    x1 = conv_bn(x1, params["b1_1"], stride=stride, padding=1, relu=True)
    x1 = conv_bn(x1, params["b1_2"], padding=visual + 1, dilation=visual + 1, relu=False)
    x2 = conv_bn(x2, params["b2_1"], padding=1, relu=True)
    x2 = conv_bn(x2, params["b2_2"], stride=stride, padding=1, relu=True)
    x2 = conv_bn(x2, params["b2_3"], padding=2 * visual + 1,
                 dilation=2 * visual + 1, relu=False)

    out = rfb_head(x0, x1, x2, x, params["lin"], params["short"],
                   stride=stride, res_scale=scale)
    return jnp.transpose(out, (1, 0, 2, 3))


# ----------------------------------------------------------------------------
# Dispatch
# ----------------------------------------------------------------------------
_rfb_fused_jit = jax.jit(basic_rfb_fused, static_argnames=("visual",))
_rfb_general_jit = jax.jit(basic_rfb_general, static_argnames=("stride", "visual"))


def basic_rfb_forward(x_nchw, params, *, scale=1.0, stride=1, visual=1):
    """BasicRFB.forward (NCHW in / NCHW out)."""
    if stride == 1:
        try:
            return _rfb_fused_jit(x_nchw, params, scale, visual=visual)
        except Exception:
            pass  # TODO(synk): fall back if the fully fused kernel cannot lower here
    return _rfb_general_jit(x_nchw, params, scale, stride=stride, visual=visual)


# ----------------------------------------------------------------------------
# Pure-JAX reference (PyTorch semantics, f32)
# ----------------------------------------------------------------------------
def _ref_conv_bn(x, prm, stride=1, padding=0, dilation=1, relu=True, eps=1e-5):
    y = jax.lax.conv_general_dilated(
        x, prm["w"], window_strides=(stride, stride),
        padding=((padding, padding), (padding, padding)),
        rhs_dilation=(dilation, dilation),
        dimension_numbers=("NCHW", "OIHW", "NCHW"))
    s = prm["gamma"] / jnp.sqrt(prm["var"] + eps)
    b = prm["beta"] - prm["mean"] * s
    y = y * s[None, :, None, None] + b[None, :, None, None]
    return jnp.maximum(y, 0.0) if relu else y


def ref_basic_rfb(x, params, *, scale=1.0, stride=1, visual=1):
    x0 = _ref_conv_bn(x, params["b0_0"], stride=stride)
    x0 = _ref_conv_bn(x0, params["b0_1"], padding=visual, dilation=visual, relu=False)
    x1 = _ref_conv_bn(x, params["b1_0"])
    x1 = _ref_conv_bn(x1, params["b1_1"], stride=stride, padding=1)
    x1 = _ref_conv_bn(x1, params["b1_2"], padding=visual + 1, dilation=visual + 1, relu=False)
    x2 = _ref_conv_bn(x, params["b2_0"])
    x2 = _ref_conv_bn(x2, params["b2_1"], padding=1)
    x2 = _ref_conv_bn(x2, params["b2_2"], stride=stride, padding=1)
    x2 = _ref_conv_bn(x2, params["b2_3"], padding=2 * visual + 1,
                      dilation=2 * visual + 1, relu=False)
    out = jnp.concatenate([x0, x1, x2], axis=1)
    out = _ref_conv_bn(out, params["lin"], relu=False)
    short = _ref_conv_bn(x, params["short"], stride=stride, relu=False)
    return jnp.maximum(out * scale + short, 0.0)


# ----------------------------------------------------------------------------
# Parameter construction (deterministic, in-script)
# ----------------------------------------------------------------------------
def init_conv_bn(key, cin, cout, k):
    k1, k2, k3, k4 = jax.random.split(key, 4)
    fan_in = cin * k * k
    return dict(
        w=jax.random.normal(k1, (cout, cin, k, k), jnp.float32) / jnp.sqrt(fan_in),
        gamma=1.0 + 0.1 * jax.random.normal(k2, (cout,), jnp.float32),
        beta=0.1 * jax.random.normal(k3, (cout,), jnp.float32),
        mean=0.05 * jax.random.normal(k4, (cout,), jnp.float32),
        var=jnp.ones((cout,), jnp.float32),
    )


def init_basic_rfb_params(key, in_planes, out_planes):
    inter = in_planes // 8
    keys = jax.random.split(key, 12)
    return {
        "b0_0": init_conv_bn(keys[0], in_planes, 2 * inter, 1),
        "b0_1": init_conv_bn(keys[1], 2 * inter, 2 * inter, 3),
        "b1_0": init_conv_bn(keys[2], in_planes, inter, 1),
        "b1_1": init_conv_bn(keys[3], inter, 2 * inter, 3),
        "b1_2": init_conv_bn(keys[4], 2 * inter, 2 * inter, 3),
        "b2_0": init_conv_bn(keys[5], in_planes, inter, 1),
        "b2_1": init_conv_bn(keys[6], inter, inter // 2 * 3, 3),
        "b2_2": init_conv_bn(keys[7], inter // 2 * 3, 2 * inter, 3),
        "b2_3": init_conv_bn(keys[8], 2 * inter, 2 * inter, 3),
        "lin": init_conv_bn(keys[9], 6 * inter, out_planes, 1),
        "short": init_conv_bn(keys[10], in_planes, out_planes, 1),
    }


# ----------------------------------------------------------------------------
if __name__ == "__main__":
    key = jax.random.PRNGKey(0)
    kx, kp = jax.random.split(key)

    # Small shapes consistent with BasicRFB(in_planes=16, out_planes=16).
    N, in_planes, H, W = 2, 16, 16, 16
    out_planes = 16
    rfb_scale, visual = 0.1, 1

    x = jax.random.normal(kx, (N, in_planes, H, W), jnp.float32)
    params = init_basic_rfb_params(kp, in_planes, out_planes)

    # stride=1 exercises the fully fused single-kernel path,
    # stride=2 exercises the tiled im2col fallback path.
    for stride in (1, 2):
        y = jax.block_until_ready(
            basic_rfb_forward(x, params, scale=rfb_scale, stride=stride, visual=visual))
        ref = jax.block_until_ready(
            ref_basic_rfb(x, params, scale=rfb_scale, stride=stride, visual=visual))

        assert y.shape == ref.shape, (y.shape, ref.shape)
        assert bool(jnp.all(jnp.isfinite(y)))
        assert bool(jnp.all(y >= 0.0))                      # final ReLU
        err = float(jnp.max(jnp.abs(y - ref)))
        tol = 5e-2 * max(1.0, float(jnp.max(jnp.abs(ref))))
        assert err < tol, f"stride={stride}: max abs err {err} vs tol {tol}"

    print("KERNEL_OK")
</pallas_src>

<mosaic_0001>
module attributes {stable_mosaic.version = 11 : i64} {
  func.func @_rfb_fused_kernel(%arg0: i32, %arg1: memref<16x1024xbf16, #tpu.memory_space<vmem>>, %arg2: memref<1x1024xf32, #tpu.memory_space<vmem>>, %arg3: memref<8x16xbf16, #tpu.memory_space<vmem>>, %arg4: memref<8x1xf32, #tpu.memory_space<vmem>>, %arg5: memref<4x36xbf16, #tpu.memory_space<vmem>>, %arg6: memref<4x1xf32, #tpu.memory_space<vmem>>, %arg7: memref<4x18xbf16, #tpu.memory_space<vmem>>, %arg8: memref<4x1xf32, #tpu.memory_space<vmem>>, %arg9: memref<4x36xbf16, #tpu.memory_space<vmem>>, %arg10: memref<4x1xf32, #tpu.memory_space<vmem>>, %arg11: memref<3x18xbf16, #tpu.memory_space<vmem>>, %arg12: memref<3x1xf32, #tpu.memory_space<vmem>>, %arg13: memref<4x27xbf16, #tpu.memory_space<vmem>>, %arg14: memref<4x1xf32, #tpu.memory_space<vmem>>, %arg15: memref<4x36xbf16, #tpu.memory_space<vmem>>, %arg16: memref<4x1xf32, #tpu.memory_space<vmem>>, %arg17: memref<16x12xbf16, #tpu.memory_space<vmem>>, %arg18: memref<16x1xf32, #tpu.memory_space<vmem>>, %arg19: memref<16x16xbf16, #tpu.memory_space<vmem>>, %arg20: memref<16x1xf32, #tpu.memory_space<vmem>>, %arg21: memref<16x1024xf32, #tpu.memory_space<vmem>>) attributes {dimension_semantics = [#tpu.dimension_semantics<arbitrary>], iteration_bounds = array<i64: 1>, scalar_prefetch = 0 : i64, scratch_operands = 0 : i64, tpu.core_type = #tpu.core_type<tc>, window_params = [{pipeline_mode = #tpu.pipeline_mode<synchronous>, transform_indices = @transform_0, window_bounds = array<i64: 16, 1024>}, {pipeline_mode = #tpu.pipeline_mode<synchronous>, transform_indices = @transform_1, window_bounds = array<i64: 1, 1024>}, {pipeline_mode = #tpu.pipeline_mode<synchronous>, transform_indices = @transform_2, window_bounds = array<i64: 8, 16>}, {pipeline_mode = #tpu.pipeline_mode<synchronous>, transform_indices = @transform_3, window_bounds = array<i64: 8, 1>}, {pipeline_mode = #tpu.pipeline_mode<synchronous>, transform_indices = @transform_4, window_bounds = array<i64: 4, 36>}, {pipeline_mode = #tpu.pipeline_mode<synchronous>, transform_indices = @transform_5, window_bounds = array<i64: 4, 1>}, {pipeline_mode = #tpu.pipeline_mode<synchronous>, transform_indices = @transform_6, window_bounds = array<i64: 4, 18>}, {pipeline_mode = #tpu.pipeline_mode<synchronous>, transform_indices = @transform_7, window_bounds = array<i64: 4, 1>}, {pipeline_mode = #tpu.pipeline_mode<synchronous>, transform_indices = @transform_8, window_bounds = array<i64: 4, 36>}, {pipeline_mode = #tpu.pipeline_mode<synchronous>, transform_indices = @transform_9, window_bounds = array<i64: 4, 1>}, {pipeline_mode = #tpu.pipeline_mode<synchronous>, transform_indices = @transform_10, window_bounds = array<i64: 3, 18>}, {pipeline_mode = #tpu.pipeline_mode<synchronous>, transform_indices = @transform_11, window_bounds = array<i64: 3, 1>}, {pipeline_mode = #tpu.pipeline_mode<synchronous>, transform_indices = @transform_12, window_bounds = array<i64: 4, 27>}, {pipeline_mode = #tpu.pipeline_mode<synchronous>, transform_indices = @transform_13, window_bounds = array<i64: 4, 1>}, {pipeline_mode = #tpu.pipeline_mode<synchronous>, transform_indices = @transform_14, window_bounds = array<i64: 4, 36>}, {pipeline_mode = #tpu.pipeline_mode<synchronous>, transform_indices = @transform_15, window_bounds = array<i64: 4, 1>}, {pipeline_mode = #tpu.pipeline_mode<synchronous>, transform_indices = @transform_16, window_bounds = array<i64: 16, 12>}, {pipeline_mode = #tpu.pipeline_mode<synchronous>, transform_indices = @transform_17, window_bounds = array<i64: 16, 1>}, {pipeline_mode = #tpu.pipeline_mode<synchronous>, transform_indices = @transform_18, window_bounds = array<i64: 16, 16>}, {pipeline_mode = #tpu.pipeline_mode<synchronous>, transform_indices = @transform_19, window_bounds = array<i64: 16, 1>}, {pipeline_mode = #tpu.pipeline_mode<synchronous>, transform_indices = @transform_20, window_bounds = array<i64: 16, 1024>}]} {
    %c0 = arith.constant 0 : index
    %c0_0 = arith.constant 0 : index
    %0 = vector.load %arg2[%c0, %c0_0] : memref<1x1024xf32, #tpu.memory_space<vmem>>, vector<1x1024xf32>
    %c0_1 = arith.constant 0 : index
    %c0_2 = arith.constant 0 : index
    %1 = vector.load %arg1[%c0_1, %c0_2] : memref<16x1024xbf16, #tpu.memory_space<vmem>>, vector<16x1024xbf16>
    %c0_3 = arith.constant 0 : index
    %c0_4 = arith.constant 0 : index
    %2 = vector.load %arg3[%c0_3, %c0_4] : memref<8x16xbf16, #tpu.memory_space<vmem>>, vector<8x16xbf16>
    %cst = arith.constant dense<0.000000e+00> : vector<8x1024xf32>
    %3 = tpu.matmul %2, %1, %cst {dimension_numbers = #tpu.dot_dimension_numbers<[1], [0], [0], [1], [0, 0, 1, 1], [], []>} : vector<8x16xbf16>, vector<16x1024xbf16>, vector<8x1024xf32> -> vector<8x1024xf32>
    %c0_5 = arith.constant 0 : index
    %c0_6 = arith.constant 0 : index
    %4 = vector.load %arg4[%c0_5, %c0_6] : memref<8x1xf32, #tpu.memory_space<vmem>>, vector<8x1xf32>
    %5 = vector.broadcast %4 : vector<8x1xf32> to vector<8x1024xf32>
    %6 = arith.addf %3, %5 : vector<8x1024xf32>
    %cst_7 = arith.constant 0.000000e+00 : f32
    %7 = vector.broadcast %cst_7 : f32 to vector<8x1024xf32>
    %8 = arith.maximumf %6, %7 : vector<8x1024xf32>
    %9 = vector.broadcast %0 : vector<1x1024xf32> to vector<8x1024xf32>
    %10 = arith.mulf %8, %9 : vector<8x1024xf32>
    %11 = vector.extract_strided_slice %10 {offsets = [0, 0], sizes = [4, 1024], strides = [1, 1]} : vector<8x1024xf32> to vector<4x1024xf32>
    %c23_i32 = arith.constant 23 : i32
    %12 = tpu.dynamic_rotate %11 by %c23_i32 dim 1 : vector<4x1024xf32>, i32 -> vector<4x1024xf32>
    %c22_i32 = arith.constant 22 : i32
    %13 = tpu.dynamic_rotate %11 by %c22_i32 dim 1 : vector<4x1024xf32>, i32 -> vector<4x1024xf32>
    %c21_i32 = arith.constant 21 : i32
    %14 = tpu.dynamic_rotate %11 by %c21_i32 dim 1 : vector<4x1024xf32>, i32 -> vector<4x1024xf32>
    %c1_i32 = arith.constant 1 : i32
    %15 = tpu.dynamic_rotate %11 by %c1_i32 dim 1 : vector<4x1024xf32>, i32 -> vector<4x1024xf32>
    %c1023_i32 = arith.constant 1023 : i32
    %16 = tpu.dynamic_rotate %11 by %c1023_i32 dim 1 : vector<4x1024xf32>, i32 -> vector<4x1024xf32>
    %c1003_i32 = arith.constant 1003 : i32
    %17 = tpu.dynamic_rotate %11 by %c1003_i32 dim 1 : vector<4x1024xf32>, i32 -> vector<4x1024xf32>
    %c1002_i32 = arith.constant 1002 : i32
    %18 = tpu.dynamic_rotate %11 by %c1002_i32 dim 1 : vector<4x1024xf32>, i32 -> vector<4x1024xf32>
    %c1001_i32 = arith.constant 1001 : i32
    %19 = tpu.dynamic_rotate %11 by %c1001_i32 dim 1 : vector<4x1024xf32>, i32 -> vector<4x1024xf32>
    %20 = tpu.concatenate %12, %13, %14, %15, %11, %16, %17, %18, %19 in 0 : vector<4x1024xf32>, vector<4x1024xf32>, vector<4x1024xf32>, vector<4x1024xf32>, vector<4x1024xf32>, vector<4x1024xf32>, vector<4x1024xf32>, vector<4x1024xf32>, vector<4x1024xf32> -> vector<36x1024xf32>
    %21 = arith.truncf %20 : vector<36x1024xf32> to vector<36x1024xbf16>
    %c0_8 = arith.constant 0 : index
    %c0_9 = arith.constant 0 : index
    %22 = vector.load %arg5[%c0_8, %c0_9] : memref<4x36xbf16, #tpu.memory_space<vmem>>, vector<4x36xbf16>
    %cst_10 = arith.constant dense<0.000000e+00> : vector<4x1024xf32>
    %23 = tpu.matmul %22, %21, %cst_10 {dimension_numbers = #tpu.dot_dimension_numbers<[1], [0], [0], [1], [0, 0, 1, 1], [], []>} : vector<4x36xbf16>, vector<36x1024xbf16>, vector<4x1024xf32> -> vector<4x1024xf32>
    %c0_11 = arith.constant 0 : index
    %c0_12 = arith.constant 0 : index
    %24 = vector.load %arg6[%c0_11, %c0_12] : memref<4x1xf32, #tpu.memory_space<vmem>>, vector<4x1xf32>
    %25 = vector.broadcast %24 : vector<4x1xf32> to vector<4x1024xf32>
    %26 = arith.addf %23, %25 : vector<4x1024xf32>
    %27 = vector.broadcast %0 : vector<1x1024xf32> to vector<4x1024xf32>
    %28 = arith.mulf %26, %27 : vector<4x1024xf32>
    %29 = vector.extract_strided_slice %10 {offsets = [4, 0], sizes = [2, 1024], strides = [1, 1]} : vector<8x1024xf32> to vector<2x1024xf32>
    %c23_i32_13 = arith.constant 23 : i32
    %30 = tpu.dynamic_rotate %29 by %c23_i32_13 dim 1 : vector<2x1024xf32>, i32 -> vector<2x1024xf32>
    %c22_i32_14 = arith.constant 22 : i32
    %31 = tpu.dynamic_rotate %29 by %c22_i32_14 dim 1 : vector<2x1024xf32>, i32 -> vector<2x1024xf32>
    %c21_i32_15 = arith.constant 21 : i32
    %32 = tpu.dynamic_rotate %29 by %c21_i32_15 dim 1 : vector<2x1024xf32>, i32 -> vector<2x1024xf32>
    %c1_i32_16 = arith.constant 1 : i32
    %33 = tpu.dynamic_rotate %29 by %c1_i32_16 dim 1 : vector<2x1024xf32>, i32 -> vector<2x1024xf32>
    %c1023_i32_17 = arith.constant 1023 : i32
    %34 = tpu.dynamic_rotate %29 by %c1023_i32_17 dim 1 : vector<2x1024xf32>, i32 -> vector<2x1024xf32>
    %c1003_i32_18 = arith.constant 1003 : i32
    %35 = tpu.dynamic_rotate %29 by %c1003_i32_18 dim 1 : vector<2x1024xf32>, i32 -> vector<2x1024xf32>
    %c1002_i32_19 = arith.constant 1002 : i32
    %36 = tpu.dynamic_rotate %29 by %c1002_i32_19 dim 1 : vector<2x1024xf32>, i32 -> vector<2x1024xf32>
    %c1001_i32_20 = arith.constant 1001 : i32
    %37 = tpu.dynamic_rotate %29 by %c1001_i32_20 dim 1 : vector<2x1024xf32>, i32 -> vector<2x1024xf32>
    %38 = tpu.concatenate %30, %31, %32, %33, %29, %34, %35, %36, %37 in 0 : vector<2x1024xf32>, vector<2x1024xf32>, vector<2x1024xf32>, vector<2x1024xf32>, vector<2x1024xf32>, vector<2x1024xf32>, vector<2x1024xf32>, vector<2x1024xf32>, vector<2x1024xf32> -> vector<18x1024xf32>
    %39 = arith.truncf %38 : vector<18x1024xf32> to vector<18x1024xbf16>
    %c0_21 = arith.constant 0 : index
    %c0_22 = arith.constant 0 : index
    %40 = vector.load %arg7[%c0_21, %c0_22] : memref<4x18xbf16, #tpu.memory_space<vmem>>, vector<4x18xbf16>
    %cst_23 = arith.constant dense<0.000000e+00> : vector<4x1024xf32>
    %41 = tpu.matmul %40, %39, %cst_23 {dimension_numbers = #tpu.dot_dimension_numbers<[1], [0], [0], [1], [0, 0, 1, 1], [], []>} : vector<4x18xbf16>, vector<18x1024xbf16>, vector<4x1024xf32> -> vector<4x1024xf32>
    %c0_24 = arith.constant 0 : index
    %c0_25 = arith.constant 0 : index
    %42 = vector.load %arg8[%c0_24, %c0_25] : memref<4x1xf32, #tpu.memory_space<vmem>>, vector<4x1xf32>
    %43 = vector.broadcast %42 : vector<4x1xf32> to vector<4x1024xf32>
    %44 = arith.addf %41, %43 : vector<4x1024xf32>
    %cst_26 = arith.constant 0.000000e+00 : f32
    %45 = vector.broadcast %cst_26 : f32 to vector<4x1024xf32>
    %46 = arith.maximumf %44, %45 : vector<4x1024xf32>
    %47 = vector.broadcast %0 : vector<1x1024xf32> to vector<4x1024xf32>
    %48 = arith.mulf %46, %47 : vector<4x1024xf32>
    %c46_i32 = arith.constant 46 : i32
    %49 = tpu.dynamic_rotate %48 by %c46_i32 dim 1 : vector<4x1024xf32>, i32 -> vector<4x1024xf32>
    %c44_i32 = arith.constant 44 : i32
    %50 = tpu.dynamic_rotate %48 by %c44_i32 dim 1 : vector<4x1024xf32>, i32 -> vector<4x1024xf32>
    %c42_i32 = arith.constant 42 : i32
    %51 = tpu.dynamic_rotate %48 by %c42_i32 dim 1 : vector<4x1024xf32>, i32 -> vector<4x1024xf32>
    %c2_i32 = arith.constant 2 : i32
    %52 = tpu.dynamic_rotate %48 by %c2_i32 dim 1 : vector<4x1024xf32>, i32 -> vector<4x1024xf32>
    %c1022_i32 = arith.constant 1022 : i32
    %53 = tpu.dynamic_rotate %48 by %c1022_i32 dim 1 : vector<4x1024xf32>, i32 -> vector<4x1024xf32>
    %c982_i32 = arith.constant 982 : i32
    %54 = tpu.dynamic_rotate %48 by %c982_i32 dim 1 : vector<4x1024xf32>, i32 -> vector<4x1024xf32>
    %c980_i32 = arith.constant 980 : i32
    %55 = tpu.dynamic_rotate %48 by %c980_i32 dim 1 : vector<4x1024xf32>, i32 -> vector<4x1024xf32>
    %c978_i32 = arith.constant 978 : i32
    %56 = tpu.dynamic_rotate %48 by %c978_i32 dim 1 : vector<4x1024xf32>, i32 -> vector<4x1024xf32>
    %57 = tpu.concatenate %49, %50, %51, %52, %48, %53, %54, %55, %56 in 0 : vector<4x1024xf32>, vector<4x1024xf32>, vector<4x1024xf32>, vector<4x1024xf32>, vector<4x1024xf32>, vector<4x1024xf32>, vector<4x1024xf32>, vector<4x1024xf32>, vector<4x1024xf32> -> vector<36x1024xf32>
    %58 = arith.truncf %57 : vector<36x1024xf32> to vector<36x1024xbf16>
    %c0_27 = arith.constant 0 : index
    %c0_28 = arith.constant 0 : index
    %59 = vector.load %arg9[%c0_27, %c0_28] : memref<4x36xbf16, #tpu.memory_space<vmem>>, vector<4x36xbf16>
    %cst_29 = arith.constant dense<0.000000e+00> : vector<4x1024xf32>
    %60 = tpu.matmul %59, %58, %cst_29 {dimension_numbers = #tpu.dot_dimension_numbers<[1], [0], [0], [1], [0, 0, 1, 1], [], []>} : vector<4x36xbf16>, vector<36x1024xbf16>, vector<4x1024xf32> -> vector<4x1024xf32>
    %c0_30 = arith.constant 0 : index
    %c0_31 = arith.constant 0 : index
    %61 = vector.load %arg10[%c0_30, %c0_31] : memref<4x1xf32, #tpu.memory_space<vmem>>, vector<4x1xf32>
    %62 = vector.broadcast %61 : vector<4x1xf32> to vector<4x1024xf32>
    %63 = arith.addf %60, %62 : vector<4x1024xf32>
    %64 = vector.broadcast %0 : vector<1x1024xf32> to vector<4x1024xf32>
    %65 = arith.mulf %63, %64 : vector<4x1024xf32>
    %66 = vector.extract_strided_slice %10 {offsets = [6, 0], sizes = [2, 1024], strides = [1, 1]} : vector<8x1024xf32> to vector<2x1024xf32>
    %c23_i32_32 = arith.constant 23 : i32
    %67 = tpu.dynamic_rotate %66 by %c23_i32_32 dim 1 : vector<2x1024xf32>, i32 -> vector<2x1024xf32>
    %c22_i32_33 = arith.constant 22 : i32
    %68 = tpu.dynamic_rotate %66 by %c22_i32_33 dim 1 : vector<2x1024xf32>, i32 -> vector<2x1024xf32>
    %c21_i32_34 = arith.constant 21 : i32
    %69 = tpu.dynamic_rotate %66 by %c21_i32_34 dim 1 : vector<2x1024xf32>, i32 -> vector<2x1024xf32>
    %c1_i32_35 = arith.constant 1 : i32
    %70 = tpu.dynamic_rotate %66 by %c1_i32_35 dim 1 : vector<2x1024xf32>, i32 -> vector<2x1024xf32>
    %c1023_i32_36 = arith.constant 1023 : i32
    %71 = tpu.dynamic_rotate %66 by %c1023_i32_36 dim 1 : vector<2x1024xf32>, i32 -> vector<2x1024xf32>
    %c1003_i32_37 = arith.constant 1003 : i32
    %72 = tpu.dynamic_rotate %66 by %c1003_i32_37 dim 1 : vector<2x1024xf32>, i32 -> vector<2x1024xf32>
    %c1002_i32_38 = arith.constant 1002 : i32
    %73 = tpu.dynamic_rotate %66 by %c1002_i32_38 dim 1 : vector<2x1024xf32>, i32 -> vector<2x1024xf32>
    %c1001_i32_39 = arith.constant 1001 : i32
    %74 = tpu.dynamic_rotate %66 by %c1001_i32_39 dim 1 : vector<2x1024xf32>, i32 -> vector<2x1024xf32>
    %75 = tpu.concatenate %67, %68, %69, %70, %66, %71, %72, %73, %74 in 0 : vector<2x1024xf32>, vector<2x1024xf32>, vector<2x1024xf32>, vector<2x1024xf32>, vector<2x1024xf32>, vector<2x1024xf32>, vector<2x1024xf32>, vector<2x1024xf32>, vector<2x1024xf32> -> vector<18x1024xf32>
    %76 = arith.truncf %75 : vector<18x1024xf32> to vector<18x1024xbf16>
    %c0_40 = arith.constant 0 : index
    %c0_41 = arith.constant 0 : index
    %77 = vector.load %arg11[%c0_40, %c0_41] : memref<3x18xbf16, #tpu.memory_space<vmem>>, vector<3x18xbf16>
    %cst_42 = arith.constant dense<0.000000e+00> : vector<3x1024xf32>
    %78 = tpu.matmul %77, %76, %cst_42 {dimension_numbers = #tpu.dot_dimension_numbers<[1], [0], [0], [1], [0, 0, 1, 1], [], []>} : vector<3x18xbf16>, vector<18x1024xbf16>, vector<3x1024xf32> -> vector<3x1024xf32>
    %c0_43 = arith.constant 0 : index
    %c0_44 = arith.constant 0 : index
    %79 = vector.load %arg12[%c0_43, %c0_44] : memref<3x1xf32, #tpu.memory_space<vmem>>, vector<3x1xf32>
    %80 = vector.broadcast %79 : vector<3x1xf32> to vector<3x1024xf32>
    %81 = arith.addf %78, %80 : vector<3x1024xf32>
    %cst_45 = arith.constant 0.000000e+00 : f32
    %82 = vector.broadcast %cst_45 : f32 to vector<3x1024xf32>
    %83 = arith.maximumf %81, %82 : vector<3x1024xf32>
    %84 = vector.broadcast %0 : vector<1x1024xf32> to vector<3x1024xf32>
    %85 = arith.mulf %83, %84 : vector<3x1024xf32>
    %c23_i32_46 = arith.constant 23 : i32
    %86 = tpu.dynamic_rotate %85 by %c23_i32_46 dim 1 : vector<3x1024xf32>, i32 -> vector<3x1024xf32>
    %c22_i32_47 = arith.constant 22 : i32
    %87 = tpu.dynamic_rotate %85 by %c22_i32_47 dim 1 : vector<3x1024xf32>, i32 -> vector<3x1024xf32>
    %c21_i32_48 = arith.constant 21 : i32
    %88 = tpu.dynamic_rotate %85 by %c21_i32_48 dim 1 : vector<3x1024xf32>, i32 -> vector<3x1024xf32>
    %c1_i32_49 = arith.constant 1 : i32
    %89 = tpu.dynamic_rotate %85 by %c1_i32_49 dim 1 : vector<3x1024xf32>, i32 -> vector<3x1024xf32>
    %c1023_i32_50 = arith.constant 1023 : i32
    %90 = tpu.dynamic_rotate %85 by %c1023_i32_50 dim 1 : vector<3x1024xf32>, i32 -> vector<3x1024xf32>
    %c1003_i32_51 = arith.constant 1003 : i32
    %91 = tpu.dynamic_rotate %85 by %c1003_i32_51 dim 1 : vector<3x1024xf32>, i32 -> vector<3x1024xf32>
    %c1002_i32_52 = arith.constant 1002 : i32
    %92 = tpu.dynamic_rotate %85 by %c1002_i32_52 dim 1 : vector<3x1024xf32>, i32 -> vector<3x1024xf32>
    %c1001_i32_53 = arith.constant 1001 : i32
    %93 = tpu.dynamic_rotate %85 by %c1001_i32_53 dim 1 : vector<3x1024xf32>, i32 -> vector<3x1024xf32>
    %94 = tpu.concatenate %86, %87, %88, %89, %85, %90, %91, %92, %93 in 0 : vector<3x1024xf32>, vector<3x1024xf32>, vector<3x1024xf32>, vector<3x1024xf32>, vector<3x1024xf32>, vector<3x1024xf32>, vector<3x1024xf32>, vector<3x1024xf32>, vector<3x1024xf32> -> vector<27x1024xf32>
    %95 = arith.truncf %94 : vector<27x1024xf32> to vector<27x1024xbf16>
    %c0_54 = arith.constant 0 : index
    %c0_55 = arith.constant 0 : index
    %96 = vector.load %arg13[%c0_54, %c0_55] : memref<4x27xbf16, #tpu.memory_space<vmem>>, vector<4x27xbf16>
    %cst_56 = arith.constant dense<0.000000e+00> : vector<4x1024xf32>
    %97 = tpu.matmul %96, %95, %cst_56 {dimension_numbers = #tpu.dot_dimension_numbers<[1], [0], [0], [1], [0, 0, 1, 1], [], []>} : vector<4x27xbf16>, vector<27x1024xbf16>, vector<4x1024xf32> -> vector<4x1024xf32>
    %c0_57 = arith.constant 0 : index
    %c0_58 = arith.constant 0 : index
    %98 = vector.load %arg14[%c0_57, %c0_58] : memref<4x1xf32, #tpu.memory_space<vmem>>, vector<4x1xf32>
    %99 = vector.broadcast %98 : vector<4x1xf32> to vector<4x1024xf32>
    %100 = arith.addf %97, %99 : vector<4x1024xf32>
    %cst_59 = arith.constant 0.000000e+00 : f32
    %101 = vector.broadcast %cst_59 : f32 to vector<4x1024xf32>
    %102 = arith.maximumf %100, %101 : vector<4x1024xf32>
    %103 = vector.broadcast %0 : vector<1x1024xf32> to vector<4x1024xf32>
    %104 = arith.mulf %102, %103 : vector<4x1024xf32>
    %c69_i32 = arith.constant 69 : i32
    %105 = tpu.dynamic_rotate %104 by %c69_i32 dim 1 : vector<4x1024xf32>, i32 -> vector<4x1024xf32>
    %c66_i32 = arith.constant 66 : i32
    %106 = tpu.dynamic_rotate %104 by %c66_i32 dim 1 : vector<4x1024xf32>, i32 -> vector<4x1024xf32>
    %c63_i32 = arith.constant 63 : i32
    %107 = tpu.dynamic_rotate %104 by %c63_i32 dim 1 : vector<4x1024xf32>, i32 -> vector<4x1024xf32>
    %c3_i32 = arith.constant 3 : i32
    %108 = tpu.dynamic_rotate %104 by %c3_i32 dim 1 : vector<4x1024xf32>, i32 -> vector<4x1024xf32>
    %c1021_i32 = arith.constant 1021 : i32
    %109 = tpu.dynamic_rotate %104 by %c1021_i32 dim 1 : vector<4x1024xf32>, i32 -> vector<4x1024xf32>
    %c961_i32 = arith.constant 961 : i32
    %110 = tpu.dynamic_rotate %104 by %c961_i32 dim 1 : vector<4x1024xf32>, i32 -> vector<4x1024xf32>
    %c958_i32 = arith.constant 958 : i32
    %111 = tpu.dynamic_rotate %104 by %c958_i32 dim 1 : vector<4x1024xf32>, i32 -> vector<4x1024xf32>
    %c955_i32 = arith.constant 955 : i32
    %112 = tpu.dynamic_rotate %104 by %c955_i32 dim 1 : vector<4x1024xf32>, i32 -> vector<4x1024xf32>
    %113 = tpu.concatenate %105, %106, %107, %108, %104, %109, %110, %111, %112 in 0 : vector<4x1024xf32>, vector<4x1024xf32>, vector<4x1024xf32>, vector<4x1024xf32>, vector<4x1024xf32>, vector<4x1024xf32>, vector<4x1024xf32>, vector<4x1024xf32>, vector<4x1024xf32> -> vector<36x1024xf32>
    %114 = arith.truncf %113 : vector<36x1024xf32> to vector<36x1024xbf16>
    %c0_60 = arith.constant 0 : index
    %c0_61 = arith.constant 0 : index
    %115 = vector.load %arg15[%c0_60, %c0_61] : memref<4x36xbf16, #tpu.memory_space<vmem>>, vector<4x36xbf16>
    %cst_62 = arith.constant dense<0.000000e+00> : vector<4x1024xf32>
    %116 = tpu.matmul %115, %114, %cst_62 {dimension_numbers = #tpu.dot_dimension_numbers<[1], [0], [0], [1], [0, 0, 1, 1], [], []>} : vector<4x36xbf16>, vector<36x1024xbf16>, vector<4x1024xf32> -> vector<4x1024xf32>
    %c0_63 = arith.constant 0 : index
    %c0_64 = arith.constant 0 : index
    %117 = vector.load %arg16[%c0_63, %c0_64] : memref<4x1xf32, #tpu.memory_space<vmem>>, vector<4x1xf32>
    %118 = vector.broadcast %117 : vector<4x1xf32> to vector<4x1024xf32>
    %119 = arith.addf %116, %118 : vector<4x1024xf32>
    %120 = vector.broadcast %0 : vector<1x1024xf32> to vector<4x1024xf32>
    %121 = arith.mulf %119, %120 : vector<4x1024xf32>
    %122 = tpu.concatenate %28, %65, %121 in 0 : vector<4x1024xf32>, vector<4x1024xf32>, vector<4x1024xf32> -> vector<12x1024xf32>
    %123 = arith.truncf %122 : vector<12x1024xf32> to vector<12x1024xbf16>
    %c0_65 = arith.constant 0 : index
    %c0_66 = arith.constant 0 : index
    %124 = vector.load %arg17[%c0_65, %c0_66] : memref<16x12xbf16, #tpu.memory_space<vmem>>, vector<16x12xbf16>
    %cst_67 = arith.constant dense<0.000000e+00> : vector<16x1024xf32>
    %125 = tpu.matmul %124, %123, %cst_67 {dimension_numbers = #tpu.dot_dimension_numbers<[1], [0], [0], [1], [0, 0, 1, 1], [], []>} : vector<16x12xbf16>, vector<12x1024xbf16>, vector<16x1024xf32> -> vector<16x1024xf32>
    %c0_68 = arith.constant 0 : index
    %c0_69 = arith.constant 0 : index
    %126 = vector.load %arg18[%c0_68, %c0_69] : memref<16x1xf32, #tpu.memory_space<vmem>>, vector<16x1xf32>
    %127 = vector.broadcast %126 : vector<16x1xf32> to vector<16x1024xf32>
    %128 = arith.addf %125, %127 : vector<16x1024xf32>
    %c0_70 = arith.constant 0 : index
    %c0_71 = arith.constant 0 : index
    %129 = vector.load %arg19[%c0_70, %c0_71] : memref<16x16xbf16, #tpu.memory_space<vmem>>, vector<16x16xbf16>
    %cst_72 = arith.constant dense<0.000000e+00> : vector<16x1024xf32>
    %130 = tpu.matmul %129, %1, %cst_72 {dimension_numbers = #tpu.dot_dimension_numbers<[1], [0], [0], [1], [0, 0, 1, 1], [], []>} : vector<16x16xbf16>, vector<16x1024xbf16>, vector<16x1024xf32> -> vector<16x1024xf32>
    %c0_73 = arith.constant 0 : index
    %c0_74 = arith.constant 0 : index
    %131 = vector.load %arg20[%c0_73, %c0_74] : memref<16x1xf32, #tpu.memory_space<vmem>>, vector<16x1xf32>
    %132 = vector.broadcast %131 : vector<16x1xf32> to vector<16x1024xf32>
    %133 = arith.addf %130, %132 : vector<16x1024xf32>
    %134 = arith.addf %128, %133 : vector<16x1024xf32>
    %cst_75 = arith.constant 0.000000e+00 : f32
    %135 = vector.broadcast %cst_75 : f32 to vector<16x1024xf32>
    %136 = arith.maximumf %134, %135 : vector<16x1024xf32>
    %c0_76 = arith.constant 0 : index
    %c0_77 = arith.constant 0 : index
    %137 = vector.load %arg21[%c0_76, %c0_77] : memref<16x1024xf32, #tpu.memory_space<vmem>>, vector<16x1024xf32>
    tpu.vector_store %arg21[%c0_76, %c0_77], %136 {strides = array<i32>} : memref<16x1024xf32, #tpu.memory_space<vmem>>, vector<16x1024xf32>,
    return
  }
  func.func @transform_0(%arg0: i32) -> (i32, i32) {
    %c0_i32 = arith.constant 0 : i32
    %c0_i32_0 = arith.constant 0 : i32
    %c0_i32_1 = arith.constant 0 : i32
    return %c0_i32, %c0_i32_0 : i32, i32
  }
  func.func @transform_1(%arg0: i32) -> (i32, i32) {
    %c0_i32 = arith.constant 0 : i32
    %c0_i32_0 = arith.constant 0 : i32
    %c0_i32_1 = arith.constant 0 : i32
    return %c0_i32, %c0_i32_0 : i32, i32
  }
  func.func @transform_2(%arg0: i32) -> (i32, i32) {
    %c0_i32 = arith.constant 0 : i32
    %c0_i32_0 = arith.constant 0 : i32
    %c0_i32_1 = arith.constant 0 : i32
    return %c0_i32, %c0_i32_0 : i32, i32
  }
  func.func @transform_3(%arg0: i32) -> (i32, i32) {
    %c0_i32 = arith.constant 0 : i32
    %c0_i32_0 = arith.constant 0 : i32
    %c0_i32_1 = arith.constant 0 : i32
    return %c0_i32, %c0_i32_0 : i32, i32
  }
  func.func @transform_4(%arg0: i32) -> (i32, i32) {
    %c0_i32 = arith.constant 0 : i32
    %c0_i32_0 = arith.constant 0 : i32
    %c0_i32_1 = arith.constant 0 : i32
    return %c0_i32, %c0_i32_0 : i32, i32
  }
  func.func @transform_5(%arg0: i32) -> (i32, i32) {
    %c0_i32 = arith.constant 0 : i32
    %c0_i32_0 = arith.constant 0 : i32
    %c0_i32_1 = arith.constant 0 : i32
    return %c0_i32, %c0_i32_0 : i32, i32
  }
  func.func @transform_6(%arg0: i32) -> (i32, i32) {
    %c0_i32 = arith.constant 0 : i32
    %c0_i32_0 = arith.constant 0 : i32
    %c0_i32_1 = arith.constant 0 : i32
    return %c0_i32, %c0_i32_0 : i32, i32
  }
  func.func @transform_7(%arg0: i32) -> (i32, i32) {
    %c0_i32 = arith.constant 0 : i32
    %c0_i32_0 = arith.constant 0 : i32
    %c0_i32_1 = arith.constant 0 : i32
    return %c0_i32, %c0_i32_0 : i32, i32
  }
  func.func @transform_8(%arg0: i32) -> (i32, i32) {
    %c0_i32 = arith.constant 0 : i32
    %c0_i32_0 = arith.constant 0 : i32
    %c0_i32_1 = arith.constant 0 : i32
    return %c0_i32, %c0_i32_0 : i32, i32
  }
  func.func @transform_9(%arg0: i32) -> (i32, i32) {
    %c0_i32 = arith.constant 0 : i32
    %c0_i32_0 = arith.constant 0 : i32
    %c0_i32_1 = arith.constant 0 : i32
    return %c0_i32, %c0_i32_0 : i32, i32
  }
  func.func @transform_10(%arg0: i32) -> (i32, i32) {
    %c0_i32 = arith.constant 0 : i32
    %c0_i32_0 = arith.constant 0 : i32
    %c0_i32_1 = arith.constant 0 : i32
    return %c0_i32, %c0_i32_0 : i32, i32
  }
  func.func @transform_11(%arg0: i32) -> (i32, i32) {
    %c0_i32 = arith.constant 0 : i32
    %c0_i32_0 = arith.constant 0 : i32
    %c0_i32_1 = arith.constant 0 : i32
    return %c0_i32, %c0_i32_0 : i32, i32
  }
  func.func @transform_12(%arg0: i32) -> (i32, i32) {
    %c0_i32 = arith.constant 0 : i32
    %c0_i32_0 = arith.constant 0 : i32
    %c0_i32_1 = arith.constant 0 : i32
    return %c0_i32, %c0_i32_0 : i32, i32
  }
  func.func @transform_13(%arg0: i32) -> (i32, i32) {
    %c0_i32 = arith.constant 0 : i32
    %c0_i32_0 = arith.constant 0 : i32
    %c0_i32_1 = arith.constant 0 : i32
    return %c0_i32, %c0_i32_0 : i32, i32
  }
  func.func @transform_14(%arg0: i32) -> (i32, i32) {
    %c0_i32 = arith.constant 0 : i32
    %c0_i32_0 = arith.constant 0 : i32
    %c0_i32_1 = arith.constant 0 : i32
    return %c0_i32, %c0_i32_0 : i32, i32
  }
  func.func @transform_15(%arg0: i32) -> (i32, i32) {
    %c0_i32 = arith.constant 0 : i32
    %c0_i32_0 = arith.constant 0 : i32
    %c0_i32_1 = arith.constant 0 : i32
    return %c0_i32, %c0_i32_0 : i32, i32
  }
  func.func @transform_16(%arg0: i32) -> (i32, i32) {
    %c0_i32 = arith.constant 0 : i32
    %c0_i32_0 = arith.constant 0 : i32
    %c0_i32_1 = arith.constant 0 : i32
    return %c0_i32, %c0_i32_0 : i32, i32
  }
  func.func @transform_17(%arg0: i32) -> (i32, i32) {
    %c0_i32 = arith.constant 0 : i32
    %c0_i32_0 = arith.constant 0 : i32
    %c0_i32_1 = arith.constant 0 : i32
    return %c0_i32, %c0_i32_0 : i32, i32
  }
  func.func @transform_18(%arg0: i32) -> (i32, i32) {
    %c0_i32 = arith.constant 0 : i32
    %c0_i32_0 = arith.constant 0 : i32
    %c0_i32_1 = arith.constant 0 : i32
    return %c0_i32, %c0_i32_0 : i32, i32
  }
  func.func @transform_19(%arg0: i32) -> (i32, i32) {
    %c0_i32 = arith.constant 0 : i32
    %c0_i32_0 = arith.constant 0 : i32
    %c0_i32_1 = arith.constant 0 : i32
    return %c0_i32, %c0_i32_0 : i32, i32
  }
  func.func @transform_20(%arg0: i32) -> (i32, i32) {
    %c0_i32 = arith.constant 0 : i32
    %c0_i32_0 = arith.constant 0 : i32
    %c0_i32_1 = arith.constant 0 : i32
    return %c0_i32, %c0_i32_0 : i32, i32
  }
}

module attributes {stable_mosaic.version = 11 : i64} {
  func.func @_matmul_bias_act_kernel(%arg0: i32, %arg1: memref<4x16xbf16, #tpu.memory_space<vmem>>, %arg2: memref<16x512xbf16, #tpu.memory_space<vmem>>, %arg3: memref<4x1xf32, #tpu.memory_space<vmem>>, %arg4: memref<4x512xbf16, #tpu.memory_space<vmem>>) attributes {dimension_semantics = [#tpu.dimension_semantics<parallel>], iteration_bounds = array<i64: 1>, scalar_prefetch = 0 : i64, scratch_operands = 0 : i64, tpu.core_type = #tpu.core_type<tc>, window_params = [{pipeline_mode = #tpu.pipeline_mode<synchronous>, transform_indices = @transform_0, window_bounds = array<i64: 4, 16>}, {transform_indices = @transform_1, window_bounds = array<i64: 16, 512>}, {pipeline_mode = #tpu.pipeline_mode<synchronous>, transform_indices = @transform_2, window_bounds = array<i64: 4, 1>}, {transform_indices = @transform_3, window_bounds = array<i64: 4, 512>}]} {
    %c0 = arith.constant 0 : index
    %c0_0 = arith.constant 0 : index
    %0 = vector.load %arg1[%c0, %c0_0] : memref<4x16xbf16, #tpu.memory_space<vmem>>, vector<4x16xbf16>
    %c0_1 = arith.constant 0 : index
    %c0_2 = arith.constant 0 : index
    %1 = vector.load %arg2[%c0_1, %c0_2] : memref<16x512xbf16, #tpu.memory_space<vmem>>, vector<16x512xbf16>
    %cst = arith.constant dense<0.000000e+00> : vector<4x512xf32>
    %2 = tpu.matmul %0, %1, %cst {dimension_numbers = #tpu.dot_dimension_numbers<[1], [0], [0], [1], [0, 0, 1, 1], [], []>} : vector<4x16xbf16>, vector<16x512xbf16>, vector<4x512xf32> -> vector<4x512xf32>
    %c0_3 = arith.constant 0 : index
    %c0_4 = arith.constant 0 : index
    %3 = vector.load %arg3[%c0_3, %c0_4] : memref<4x1xf32, #tpu.memory_space<vmem>>, vector<4x1xf32>
    %4 = vector.broadcast %3 : vector<4x1xf32> to vector<4x512xf32>
    %5 = arith.addf %2, %4 : vector<4x512xf32>
    %cst_5 = arith.constant 0.000000e+00 : f32
    %6 = vector.broadcast %cst_5 : f32 to vector<4x512xf32>
    %7 = arith.maximumf %5, %6 : vector<4x512xf32>
    %8 = arith.truncf %7 : vector<4x512xf32> to vector<4x512xbf16>
    %c0_6 = arith.constant 0 : index
    %c0_7 = arith.constant 0 : index
    %9 = vector.load %arg4[%c0_6, %c0_7] : memref<4x512xbf16, #tpu.memory_space<vmem>>, vector<4x512xbf16>
    tpu.vector_store %arg4[%c0_6, %c0_7], %8 {strides = array<i32>} : memref<4x512xbf16, #tpu.memory_space<vmem>>, vector<4x512xbf16>,
    return
  }
  func.func @transform_0(%arg0: i32) -> (i32, i32) {
    %c0_i32 = arith.constant 0 : i32
    %c0_i32_0 = arith.constant 0 : i32
    %c0_i32_1 = arith.constant 0 : i32
    return %c0_i32, %c0_i32_0 : i32, i32
  }
  func.func @transform_1(%arg0: i32) -> (i32, i32) {
    %c0_i32 = arith.constant 0 : i32
    %c0_i32_0 = arith.constant 0 : i32
    return %c0_i32, %arg0 : i32, i32
  }
  func.func @transform_2(%arg0: i32) -> (i32, i32) {
    %c0_i32 = arith.constant 0 : i32
    %c0_i32_0 = arith.constant 0 : i32
    %c0_i32_1 = arith.constant 0 : i32
    return %c0_i32, %c0_i32_0 : i32, i32
  }
  func.func @transform_3(%arg0: i32) -> (i32, i32) {
    %c0_i32 = arith.constant 0 : i32
    %c0_i32_0 = arith.constant 0 : i32
    return %c0_i32, %arg0 : i32, i32
  }
}

module attributes {stable_mosaic.version = 11 : i64} {
  func.func @_matmul_bias_act_kernel(%arg0: i32, %arg1: memref<4x18xbf16, #tpu.memory_space<vmem>>, %arg2: memref<18x512xbf16, #tpu.memory_space<vmem>>, %arg3: memref<4x1xf32, #tpu.memory_space<vmem>>, %arg4: memref<4x512xbf16, #tpu.memory_space<vmem>>) attributes {dimension_semantics = [#tpu.dimension_semantics<parallel>], iteration_bounds = array<i64: 1>, scalar_prefetch = 0 : i64, scratch_operands = 0 : i64, tpu.core_type = #tpu.core_type<tc>, window_params = [{pipeline_mode = #tpu.pipeline_mode<synchronous>, transform_indices = @transform_0, window_bounds = array<i64: 4, 18>}, {transform_indices = @transform_1, window_bounds = array<i64: 18, 512>}, {pipeline_mode = #tpu.pipeline_mode<synchronous>, transform_indices = @transform_2, window_bounds = array<i64: 4, 1>}, {transform_indices = @transform_3, window_bounds = array<i64: 4, 512>}]} {
    %c0 = arith.constant 0 : index
    %c0_0 = arith.constant 0 : index
    %0 = vector.load %arg1[%c0, %c0_0] : memref<4x18xbf16, #tpu.memory_space<vmem>>, vector<4x18xbf16>
    %c0_1 = arith.constant 0 : index
    %c0_2 = arith.constant 0 : index
    %1 = vector.load %arg2[%c0_1, %c0_2] : memref<18x512xbf16, #tpu.memory_space<vmem>>, vector<18x512xbf16>
    %cst = arith.constant dense<0.000000e+00> : vector<4x512xf32>
    %2 = tpu.matmul %0, %1, %cst {dimension_numbers = #tpu.dot_dimension_numbers<[1], [0], [0], [1], [0, 0, 1, 1], [], []>} : vector<4x18xbf16>, vector<18x512xbf16>, vector<4x512xf32> -> vector<4x512xf32>
    %c0_3 = arith.constant 0 : index
    %c0_4 = arith.constant 0 : index
    %3 = vector.load %arg3[%c0_3, %c0_4] : memref<4x1xf32, #tpu.memory_space<vmem>>, vector<4x1xf32>
    %4 = vector.broadcast %3 : vector<4x1xf32> to vector<4x512xf32>
    %5 = arith.addf %2, %4 : vector<4x512xf32>
    %cst_5 = arith.constant 0.000000e+00 : f32
    %6 = vector.broadcast %cst_5 : f32 to vector<4x512xf32>
    %7 = arith.maximumf %5, %6 : vector<4x512xf32>
    %8 = arith.truncf %7 : vector<4x512xf32> to vector<4x512xbf16>
    %c0_6 = arith.constant 0 : index
    %c0_7 = arith.constant 0 : index
    %9 = vector.load %arg4[%c0_6, %c0_7] : memref<4x512xbf16, #tpu.memory_space<vmem>>, vector<4x512xbf16>
    tpu.vector_store %arg4[%c0_6, %c0_7], %8 {strides = array<i32>} : memref<4x512xbf16, #tpu.memory_space<vmem>>, vector<4x512xbf16>,
    return
  }
  func.func @transform_0(%arg0: i32) -> (i32, i32) {
    %c0_i32 = arith.constant 0 : i32
    %c0_i32_0 = arith.constant 0 : i32
    %c0_i32_1 = arith.constant 0 : i32
    return %c0_i32, %c0_i32_0 : i32, i32
  }
  func.func @transform_1(%arg0: i32) -> (i32, i32) {
    %c0_i32 = arith.constant 0 : i32
    %c0_i32_0 = arith.constant 0 : i32
    return %c0_i32, %arg0 : i32, i32
  }
  func.func @transform_2(%arg0: i32) -> (i32, i32) {
    %c0_i32 = arith.constant 0 : i32
    %c0_i32_0 = arith.constant 0 : i32
    %c0_i32_1 = arith.constant 0 : i32
    return %c0_i32, %c0_i32_0 : i32, i32
  }
  func.func @transform_3(%arg0: i32) -> (i32, i32) {
    %c0_i32 = arith.constant 0 : i32
    %c0_i32_0 = arith.constant 0 : i32
    return %c0_i32, %arg0 : i32, i32
  }
}

module attributes {stable_mosaic.version = 11 : i64} {
  func.func @_matmul_bias_act_kernel(%arg0: i32, %arg1: memref<3x18xbf16, #tpu.memory_space<vmem>>, %arg2: memref<18x512xbf16, #tpu.memory_space<vmem>>, %arg3: memref<3x1xf32, #tpu.memory_space<vmem>>, %arg4: memref<3x512xbf16, #tpu.memory_space<vmem>>) attributes {dimension_semantics = [#tpu.dimension_semantics<parallel>], iteration_bounds = array<i64: 1>, scalar_prefetch = 0 : i64, scratch_operands = 0 : i64, tpu.core_type = #tpu.core_type<tc>, window_params = [{pipeline_mode = #tpu.pipeline_mode<synchronous>, transform_indices = @transform_0, window_bounds = array<i64: 3, 18>}, {transform_indices = @transform_1, window_bounds = array<i64: 18, 512>}, {pipeline_mode = #tpu.pipeline_mode<synchronous>, transform_indices = @transform_2, window_bounds = array<i64: 3, 1>}, {transform_indices = @transform_3, window_bounds = array<i64: 3, 512>}]} {
    %c0 = arith.constant 0 : index
    %c0_0 = arith.constant 0 : index
    %0 = vector.load %arg1[%c0, %c0_0] : memref<3x18xbf16, #tpu.memory_space<vmem>>, vector<3x18xbf16>
    %c0_1 = arith.constant 0 : index
    %c0_2 = arith.constant 0 : index
    %1 = vector.load %arg2[%c0_1, %c0_2] : memref<18x512xbf16, #tpu.memory_space<vmem>>, vector<18x512xbf16>
    %cst = arith.constant dense<0.000000e+00> : vector<3x512xf32>
    %2 = tpu.matmul %0, %1, %cst {dimension_numbers = #tpu.dot_dimension_numbers<[1], [0], [0], [1], [0, 0, 1, 1], [], []>} : vector<3x18xbf16>, vector<18x512xbf16>, vector<3x512xf32> -> vector<3x512xf32>
    %c0_3 = arith.constant 0 : index
    %c0_4 = arith.constant 0 : index
    %3 = vector.load %arg3[%c0_3, %c0_4] : memref<3x1xf32, #tpu.memory_space<vmem>>, vector<3x1xf32>
    %4 = vector.broadcast %3 : vector<3x1xf32> to vector<3x512xf32>
    %5 = arith.addf %2, %4 : vector<3x512xf32>
    %cst_5 = arith.constant 0.000000e+00 : f32
    %6 = vector.broadcast %cst_5 : f32 to vector<3x512xf32>
    %7 = arith.maximumf %5, %6 : vector<3x512xf32>
    %8 = arith.truncf %7 : vector<3x512xf32> to vector<3x512xbf16>
    %c0_6 = arith.constant 0 : index
    %c0_7 = arith.constant 0 : index
    %9 = vector.load %arg4[%c0_6, %c0_7] : memref<3x512xbf16, #tpu.memory_space<vmem>>, vector<3x512xbf16>
    tpu.vector_store %arg4[%c0_6, %c0_7], %8 {strides = array<i32>} : memref<3x512xbf16, #tpu.memory_space<vmem>>, vector<3x512xbf16>,
    return
  }
  func.func @transform_0(%arg0: i32) -> (i32, i32) {
    %c0_i32 = arith.constant 0 : i32
    %c0_i32_0 = arith.constant 0 : i32
    %c0_i32_1 = arith.constant 0 : i32
    return %c0_i32, %c0_i32_0 : i32, i32
  }
  func.func @transform_1(%arg0: i32) -> (i32, i32) {
    %c0_i32 = arith.constant 0 : i32
    %c0_i32_0 = arith.constant 0 : i32
    return %c0_i32, %arg0 : i32, i32
  }
  func.func @transform_2(%arg0: i32) -> (i32, i32) {
    %c0_i32 = arith.constant 0 : i32
    %c0_i32_0 = arith.constant 0 : i32
    %c0_i32_1 = arith.constant 0 : i32
    return %c0_i32, %c0_i32_0 : i32, i32
  }
  func.func @transform_3(%arg0: i32) -> (i32, i32) {
    %c0_i32 = arith.constant 0 : i32
    %c0_i32_0 = arith.constant 0 : i32
    return %c0_i32, %arg0 : i32, i32
  }
}

module attributes {stable_mosaic.version = 11 : i64} {
  func.func @_matmul_bias_act_kernel(%arg0: i32, %arg1: memref<4x27xbf16, #tpu.memory_space<vmem>>, %arg2: memref<27x512xbf16, #tpu.memory_space<vmem>>, %arg3: memref<4x1xf32, #tpu.memory_space<vmem>>, %arg4: memref<4x512xbf16, #tpu.memory_space<vmem>>) attributes {dimension_semantics = [#tpu.dimension_semantics<parallel>], iteration_bounds = array<i64: 1>, scalar_prefetch = 0 : i64, scratch_operands = 0 : i64, tpu.core_type = #tpu.core_type<tc>, window_params = [{pipeline_mode = #tpu.pipeline_mode<synchronous>, transform_indices = @transform_0, window_bounds = array<i64: 4, 27>}, {transform_indices = @transform_1, window_bounds = array<i64: 27, 512>}, {pipeline_mode = #tpu.pipeline_mode<synchronous>, transform_indices = @transform_2, window_bounds = array<i64: 4, 1>}, {transform_indices = @transform_3, window_bounds = array<i64: 4, 512>}]} {
    %c0 = arith.constant 0 : index
    %c0_0 = arith.constant 0 : index
    %0 = vector.load %arg1[%c0, %c0_0] : memref<4x27xbf16, #tpu.memory_space<vmem>>, vector<4x27xbf16>
    %c0_1 = arith.constant 0 : index
    %c0_2 = arith.constant 0 : index
    %1 = vector.load %arg2[%c0_1, %c0_2] : memref<27x512xbf16, #tpu.memory_space<vmem>>, vector<27x512xbf16>
    %cst = arith.constant dense<0.000000e+00> : vector<4x512xf32>
    %2 = tpu.matmul %0, %1, %cst {dimension_numbers = #tpu.dot_dimension_numbers<[1], [0], [0], [1], [0, 0, 1, 1], [], []>} : vector<4x27xbf16>, vector<27x512xbf16>, vector<4x512xf32> -> vector<4x512xf32>
    %c0_3 = arith.constant 0 : index
    %c0_4 = arith.constant 0 : index
    %3 = vector.load %arg3[%c0_3, %c0_4] : memref<4x1xf32, #tpu.memory_space<vmem>>, vector<4x1xf32>
    %4 = vector.broadcast %3 : vector<4x1xf32> to vector<4x512xf32>
    %5 = arith.addf %2, %4 : vector<4x512xf32>
    %cst_5 = arith.constant 0.000000e+00 : f32
    %6 = vector.broadcast %cst_5 : f32 to vector<4x512xf32>
    %7 = arith.maximumf %5, %6 : vector<4x512xf32>
    %8 = arith.truncf %7 : vector<4x512xf32> to vector<4x512xbf16>
    %c0_6 = arith.constant 0 : index
    %c0_7 = arith.constant 0 : index
    %9 = vector.load %arg4[%c0_6, %c0_7] : memref<4x512xbf16, #tpu.memory_space<vmem>>, vector<4x512xbf16>
    tpu.vector_store %arg4[%c0_6, %c0_7], %8 {strides = array<i32>} : memref<4x512xbf16, #tpu.memory_space<vmem>>, vector<4x512xbf16>,
    return
  }
  func.func @transform_0(%arg0: i32) -> (i32, i32) {
    %c0_i32 = arith.constant 0 : i32
    %c0_i32_0 = arith.constant 0 : i32
    %c0_i32_1 = arith.constant 0 : i32
    return %c0_i32, %c0_i32_0 : i32, i32
  }
  func.func @transform_1(%arg0: i32) -> (i32, i32) {
    %c0_i32 = arith.constant 0 : i32
    %c0_i32_0 = arith.constant 0 : i32
    return %c0_i32, %arg0 : i32, i32
  }
  func.func @transform_2(%arg0: i32) -> (i32, i32) {
    %c0_i32 = arith.constant 0 : i32
    %c0_i32_0 = arith.constant 0 : i32
    %c0_i32_1 = arith.constant 0 : i32
    return %c0_i32, %c0_i32_0 : i32, i32
  }
  func.func @transform_3(%arg0: i32) -> (i32, i32) {
    %c0_i32 = arith.constant 0 : i32
    %c0_i32_0 = arith.constant 0 : i32
    return %c0_i32, %arg0 : i32, i32
  }
}

module attributes {stable_mosaic.version = 11 : i64} {
  func.func @_matmul_bias_act_kernel(%arg0: i32, %arg1: memref<4x36xbf16, #tpu.memory_space<vmem>>, %arg2: memref<36x512xbf16, #tpu.memory_space<vmem>>, %arg3: memref<4x1xf32, #tpu.memory_space<vmem>>, %arg4: memref<4x512xbf16, #tpu.memory_space<vmem>>) attributes {dimension_semantics = [#tpu.dimension_semantics<parallel>], iteration_bounds = array<i64: 1>, scalar_prefetch = 0 : i64, scratch_operands = 0 : i64, tpu.core_type = #tpu.core_type<tc>, window_params = [{pipeline_mode = #tpu.pipeline_mode<synchronous>, transform_indices = @transform_0, window_bounds = array<i64: 4, 36>}, {transform_indices = @transform_1, window_bounds = array<i64: 36, 512>}, {pipeline_mode = #tpu.pipeline_mode<synchronous>, transform_indices = @transform_2, window_bounds = array<i64: 4, 1>}, {transform_indices = @transform_3, window_bounds = array<i64: 4, 512>}]} {
    %c0 = arith.constant 0 : index
    %c0_0 = arith.constant 0 : index
    %0 = vector.load %arg1[%c0, %c0_0] : memref<4x36xbf16, #tpu.memory_space<vmem>>, vector<4x36xbf16>
    %c0_1 = arith.constant 0 : index
    %c0_2 = arith.constant 0 : index
    %1 = vector.load %arg2[%c0_1, %c0_2] : memref<36x512xbf16, #tpu.memory_space<vmem>>, vector<36x512xbf16>
    %cst = arith.constant dense<0.000000e+00> : vector<4x512xf32>
    %2 = tpu.matmul %0, %1, %cst {dimension_numbers = #tpu.dot_dimension_numbers<[1], [0], [0], [1], [0, 0, 1, 1], [], []>} : vector<4x36xbf16>, vector<36x512xbf16>, vector<4x512xf32> -> vector<4x512xf32>
    %c0_3 = arith.constant 0 : index
    %c0_4 = arith.constant 0 : index
    %3 = vector.load %arg3[%c0_3, %c0_4] : memref<4x1xf32, #tpu.memory_space<vmem>>, vector<4x1xf32>
    %4 = vector.broadcast %3 : vector<4x1xf32> to vector<4x512xf32>
    %5 = arith.addf %2, %4 : vector<4x512xf32>
    %6 = arith.truncf %5 : vector<4x512xf32> to vector<4x512xbf16>
    %c0_5 = arith.constant 0 : index
    %c0_6 = arith.constant 0 : index
    %7 = vector.load %arg4[%c0_5, %c0_6] : memref<4x512xbf16, #tpu.memory_space<vmem>>, vector<4x512xbf16>
    tpu.vector_store %arg4[%c0_5, %c0_6], %6 {strides = array<i32>} : memref<4x512xbf16, #tpu.memory_space<vmem>>, vector<4x512xbf16>,
    return
  }
  func.func @transform_0(%arg0: i32) -> (i32, i32) {
    %c0_i32 = arith.constant 0 : i32
    %c0_i32_0 = arith.constant 0 : i32
    %c0_i32_1 = arith.constant 0 : i32
    return %c0_i32, %c0_i32_0 : i32, i32
  }
  func.func @transform_1(%arg0: i32) -> (i32, i32) {
    %c0_i32 = arith.constant 0 : i32
    %c0_i32_0 = arith.constant 0 : i32
    return %c0_i32, %arg0 : i32, i32
  }
  func.func @transform_2(%arg0: i32) -> (i32, i32) {
    %c0_i32 = arith.constant 0 : i32
    %c0_i32_0 = arith.constant 0 : i32
    %c0_i32_1 = arith.constant 0 : i32
    return %c0_i32, %c0_i32_0 : i32, i32
  }
  func.func @transform_3(%arg0: i32) -> (i32, i32) {
    %c0_i32 = arith.constant 0 : i32
    %c0_i32_0 = arith.constant 0 : i32
    return %c0_i32, %arg0 : i32, i32
  }
}

module attributes {stable_mosaic.version = 11 : i64} {
  func.func @_head_kernel(%arg0: i32, %arg1: memref<16x12xbf16, #tpu.memory_space<vmem>>, %arg2: memref<16x16xbf16, #tpu.memory_space<vmem>>, %arg3: memref<12x512xbf16, #tpu.memory_space<vmem>>, %arg4: memref<16x512xbf16, #tpu.memory_space<vmem>>, %arg5: memref<16x1xf32, #tpu.memory_space<vmem>>, %arg6: memref<16x1xf32, #tpu.memory_space<vmem>>, %arg7: memref<16x512xf32, #tpu.memory_space<vmem>>) attributes {dimension_semantics = [#tpu.dimension_semantics<parallel>], iteration_bounds = array<i64: 1>, scalar_prefetch = 0 : i64, scratch_operands = 0 : i64, tpu.core_type = #tpu.core_type<tc>, window_params = [{pipeline_mode = #tpu.pipeline_mode<synchronous>, transform_indices = @transform_0, window_bounds = array<i64: 16, 12>}, {pipeline_mode = #tpu.pipeline_mode<synchronous>, transform_indices = @transform_1, window_bounds = array<i64: 16, 16>}, {transform_indices = @transform_2, window_bounds = array<i64: 12, 512>}, {transform_indices = @transform_3, window_bounds = array<i64: 16, 512>}, {pipeline_mode = #tpu.pipeline_mode<synchronous>, transform_indices = @transform_4, window_bounds = array<i64: 16, 1>}, {pipeline_mode = #tpu.pipeline_mode<synchronous>, transform_indices = @transform_5, window_bounds = array<i64: 16, 1>}, {transform_indices = @transform_6, window_bounds = array<i64: 16, 512>}]} {
    %c0 = arith.constant 0 : index
    %c0_0 = arith.constant 0 : index
    %0 = vector.load %arg1[%c0, %c0_0] : memref<16x12xbf16, #tpu.memory_space<vmem>>, vector<16x12xbf16>
    %c0_1 = arith.constant 0 : index
    %c0_2 = arith.constant 0 : index
    %1 = vector.load %arg3[%c0_1, %c0_2] : memref<12x512xbf16, #tpu.memory_space<vmem>>, vector<12x512xbf16>
    %cst = arith.constant dense<0.000000e+00> : vector<16x512xf32>
    %2 = tpu.matmul %0, %1, %cst {dimension_numbers = #tpu.dot_dimension_numbers<[1], [0], [0], [1], [0, 0, 1, 1], [], []>} : vector<16x12xbf16>, vector<12x512xbf16>, vector<16x512xf32> -> vector<16x512xf32>
    %c0_3 = arith.constant 0 : index
    %c0_4 = arith.constant 0 : index
    %3 = vector.load %arg5[%c0_3, %c0_4] : memref<16x1xf32, #tpu.memory_space<vmem>>, vector<16x1xf32>
    %4 = vector.broadcast %3 : vector<16x1xf32> to vector<16x512xf32>
    %5 = arith.addf %2, %4 : vector<16x512xf32>
    %c0_5 = arith.constant 0 : index
    %c0_6 = arith.constant 0 : index
    %6 = vector.load %arg2[%c0_5, %c0_6] : memref<16x16xbf16, #tpu.memory_space<vmem>>, vector<16x16xbf16>
    %c0_7 = arith.constant 0 : index
    %c0_8 = arith.constant 0 : index
    %7 = vector.load %arg4[%c0_7, %c0_8] : memref<16x512xbf16, #tpu.memory_space<vmem>>, vector<16x512xbf16>
    %cst_9 = arith.constant dense<0.000000e+00> : vector<16x512xf32>
    %8 = tpu.matmul %6, %7, %cst_9 {dimension_numbers = #tpu.dot_dimension_numbers<[1], [0], [0], [1], [0, 0, 1, 1], [], []>} : vector<16x16xbf16>, vector<16x512xbf16>, vector<16x512xf32> -> vector<16x512xf32>
    %c0_10 = arith.constant 0 : index
    %c0_11 = arith.constant 0 : index
    %9 = vector.load %arg6[%c0_10, %c0_11] : memref<16x1xf32, #tpu.memory_space<vmem>>, vector<16x1xf32>
    %10 = vector.broadcast %9 : vector<16x1xf32> to vector<16x512xf32>
    %11 = arith.addf %8, %10 : vector<16x512xf32>
    %12 = arith.addf %5, %11 : vector<16x512xf32>
    %cst_12 = arith.constant 0.000000e+00 : f32
    %13 = vector.broadcast %cst_12 : f32 to vector<16x512xf32>
    %14 = arith.maximumf %12, %13 : vector<16x512xf32>
    %c0_13 = arith.constant 0 : index
    %c0_14 = arith.constant 0 : index
    %15 = vector.load %arg7[%c0_13, %c0_14] : memref<16x512xf32, #tpu.memory_space<vmem>>, vector<16x512xf32>
    tpu.vector_store %arg7[%c0_13, %c0_14], %14 {strides = array<i32>} : memref<16x512xf32, #tpu.memory_space<vmem>>, vector<16x512xf32>,
    return
  }
  func.func @transform_0(%arg0: i32) -> (i32, i32) {
    %c0_i32 = arith.constant 0 : i32
    %c0_i32_0 = arith.constant 0 : i32
    %c0_i32_1 = arith.constant 0 : i32
    return %c0_i32, %c0_i32_0 : i32, i32
  }
  func.func @transform_1(%arg0: i32) -> (i32, i32) {
    %c0_i32 = arith.constant 0 : i32
    %c0_i32_0 = arith.constant 0 : i32
    %c0_i32_1 = arith.constant 0 : i32
    return %c0_i32, %c0_i32_0 : i32, i32
  }
  func.func @transform_2(%arg0: i32) -> (i32, i32) {
    %c0_i32 = arith.constant 0 : i32
    %c0_i32_0 = arith.constant 0 : i32
    return %c0_i32, %arg0 : i32, i32
  }
  func.func @transform_3(%arg0: i32) -> (i32, i32) {
    %c0_i32 = arith.constant 0 : i32
    %c0_i32_0 = arith.constant 0 : i32
    return %c0_i32, %arg0 : i32, i32
  }
  func.func @transform_4(%arg0: i32) -> (i32, i32) {
    %c0_i32 = arith.constant 0 : i32
    %c0_i32_0 = arith.constant 0 : i32
    %c0_i32_1 = arith.constant 0 : i32
    return %c0_i32, %c0_i32_0 : i32, i32
  }
  func.func @transform_5(%arg0: i32) -> (i32, i32) {
    %c0_i32 = arith.constant 0 : i32
    %c0_i32_0 = arith.constant 0 : i32
    %c0_i32_1 = arith.constant 0 : i32
    return %c0_i32, %c0_i32_0 : i32, i32
  }
  func.func @transform_6(%arg0: i32) -> (i32, i32) {
    %c0_i32 = arith.constant 0 : i32
    %c0_i32_0 = arith.constant 0 : i32
    return %c0_i32, %arg0 : i32, i32
  }
}

</mosaic_0001>

<bundles_post_ra>
// kernel: basic_rfb_fused.1
= control target key start
LH: loop header
LB: loop body
LE: loop exit
PB: predicated region body
PF: predicated region fallthrough
CT: control target
= control target key end

     0   :  { %v9409_v3 = vmov 0   ;;  %vm9491_vm0 = vcmask 130048   ;;  %v299_v19 = vlaneseq  ;;  %s5523_s29 = smov 1   ;;  %s5524_s30 = smov 22   ;;  %vm645_vm5 = vcmask 1043456   ;;  %s9385_s0 = inlined_call_operand.vmem [shape: bf16[16,1024], index: 0, kind: input, shape index: {}]   ;;  %s9386_s3 = inlined_call_operand.vmem [shape: f32[8,1], index: 3, kind: input, shape index: {}]   ;;  %s9387_s2 = inlined_call_operand.vmem [shape: bf16[8,16], index: 2, kind: input, shape index: {}]   ;;  %s9388_s1 = inlined_call_operand.vmem [shape: f32[1,1024], index: 1, kind: input, shape index: {}]   ;;  %s9389_s7 = inlined_call_operand.vmem [shape: f32[4,1], index: 7, kind: input, shape index: {}]   ;;  %s9390_s4 = inlined_call_operand.vmem [shape: bf16[4,36], index: 4, kind: input, shape index: {}]   ;;  %s9391_s6 = inlined_call_operand.vmem [shape: bf16[4,18], index: 6, kind: input, shape index: {}]   ;;  %s9392_s11 = inlined_call_operand.vmem [shape: f32[3,1], index: 11, kind: input, shape index: {}]   ;;  %s9393_s8 = inlined_call_operand.vmem [shape: bf16[4,36], index: 8, kind: input, shape index: {}]   ;;  %s9394_s10 = inlined_call_operand.vmem [shape: bf16[3,18], index: 10, kind: input, shape index: {}]   ;;  %s9395_s13 = inlined_call_operand.vmem [shape: f32[4,1], index: 13, kind: input, shape index: {}]   ;;  %s9396_s12 = inlined_call_operand.vmem [shape: bf16[4,27], index: 12, kind: input, shape index: {}]   ;;  %s9397_s9 = inlined_call_operand.vmem [shape: f32[4,1], index: 9, kind: input, shape index: {}]   ;;  %s9398_s15 = inlined_call_operand.vmem [shape: f32[4,1], index: 15, kind: input, shape index: {}]   ;;  %s9399_s17 = inlined_call_operand.vmem [shape: f32[16,1], index: 17, kind: input, shape index: {}]   ;;  %s9400_s5 = inlined_call_operand.vmem [shape: f32[4,1], index: 5, kind: input, shape index: {}]   ;;  %s9401_s19 = inlined_call_operand.vmem [shape: f32[16,1], index: 19, kind: input, shape index: {}]   ;;  %s9402_s14 = inlined_call_operand.vmem [shape: bf16[4,36], index: 14, kind: input, shape index: {}]   ;;  %s9403_s16 = inlined_call_operand.vmem [shape: bf16[16,12], index: 16, kind: input, shape index: {}]   ;;  %s9404_s18 = inlined_call_operand.vmem [shape: bf16[16,16], index: 18, kind: input, shape index: {}]   ;;  %s9405_s20 = inlined_call_operand.vmem [shape: f32[16,1024], index: 20, kind: output, shape index: {}]  }
   0x1   :  { %9572 = sst [smem:[#allocation46_spill]] %s9385_s0  ;;  %158 = vmatprep.mubr.bf16.mxu0 %v9409_v3  ;;  %199 = vmatprep.mubr.bf16.mxu1 %v9409_v3  ;;  %s5525_s0 = smov 21   ;;  %vm713_vm10 = vcmask 1041408   ;;  %vm9499_vm11 = vcmask 1045504   ;;  %vm9493_vm12 = vcmask 1040384   ;;  %vm709_vm13 = vcmask 293888  }
   0x2   :  { %9573 = sst [smem:[#allocation47_spill]] %s9386_s3  ;;  %s9577_s23 = sld [smem:[#allocation46_spill]]  ;;  %4598 = vset.pattern.permute.xlu0 %v9409_v3  ;;  %4909 = vset.pattern.permute.xlu1 %v9409_v3  ;;  %v5720_v20 = vshrl.u32 %v299_v19, 7  ;;  %vm9492_vm14 = vcmask 146432  }
   0x3   :  { %9574 = sst [smem:[#allocation48_spill]] %s9387_s2  ;;  %s9584_s25 = sld [smem:[#allocation47_spill]] }
   0x4   :  { %9575 = sst [smem:[#allocation49_spill]] %s9388_s1  ;;  %s9585_s27 = sld [smem:[#allocation48_spill]]  ;;  %v321_v21 = vsub.s32 5, %v5720_v20  ;;  %v309_v25 = vsub.s32 2, %v5720_v20  ;;  %v313_v26 = vsub.s32 3, %v5720_v20  ;;  %v301_v28 = vsub.s32 0, %v5720_v20 }
   0x5   :  { %9576 = sst [smem:[#allocation50_spill]] %s9389_s7  ;;  %s9588_s7 = sld [smem:[#allocation49_spill]]  ;;  %v305_v32 = vsub.s32 1, %v5720_v20 }
   0x6   :  { %s5526_s21 = smov 23   ;;  %s5527_s3 = smov 106  }
   0x7   :  { %s5528_s22 = smov 127   ;;  %s5529_s24 = smov 107  }
   0x8   :  { %v67_v0 = vld [vmem:[%s9577_s23] sm:$0xff]  ;;  %v68_v2 = vld [vmem:[%s9577_s23 + $0x8] sm:$0xff]  ;;  %v69_v7 = vld [vmem:[%s9577_s23 + $0x10] sm:$0xff]  ;;  %s5530_s2 = smov 105   ;;  %s9607_s26 = sld [smem:[#allocation50_spill]] }
   0x9   :  { %v71_v1 = vld [vmem:[%s9577_s23 + $0x20] sm:$0xff]  ;;  %v72_v5 = vld [vmem:[%s9577_s23 + $0x28] sm:$0xff]  ;;  %v73_v10 = vld [vmem:[%s9577_s23 + $0x30] sm:$0xff]  ;;  %s5534_s1 = smov 86  }
   0xa   :  { %v5664_v4 = vcombine.high %v67_v0, %v71_v1  ;;  %v5669_v6 = vcombine.low %v67_v0, %v71_v1  ;;  %v5676_v8 = vcombine.high %v68_v2, %v72_v5  ;;  %v5678_v9 = vcombine.low %v68_v2, %v72_v5  ;;  %v70_v11 = vld [vmem:[%s9577_s23 + $0x18] sm:$0xff]  ;;  %v76_v15 = vld [vmem:[%s9584_s25] sm:$0xff]  ;;  %s5533_s25 = smov 126  }
   0xb   :  { %v74_v12 = vld [vmem:[%s9577_s23 + $0x38] sm:$0xff]  ;;  %v5690_v13 = vcombine.high %v69_v7, %v73_v10  ;;  %v75_v16 = vld [vmem:[%s9585_s27] sm:$0xf]  ;;  %v5702_v17 = vcombine.low %v69_v7, %v73_v10  ;;  %79 = vperm.xlu0 %4598, %v76_v15   ;;  %v317_v15 = vsub.s32 4, %v5720_v20  ;;  %s5536_s27 = smov 2   ;;  %s5537_s23 = smov 46  }
   0xc   :  { %9578 = vst [vmem:[#allocation2_spill] sm:$0xff] %v5664_v4  ;;  %9579 = vst [vmem:[#allocation3_spill] sm:$0xff] %v5669_v6  ;;  %126 = vmatprep.subr.bf16.mxu0 %v5664_v4  ;;  %v5692_v14 = vcombine.high %v70_v11, %v74_v12  ;;  %167 = vmatprep.subr.bf16.mxu1 %v5676_v8  ;;  %v5706_v18 = vcombine.low %v70_v11, %v74_v12  ;;  %v5726_v22 = vld [vmem:[%s9588_s7] sm:$0xff]  ;;  %s5532_s7 = smov 84  }
   0xd   :  { %9580 = vst [vmem:[#allocation4_spill] sm:$0xff] %v5676_v8  ;;  %9581 = vst [vmem:[#allocation5_spill] sm:$0xff] %v5678_v9  ;;  %127 = vmatpush1.bf16.msra.mxu0 %v5669_v6  ;;  %168 = vmatpush1.bf16.msra.mxu1 %v5678_v9  ;;  %v5729_v23 = vrot.slane %v5726_v22, %v321_v21  ;;  %v5740_v34 = vrot.slane %v5726_v22, %v309_v25  ;;  %v325_v25 = vsub.s32 6, %v5720_v20 }
   0xe   :  { %9582 = vst [vmem:[#allocation6_spill] sm:$0xff] %v5690_v13  ;;  %9583 = vst [vmem:[#allocation7_spill] sm:$0xff] %v5692_v14  ;;  %208 = vmatprep.subr.bf16.mxu0 %v5690_v13  ;;  %249 = vmatprep.subr.bf16.mxu1 %v5692_v14  ;;  %v5745_v39 = vrot.slane %v5726_v22, %v313_v26  ;;  %v5748_v42 = vrot.slane %v5726_v22, %v301_v28 }
   0xf   :  { %9586 = vst [vmem:[#allocation8_spill] sm:$0xff] %v5702_v17  ;;  %9587 = vst [vmem:[#allocation9_spill] sm:$0xff] %v5706_v18  ;;  %v5751_v47 = vrot.slane %v5726_v22, %v305_v32  ;;  %v5812_v21 = vrot.slane %v5726_v22, %v317_v15  ;;  %v5824_v28 = vrot.slane %v5726_v22, %v325_v25 }
  0x10   :  { %4462 = vmatmul.mubr.msk.bf16.vlgmr.msra.gmra.mrb[0].mxu0 %vm9491_vm0, %v75_v16  ;;  %4463 = vmatmul.mubr.msk.bf16.vlgmr.msra.gmra.mrb[0].mxu1 %vm9491_vm0, %v75_v16  ;;  %9589 = vst [vmem:[#allocation10_spill] sm:$0xff] %v5729_v23  ;;  %9590 = vst [vmem:[#allocation11_spill] sm:$0xff] %v5740_v34 }
  0x11   :  { %209 = vmatpush1.bf16.msra.mxu0 %v5702_v17  ;;  %250 = vmatpush1.bf16.msra.mxu1 %v5706_v18  ;;  %9591 = vst [vmem:[#allocation12_spill] sm:$0xff] %v5745_v39  ;;  %9592 = vst [vmem:[#allocation13_spill] sm:$0xff] %v5748_v42 }
  0x12   :  { %240 = vmatprep.mubr.bf16.mxu0 %v9409_v3  ;;  %281 = vmatprep.mubr.bf16.mxu1 %v9409_v3  ;;  %9593 = vst [vmem:[#allocation14_spill] sm:$0xff] %v5751_v47  ;;  %9596 = vst [vmem:[#allocation17_spill] sm:$0xff] %v5812_v21 }
  0x13   :  { %9597 = vst [vmem:[#allocation18_spill] sm:$0xff] %v5824_v28 }
  0x18   :  { %4464 = vmatmul.mubr.msk.bf16.vlgmr.msra.gmra.mrb[4].mxu0 %vm9491_vm0, %v75_v16  ;;  %4465 = vmatmul.mubr.msk.bf16.vlgmr.msra.gmra.mrb[4].mxu1 %vm9491_vm0, %v75_v16 }
  0x19   :  { %770 = vmatprep.mubr.bf16.mxu0 %v9409_v3  ;;  %811 = vmatprep.mubr.bf16.mxu1 %v9409_v3 }
  0x8a   :  { %v5731_v24 = vpop.permute.xlu0 %79 }
  0xe3   :  { %v160_v27 = vpop.f32.mrb[0].mxu0  ;;  %v201_v30 = vpop.f32.mrb[0].mxu1 }
  0xe4   :  { %v161_v29 = vadd.f32 %v160_v27, %v5731_v24  ;;  %v162_v31 = vpop.f32.mrb[1].mxu0  ;;  %v202_v33 = vadd.f32 %v201_v30, %v5731_v24  ;;  %v203_v36 = vpop.f32.mrb[1].mxu1 }
  0xe5   :  { %v163_v35 = vadd.f32 %v162_v31, %v5731_v24  ;;  %v164_v37 = vpop.f32.mrb[2].mxu0  ;;  %v204_v38 = vadd.f32 %v203_v36, %v5731_v24  ;;  %v205_v40 = vpop.f32.mrb[2].mxu1 }
  0xe6   :  { %v165_v41 = vpop.f32.mrb[3].mxu0  ;;  %v292_v43 = vmax.f32 %v202_v33, 0.0  ;;  %v206_v44 = vpop.f32.mrb[3].mxu1  ;;  %v290_v45 = vmax.f32 %v161_v29, 0.0  ;;  %v329_v29 = vsub.s32 7, %v5720_v20 }
  0xe7   :  { %v291_v46 = vmax.f32 %v163_v35, 0.0  ;;  %v293_v48 = vmax.f32 %v204_v38, 0.0 }
  0xe8   :  { %v5754_v49 = vmul.f32 %v5740_v34, %v292_v43  ;;  %v5760_v52 = vmul.f32 %v5748_v42, %v290_v45  ;;  %v5833_v33 = vrot.slane %v5726_v22, %v329_v29 }
  0xe9   :  { %v5757_v50 = vmul.f32 %v5745_v39, %v293_v48  ;;  %v5763_v53 = vmul.f32 %v5751_v47, %v291_v46 }
  0xea   :  { %v5784_v0 = vrot.slane %v5760_v52, 4  ;;  %v5787_v1 = vrot.slane %v5754_v49, 4  ;;  %9598 = vst [vmem:[#allocation19_spill] sm:$0xff] %v5833_v33 }
  0xeb   :  { %v242_v51 = vpop.f32.mrb[4].mxu0  ;;  %v283_v54 = vpop.f32.mrb[4].mxu1  ;;  %v4604_v56 = vpack.i.bf16 %v5757_v50, %v5754_v49  ;;  %v4614_v62 = vpack.i.bf16 %v5760_v52, %v5763_v53  ;;  %v4644_v63 = vpack.i.bf16 %v5763_v53, %v5754_v49  ;;  %v5790_v2 = vrot.slane %v5757_v50, 4 }
  0xec   :  { %v5765_v55 = vpop.f32.mrb[5].mxu0  ;;  %v285_v57 = vpop.f32.mrb[5].mxu1  ;;  %9594 = vst [vmem:[#allocation15_spill] sm:$0xff] %v5784_v0  ;;  %v5793_v5 = vrot.slane %v5763_v53, 4  ;;  %v243_v12 = vadd.f32 %v242_v51, %v5731_v24  ;;  %v284_v27 = vadd.f32 %v283_v54, %v5731_v24 }
  0xed   :  { %v246_v58 = vpop.f32.mrb[6].mxu0  ;;  %4605 = vrot.lane.b32.xlu1 %v4604_v56, %s5523_s29  ;;  %4600 = vrot.lane.b32.xlu0 %v4604_v56, %s5524_s30  ;;  %v287_v60 = vpop.f32.mrb[6].mxu1  ;;  %9595 = vst [vmem:[#allocation16_spill] sm:$0xff] %v5790_v2  ;;  %v4659_v7 = vpack.i.bf16 %v5790_v2, %v5787_v1  ;;  %v286_v31 = vadd.f32 %v285_v57, %v5731_v24 }
  0xee   :  { %v247_v59 = vpop.f32.mrb[7].mxu0  ;;  %v288_v61 = vpop.f32.mrb[7].mxu1  ;;  %v4664_v10 = vpack.i.bf16 %v5784_v0, %v5793_v5  ;;  %v4674_v11 = vpack.i.bf16 %v5793_v5, %v5787_v1  ;;  %v294_v16 = vmax.f32 %v243_v12, 0.0  ;;  %v296_v30 = vmax.f32 %v284_v27, 0.0 }
  0xef   :  { %v297_v36 = vmax.f32 %v286_v31, 0.0  ;;  %v245_v22 = vadd.f32 %v5765_v55, %v5731_v24  ;;  %v5949_v31 = vrot.slane %v5760_v52, 6 }
  0xf0   :  { %v5818_v26 = vmul.f32 %v5812_v21, %v294_v16  ;;  %v5836_v35 = vmul.f32 %v5824_v28, %v296_v30 }
  0xf1   :  { %4615 = vrot.lane.b32.xlu0 %v4614_v62, %s5523_s29  ;;  %4610 = vrot.lane.b32.xlu1 %v4614_v62, %s5524_s30  ;;  %v5841_v20 = vmul.f32 %v5833_v33, %v297_v36  ;;  %v295_v41 = vmax.f32 %v245_v22, 0.0  ;;  %9603 = vst [vmem:[#allocation24_spill] sm:$0xff] %v5949_v31 }
  0xf2   :  { %v4719_v32 = vpack.i.bf16 %v5818_v26, %v5757_v50  ;;  %v4744_v37 = vpack.i.bf16 %v5790_v2, %v5836_v35  ;;  %v4734_v38 = vpack.i.bf16 %v5760_v52, %v5818_v26  ;;  %v4739_v43 = vpack.i.bf16 %v5836_v35, %v5763_v53 }
  0xf3   :  { %v4754_v40 = vpack.i.bf16 %v5836_v35, %v5841_v20  ;;  %v5860_v24 = vmul.f32 %v5729_v23, %v295_v41  ;;  %v4769_v44 = vpack.i.bf16 %v5841_v20, %v5760_v52  ;;  %v5877_v48 = vrot.slane %v5818_v26, 4 }
  0xf4   :  { %v5894_v57 = vrot.slane %v5841_v20, 4  ;;  %v5897_v58 = vrot.slane %v5836_v35, 4 }
  0xf5   :  { %4625 = vrot.lane.b32.xlu0 %v4604_v56, %s5525_s0  ;;  %4620 = vrot.lane.b32.xlu1 %v4604_v56, %s5526_s21  ;;  %v4779_v45 = vpack.i.bf16 %v5818_v26, %v5860_v24  ;;  %v4809_v46 = vpack.i.bf16 %v5860_v24, %v5836_v35  ;;  %9599 = vst [vmem:[#allocation20_spill] sm:$0xff] %v5877_v48  ;;  %v5908_v61 = vrot.slane %v5860_v24, 4 }
  0xf6   :  { %v4819_v51 = vpack.i.bf16 %v5877_v48, %v5790_v2  ;;  %v4814_v54 = vpack.i.bf16 %v5860_v24, %v5841_v20  ;;  %v4824_v55 = vpack.i.bf16 %v5860_v24, %v5877_v48  ;;  %9600 = vst [vmem:[#allocation21_spill] sm:$0xff] %v5894_v57  ;;  %9601 = vst [vmem:[#allocation22_spill] sm:$0xff] %v5897_v58 }
  0xf7   :  { %v4844_v59 = vpack.i.bf16 %v5894_v57, %v5784_v0  ;;  %v4839_v60 = vpack.i.bf16 %v5897_v58, %v5894_v57  ;;  %9602 = vst [vmem:[#allocation23_spill] sm:$0xff] %v5908_v61 }
  0xf9   :  { %4635 = vrot.lane.b32.xlu0 %v4614_v62, %s5525_s0  ;;  %4630 = vrot.lane.b32.xlu1 %v4614_v62, %s5526_s21  ;;  %v4864_v62 = vpack.i.bf16 %v5877_v48, %v5908_v61 }
  0xfd   :  { %4645 = vrot.lane.b32.xlu0 %v4644_v63, %s5527_s3  ;;  %4640 = vrot.lane.b32.xlu1 %v4644_v63, %s5528_s22 }
 0x101   :  { %4650 = vrot.lane.b32.xlu0 %v4644_v63, %s5529_s24  ;;  %4655 = vrot.lane.b32.xlu1 %v4604_v56, %s5530_s2  ;;  %v4834_v56 = vpack.i.bf16 %v5784_v0, %v5877_v48  ;;  %v4874_v63 = vpack.i.bf16 %v5908_v61, %v5897_v58 }
 0x105   :  { %4660 = vrot.lane.b32.xlu0 %v4659_v7, %s5524_s30  ;;  %4665 = vrot.lane.b32.xlu1 %v4664_v10, %s5524_s30 }
 0x109   :  { %4670 = vrot.lane.b32.xlu0 %v4659_v7, %s5525_s0  ;;  %4675 = vrot.lane.b32.xlu1 %v4674_v11, %s5528_s22 }
 0x10d   :  { %4685 = vrot.lane.b32.xlu0 %v4664_v10, %s5525_s0  ;;  %4680 = vrot.lane.b32.xlu1 %v4659_v7, %s5526_s21 }
 0x111   :  { %4695 = vrot.lane.b32.xlu0 %v4674_v11, %s5529_s24  ;;  %4690 = vrot.lane.b32.xlu1 %v4659_v7, %s5523_s29 }
 0x115   :  { %4700 = vrot.lane.b32.xlu0 %v4664_v10, %s5526_s21  ;;  %4705 = vrot.lane.b32.xlu1 %v4664_v10, %s5523_s29 }
 0x119   :  { %4710 = vrot.lane.b32.xlu0 %v4674_v11, %s5527_s3  ;;  %4720 = vrot.lane.b32.xlu1 %v4719_v32, %s5528_s22 }
 0x11d   :  { %4715 = vrot.lane.b32.xlu0 %v4659_v7, %s5530_s2  ;;  %4730 = vrot.lane.b32.xlu1 %v4719_v32, %s5529_s24  ;;  %v5923_v7 = vand.u32 127, %v299_v19 }
 0x11f   :  { %vm9502_vm1 = vcmp.lt.s32.totalorder %v5923_v7, 1  ;;  %vm9498_vm2 = vcmp.lt.s32.totalorder %v5923_v7, 22  ;;  %vm415_vm3 = vcmp.lt.s32.totalorder %v5923_v7, 21  ;;  %vm365_vm4 = vcmp.lt.s32.totalorder %v5923_v7, 23 }
 0x120   :  { %vm9494_vm6 = vcmp.lt.s32.totalorder %v5923_v7, 106  ;;  %vm465_vm7 = vcmp.lt.s32.totalorder %v5923_v7, 127  ;;  %vm490_vm8 = vcmp.lt.s32.totalorder %v5923_v7, 107  ;;  %vm540_vm9 = vcmp.lt.s32.totalorder %v5923_v7, 105 }
 0x121   :  { %4725 = vrot.lane.b32.xlu0 %v4719_v32, %s5527_s3  ;;  %4745 = vrot.lane.b32.xlu1 %v4744_v37, %s5529_s24  ;;  %vm1592_vm15 = vcmp.lt.s32.totalorder %v5923_v7, 44  ;;  %vm1642_vm0 = vcmp.lt.s32.totalorder %v5923_v7, 2 }
 0x125   :  { %4735 = vrot.lane.b32.xlu0 %v4734_v38, %s5530_s2  ;;  %4755 = vrot.lane.b32.xlu1 %v4754_v40, %s5523_s29 }
 0x129   :  { %4740 = vrot.lane.b32.xlu0 %v4739_v43, %s5530_s2  ;;  %4760 = vrot.lane.b32.xlu1 %v4754_v40, %s5526_s21  ;;  %v4904_v43 = vpack.i.bf16 %v5897_v58, %v5793_v5 }
 0x12d   :  { %4750 = vrot.lane.b32.xlu0 %v4754_v40, %s5524_s30  ;;  %4770 = vrot.lane.b32.xlu1 %v4769_v44, %s5528_s22 }
 0x131   :  { %4765 = vrot.lane.b32.xlu0 %v4754_v40, %s5525_s0  ;;  %4780 = vrot.lane.b32.xlu1 %v4779_v45, %s5524_s30 }
 0x135   :  { %4775 = vrot.lane.b32.xlu0 %v4769_v44, %s5527_s3  ;;  %4790 = vrot.lane.b32.xlu1 %v4769_v44, %s5529_s24  ;;  %v5972_v44 = vrot.slane %v5763_v53, 6 }
 0x137   :  { %9604 = vst [vmem:[#allocation25_spill] sm:$0xff] %v5972_v44 }
 0x139   :  { %4785 = vrot.lane.b32.xlu0 %v4779_v45, %s5523_s29  ;;  %4800 = vrot.lane.b32.xlu1 %v4779_v45, %s5525_s0 }
 0x13d   :  { %4795 = vrot.lane.b32.xlu0 %v4779_v45, %s5526_s21  ;;  %4810 = vrot.lane.b32.xlu1 %v4809_v46, %s5527_s3  ;;  %v5975_v45 = vrot.slane %v5754_v49, 6 }
 0x13f   :  { %9605 = vst [vmem:[#allocation26_spill] sm:$0xff] %v5975_v45 }
 0x141   :  { %4805 = vrot.lane.b32.xlu0 %v4809_v46, %s5528_s22  ;;  %4820 = vrot.lane.b32.xlu1 %v4819_v51, %s5528_s22 }
 0x145   :  { %4815 = vrot.lane.b32.xlu0 %v4814_v54, %s5530_s2  ;;  %4830 = vrot.lane.b32.xlu1 %v4819_v51, %s5527_s3 }
 0x149   :  { %4825 = vrot.lane.b32.xlu0 %v4824_v55, %s5529_s24  ;;  %4835 = vrot.lane.b32.xlu1 %v4834_v56, %s5530_s2 }
 0x14d   :  { %4845 = vrot.lane.b32.xlu0 %v4844_v59, %s5528_s22  ;;  %4840 = vrot.lane.b32.xlu1 %v4839_v60, %s5524_s30 }
 0x151   :  { %4855 = vrot.lane.b32.xlu0 %v4844_v59, %s5529_s24  ;;  %4850 = vrot.lane.b32.xlu1 %v4839_v60, %s5525_s0 }
 0x155   :  { %4865 = vrot.lane.b32.xlu0 %v4864_v62, %s5524_s30  ;;  %4860 = vrot.lane.b32.xlu1 %v4839_v60, %s5526_s21 }
 0x159   :  { %4875 = vrot.lane.b32.xlu0 %v4874_v63, %s5528_s22  ;;  %4870 = vrot.lane.b32.xlu1 %v4839_v60, %s5523_s29 }
 0x15d   :  { %4885 = vrot.lane.b32.xlu0 %v4864_v62, %s5525_s0  ;;  %4880 = vrot.lane.b32.xlu1 %v4844_v59, %s5527_s3 }
 0x15f   :  { %v5925_v10 = vpop.permute.xlu1 %4605  ;;  %v5927_v11 = vpop.permute.xlu0 %4600 }
 0x160   :  { %v9407_v12 = vunpack.i.h.bf16 %v5925_v10  ;;  %v4607_v15 = vunpack.i.l.bf16 %v5925_v10  ;;  %v9408_v16 = vunpack.i.h.bf16 %v5927_v11  ;;  %v4602_v25 = vunpack.i.l.bf16 %v5927_v11 }
 0x161   :  { %4895 = vrot.lane.b32.xlu0 %v4864_v62, %s5526_s21  ;;  %4890 = vrot.lane.b32.xlu1 %v4874_v63, %s5529_s24 }
 0x162   :  { %v445_v32 = vsel %vm9502_vm1, %v4607_v15, %v9407_v12  ;;  %v395_v36 = vsel %vm9498_vm2, %v4602_v25, %v9408_v16 }
 0x163   :  { %v5937_v19 = vpop.permute.xlu0 %4615  ;;  %v5939_v27 = vpop.permute.xlu1 %4610  ;;  %v584_v56 = vrot.slane %v445_v32, 4  ;;  %v560_v59 = vrot.slane %v395_v36, 4 }
 0x164   :  { %v9414_v29 = vunpack.i.h.bf16 %v5937_v19  ;;  %v4617_v30 = vunpack.i.l.bf16 %v5937_v19  ;;  %v9412_v37 = vunpack.i.h.bf16 %v5939_v27  ;;  %v4612_v22 = vunpack.i.l.bf16 %v5939_v27 }
 0x165   :  { %1090 = vrot.lane.b32.xlu0 %v5897_v58, %s5527_s3  ;;  %4900 = vrot.lane.b32.xlu1 %v4864_v62, %s5523_s29  ;;  %v5987_v62 = vrot.slane %v5757_v50, 6 }
 0x166   :  { %v447_v38 = vsel %vm9502_vm1, %v9414_v29, %v4617_v30  ;;  %v446_v60 = vsel %vm9502_vm1, %v4617_v30, %v4607_v15  ;;  %v396_v63 = vsel %vm9498_vm2, %v4612_v22, %v4602_v25  ;;  %v397_v32 = vsel %vm9498_vm2, %v9412_v37, %v4612_v22 }
 0x167   :  { %v5965_v40 = vpop.permute.xlu0 %4625  ;;  %v5967_v41 = vpop.permute.xlu1 %4620  ;;  %9606 = vst [vmem:[#allocation27_spill] sm:$0xff] %v5987_v62  ;;  %v582_v36 = vrot.slane %v447_v38, 4  ;;  %v4915_v22 = vpack.i.bf16 %v5975_v45, %v5972_v44  ;;  %v583_v38 = vrot.slane %v446_v60, 4  ;;  %v558_v29 = vrot.slane %v397_v32, 4 }
 0x168   :  { %v9413_v46 = vunpack.i.h.bf16 %v5965_v40  ;;  %v4627_v51 = vunpack.i.l.bf16 %v5965_v40  ;;  %v9411_v54 = vunpack.i.h.bf16 %v5967_v41  ;;  %v4622_v55 = vunpack.i.l.bf16 %v5967_v41 }
 0x169   :  { %1088 = vrot.lane.b32.xlu0 %v5908_v61, %s5527_s3  ;;  %4905 = vrot.lane.b32.xlu1 %v4904_v43, %s5530_s2  ;;  %v559_v18 = vrot.slane %v396_v63, 4 }
 0x16a   :  { %v370_v15 = vsel %vm365_vm4, %v4622_v55, %v9411_v54  ;;  %v420_v30 = vsel %vm415_vm3, %v4627_v51, %v9413_v46 }
 0x16b   :  { %v6003_v43 = vpop.permute.xlu0 %4635  ;;  %v6005_v12 = vpop.permute.xlu1 %4630  ;;  %v649_v25 = vsel %vm645_vm5, %v370_v15, %v560_v59  ;;  %v657_v16 = vsel %vm645_vm5, %v420_v30, %v584_v56  ;;  %v1336_v30 = vld [vmem:[%s9607_s26] sm:$0xf]  ;;  %s5535_s26 = smov 44  }
 0x16c   :  { %v9418_v3 = vunpack.i.h.bf16 %v6003_v43  ;;  %v4637_v54 = vunpack.i.l.bf16 %v6003_v43  ;;  %v9417_v37 = vunpack.i.h.bf16 %v6005_v12  ;;  %v4632_v46 = vunpack.i.l.bf16 %v6005_v12 }
 0x16d   :  { %1112 = vrot.lane.b32.xlu0 %v5908_v61, %s5530_s2  ;;  %1116 = vrot.lane.b32.xlu1 %v5894_v57, %s5530_s2  ;;  %v681_v56 = vpack.c.bf16 %v657_v16, %v649_v25 }
 0x16e   :  { %v421_v59 = vsel %vm415_vm3, %v4637_v54, %v4627_v51  ;;  %v371_v15 = vsel %vm365_vm4, %v4632_v46, %v4622_v55  ;;  %v372_v60 = vsel %vm365_vm4, %v9417_v37, %v4632_v46  ;;  %v422_v16 = vsel %vm415_vm3, %v9418_v3, %v4637_v54 }
 0x16f   :  { %779 = vmatprep.subr.bf16.mxu1 %v681_v56  ;;  %v6034_v63 = vpop.permute.xlu0 %4645  ;;  %v6036_v51 = vpop.permute.xlu1 %4640  ;;  %v647_v55 = vsel %vm645_vm5, %v372_v60, %v558_v29  ;;  %v655_v32 = vsel %vm645_vm5, %v422_v16, %v582_v36  ;;  %v648_v25 = vsel %vm645_vm5, %v371_v15, %v559_v18  ;;  %v656_v17 = vsel %vm645_vm5, %v421_v59, %v583_v38 }
 0x170   :  { %v679_v46 = vpack.c.bf16 %v655_v32, %v647_v55  ;;  %v680_v37 = vpack.c.bf16 %v656_v17, %v648_v25  ;;  %v6049_v29 = vpack.i.bf16 %v5987_v62, %v5949_v31  ;;  %v6053_v18 = vpack.i.bf16 %v5972_v44, %v5949_v31 }
 0x171   :  { %4916 = vrot.lane.b32.xlu0 %v4915_v22, %s5528_s22  ;;  %1339 = vperm.xlu1 %4909, %v1336_v30   ;;  %v6068_v36 = vrot.slane %v5818_v26, 6  ;;  %v6075_v15 = vrot.slane %v5841_v20, 6  ;;  %v9427_v30 = vunpack.i.h.bf16 %v6036_v51  ;;  %v9428_v60 = vunpack.i.l.bf16 %v6036_v51 }
 0x172   :  { %738 = vmatprep.subr.bf16.mxu0 %v679_v46  ;;  %780 = vmatpush1.bf16.msra.mxu1 %v680_v37  ;;  %9608 = vst [vmem:[#allocation28_spill] sm:$0xff] %v6053_v18  ;;  %v6103_v3 = vrot.slane %v5860_v24, 6  ;;  %v9619_v31 = vunpack.i.l.bf16 %v6034_v63  ;;  %v9620_v44 = vunpack.i.h.bf16 %v6034_v63 }
 0x173   :  { %v6043_v54 = vpop.permute.xlu0 %4650  ;;  %v6045_v56 = vpop.permute.xlu1 %4655  ;;  %9611 = vst [vmem:[#allocation31_spill] sm:$0xff] %v6068_v36  ;;  %9613 = vst [vmem:[#allocation33_spill] sm:$0xff] %v6075_v15  ;;  %v6085_v16 = vpack.i.bf16 %v6068_v36, %v5987_v62  ;;  %v6096_v46 = vpack.i.bf16 %v5975_v45, %v6075_v15  ;;  %v471_v25 = vsel %vm465_vm7, %v9427_v30, %v9428_v60 }
 0x174   :  { %9616 = vst [vmem:[#allocation36_spill] sm:$0xff] %v6103_v3  ;;  %v521_v30 = vsel %vm9494_vm6, %v9620_v44, %v9619_v31  ;;  %v6139_v9 = vpack.i.bf16 %v6103_v3, %v6068_v36  ;;  %v606_v31 = vrot.slane %v471_v25, 4  ;;  %v9625_v36 = vunpack.i.l.bf16 %v6045_v56 }
 0x175   :  { %4926 = vrot.lane.b32.xlu0 %v6049_v29, %s5528_s22  ;;  %4911 = vrot.lane.b32.xlu1 %v6053_v18, %s5524_s30  ;;  %v630_v62 = vrot.slane %v521_v30, 4  ;;  %v9626_v44 = vunpack.i.l.bf16 %v6043_v54  ;;  %v9627_v30 = vunpack.i.h.bf16 %v6043_v54 }
 0x177   :  { %v6059_v17 = vpop.permute.xlu0 %4660  ;;  %v6061_v37 = vpop.permute.xlu1 %4665  ;;  %v496_v15 = vsel %vm490_vm8, %v9627_v30, %v9626_v44 }
 0x178   :  { %9609 = vst [vmem:[#allocation29_spill] sm:$0xff] %v6059_v17  ;;  %9610 = vst [vmem:[#allocation30_spill] sm:$0xff] %v6061_v37  ;;  %v4662_v14 = vunpack.i.l.bf16 %v6059_v17  ;;  %v4667_v60 = vunpack.i.l.bf16 %v6061_v37  ;;  %v9628_v23 = vunpack.i.h.bf16 %v6059_v17  ;;  %v6206_v34 = vsel %vm645_vm5, %v496_v15, %v630_v62 }
 0x179   :  { %4936 = vrot.lane.b32.xlu0 %v6053_v18, %s5526_s21  ;;  %4921 = vrot.lane.b32.xlu1 %v6053_v18, %s5525_s0 }
 0x17a   :  { %v979_v28 = vsel %vm9498_vm2, %v4667_v60, %v4662_v14 }
 0x17b   :  { %v6070_v38 = vpop.permute.xlu0 %4670  ;;  %v6072_v59 = vpop.permute.xlu1 %4675 }
 0x17c   :  { %9612 = vst [vmem:[#allocation32_spill] sm:$0xff] %v6070_v38  ;;  %v9630_v33 = vunpack.i.h.bf16 %v6072_v59  ;;  %v9634_v48 = vunpack.i.h.bf16 %v6070_v38 }
 0x17d   :  { %4956 = vrot.lane.b32.xlu0 %v4915_v22, %s5527_s3  ;;  %4931 = vrot.lane.b32.xlu1 %v4915_v22, %s5529_s24  ;;  %v6112_v22 = vrot.slane %v5836_v35, 6 }
 0x17f   :  { %v6087_v55 = vpop.permute.xlu0 %4685  ;;  %v6089_v32 = vpop.permute.xlu1 %4680  ;;  %9617 = vst [vmem:[#allocation37_spill] sm:$0xff] %v6112_v22  ;;  %v6149_v45 = vpack.i.bf16 %v6112_v22, %v6103_v3  ;;  %v978_v3 = vsel %vm9498_vm2, %v4662_v14, %v9628_v23  ;;  %v9631_v23 = vunpack.i.h.bf16 %v6061_v37 }
 0x180   :  { %9614 = vst [vmem:[#allocation34_spill] sm:$0xff] %v6087_v55  ;;  %9615 = vst [vmem:[#allocation35_spill] sm:$0xff] %v6089_v32  ;;  %v4687_v47 = vunpack.i.l.bf16 %v6087_v55  ;;  %v1137_v30 = vrot.slane %v978_v3, 6 }
 0x181   :  { %4961 = vrot.lane.b32.xlu0 %v6085_v16, %s5525_s0  ;;  %4941 = vrot.lane.b32.xlu1 %v6085_v16, %s5524_s30  ;;  %9623 = vst [vmem:[#allocation41_spill] sm:$0xff] %v6149_v45  ;;  %v6189_v22 = vsel %vm9498_vm2, %v9631_v23, %v4667_v60 }
 0x183   :  { %v6118_v8 = vpop.permute.xlu0 %4695  ;;  %v6120_v4 = vpop.permute.xlu1 %4690 }
 0x184   :  { %9618 = vst [vmem:[#allocation38_spill] sm:$0xff] %v6120_v4  ;;  %v9632_v61 = vunpack.i.l.bf16 %v6118_v8 }
 0x185   :  { %4971 = vrot.lane.b32.xlu0 %v6085_v16, %s5526_s21  ;;  %4946 = vrot.lane.b32.xlu1 %v6053_v18, %s5523_s29  ;;  %v9624_v18 = vunpack.i.h.bf16 %v6045_v56 }
 0x187   :  { %v6143_v13 = vpop.permute.xlu0 %4700  ;;  %v6145_v6 = vpop.permute.xlu1 %4705  ;;  %v6157_v25 = vsel %vm540_vm9, %v9625_v36, %v9624_v18  ;;  %v4672_v18 = vunpack.i.l.bf16 %v6070_v38  ;;  %v9629_v36 = vunpack.i.l.bf16 %v6072_v59 }
 0x188   :  { %9621 = vst [vmem:[#allocation39_spill] sm:$0xff] %v6143_v13  ;;  %9622 = vst [vmem:[#allocation40_spill] sm:$0xff] %v6145_v6  ;;  %v4702_v23 = vunpack.i.l.bf16 %v6143_v13  ;;  %v4707_v17 = vunpack.i.l.bf16 %v6145_v6 }
 0x189   :  { %v1051_v44 = vsel %vm465_vm7, %v9630_v33, %v9629_v36  ;;  %4981 = vrot.lane.b32.xlu0 %v6096_v46, %s5524_s30  ;;  %4951 = vrot.lane.b32.xlu1 %v6049_v29, %s5529_s24  ;;  %v4682_v33 = vunpack.i.l.bf16 %v6089_v32  ;;  %v6195_v36 = vsel %vm645_vm5, %v5763_v53, %v606_v31  ;;  %v9633_v53 = vunpack.i.h.bf16 %v6118_v8 }
 0x18a   :  { %v1207_v21 = vrot.slane %v1051_v44, 6  ;;  %v1135_v31 = vrot.slane %v6189_v22, 6  ;;  %v6221_v62 = vsel %vm415_vm3, %v4672_v18, %v9634_v48  ;;  %v6225_v15 = vsel %vm415_vm3, %v4687_v47, %v4672_v18 }
 0x18b   :  { %v6199_v42 = vpop.permute.xlu0 %4710  ;;  %v6201_v39 = vpop.permute.xlu1 %4720  ;;  %v1075_v3 = vsel %vm490_vm8, %v9633_v53, %v9632_v61  ;;  %v9635_v44 = vunpack.i.h.bf16 %v6087_v55  ;;  %v9636_v22 = vunpack.i.h.bf16 %v6089_v32  ;;  %v4692_v53 = vunpack.i.l.bf16 %v6120_v4 }
 0x18c   :  { %v4722_v60 = vunpack.i.l.bf16 %v6201_v39  ;;  %v1231_v14 = vrot.slane %v1075_v3, 4  ;;  %v1136_v32 = vrot.slane %v979_v28, 6  ;;  %v9637_v18 = vunpack.i.h.bf16 %v6201_v39 }
 0x18d   :  { %v6231_v61 = vsel %vm415_vm3, %v9635_v44, %v4687_v47  ;;  %4986 = vrot.lane.b32.xlu0 %v6096_v46, %s5525_s0  ;;  %4966 = vrot.lane.b32.xlu1 %v6049_v29, %s5527_s3  ;;  %v954_v48 = vsel %vm365_vm4, %v4682_v33, %v9636_v22  ;;  %v1296_v3 = vsel %vm713_vm10, %v5793_v5, %v1207_v21  ;;  %v1160_v44 = vrot.slane %v6225_v15, 4 }
 0x18e   :  { %v469_v38 = vsel %vm465_vm7, %v4722_v60, %v9637_v18  ;;  %v1159_v47 = vrot.slane %v6231_v61, 4  ;;  %v9638_v28 = vunpack.i.h.bf16 %v6120_v4  ;;  %v955_v5 = vsel %vm365_vm4, %v4702_v23, %v4682_v33 }
 0x18f   :  { %v6247_v58 = vpop.permute.xlu0 %4715  ;;  %v6249_v29 = vpop.permute.xlu1 %4730  ;;  %v9639_v21 = vunpack.i.l.bf16 %v6036_v51  ;;  %v1273_v61 = vsel %vm713_vm10, %v954_v48, %v1137_v30  ;;  %v9640_v22 = vunpack.i.h.bf16 %v6143_v13  ;;  %v9641_v57 = vunpack.i.l.bf16 %v6199_v42 }
 0x190   :  { %v6270_v18 = vsel %vm9502_vm1, %v4692_v53, %v9638_v28  ;;  %v9642_v28 = vunpack.i.h.bf16 %v6199_v42  ;;  %v608_v33 = vrot.slane %v469_v38, 4  ;;  %v1304_v30 = vsel %vm645_vm5, %v1296_v3, %v1231_v14 }
 0x191   :  { %4991 = vrot.lane.b32.xlu0 %v6139_v9, %s5528_s22  ;;  %4976 = vrot.lane.b32.xlu1 %v6085_v16, %s5523_s29  ;;  %v470_v15 = vsel %vm465_vm7, %v9639_v21, %v4722_v60  ;;  %v956_v16 = vsel %vm365_vm4, %v9640_v22, %v4702_v23  ;;  %v4732_v48 = vunpack.i.l.bf16 %v6249_v29  ;;  %v1272_v21 = vsel %vm713_vm10, %v955_v5, %v1136_v32 }
 0x192   :  { %v1099_v4 = vsel %vm9494_vm6, %v9642_v28, %v9641_v57  ;;  %v1027_v57 = vsel %vm9502_vm1, %v4707_v17, %v4692_v53  ;;  %v9643_v38 = vunpack.i.h.bf16 %v6145_v6  ;;  %v607_v13 = vrot.slane %v470_v15, 4 }
 0x193   :  { %v6289_v0 = vpop.permute.xlu0 %4725  ;;  %v6291_v55 = vpop.permute.xlu1 %4745  ;;  %v9644_v53 = vunpack.i.l.bf16 %v6034_v63  ;;  %v1255_v5 = vrot.slane %v1099_v4, 2  ;;  %v1271_v3 = vsel %vm713_vm10, %v956_v16, %v1135_v31  ;;  %v9645_v14 = vunpack.i.l.bf16 %v6043_v54 }
 0x194   :  { %v9469_v23 = vunpack.i.h.bf16 %v6289_v0  ;;  %v4727_v22 = vunpack.i.l.bf16 %v6289_v0  ;;  %v1028_v28 = vsel %vm9502_vm1, %v9643_v38, %v4707_v17  ;;  %v9646_v37 = vunpack.i.h.bf16 %v6249_v29 }
 0x195   :  { %5006 = vrot.lane.b32.xlu0 %v6139_v9, %s5529_s24  ;;  %4996 = vrot.lane.b32.xlu1 %v6096_v46, %s5526_s21  ;;  %v664_v16 = vsel %vm645_vm5, %v5754_v49, %v607_v13  ;;  %v9649_v13 = vunpack.i.h.bf16 %v6045_v56 }
 0x196   :  { %v519_v32 = vsel %vm9494_vm6, %v4727_v22, %v9469_v23  ;;  %v520_v17 = vsel %vm9494_vm6, %v9644_v53, %v4727_v22  ;;  %v495_v23 = vsel %vm490_vm8, %v9645_v14, %v4732_v48  ;;  %v494_v4 = vsel %vm490_vm8, %v4732_v48, %v9646_v37 }
 0x197   :  { %v631_v15 = vrot.slane %v520_v17, 4  ;;  %v632_v38 = vrot.slane %v519_v32, 4  ;;  %v6319_v60 = vpop.permute.xlu0 %4735  ;;  %v6321_v6 = vpop.permute.xlu1 %4755  ;;  %v665_v22 = vsel %vm645_vm5, %v5757_v50, %v608_v33  ;;  %v1185_v32 = vrot.slane %v6270_v18, 2 }
 0x198   :  { %v9472_v2 = vunpack.i.l.bf16 %v6319_v60  ;;  %v1183_v37 = vrot.slane %v1028_v28, 2  ;;  %v9647_v50 = vunpack.i.h.bf16 %v6247_v58  ;;  %v9648_v18 = vunpack.i.l.bf16 %v6247_v58 }
 0x199   :  { %5011 = vrot.lane.b32.xlu0 %v6139_v9, %s5527_s3  ;;  %5001 = vrot.lane.b32.xlu1 %v6096_v46, %s5523_s29  ;;  %v673_v31 = vsel %vm645_vm5, %v494_v4, %v632_v38  ;;  %v672_v14 = vsel %vm645_vm5, %v495_v23, %v631_v15  ;;  %v1184_v33 = vrot.slane %v1027_v57, 2  ;;  %v9473_v46 = vunpack.i.h.bf16 %v6291_v55 }
 0x19a   :  { %v689_v48 = vpack.c.bf16 %v673_v31, %v665_v22  ;;  %v688_v53 = vpack.c.bf16 %v672_v14, %v664_v16  ;;  %v1122_v9 = vsel %vm540_vm9, %v9648_v18, %v9647_v50  ;;  %v544_v49 = vsel %vm540_vm9, %v9649_v13, %v9472_v2 }
 0x19b   :  { %v6351_v17 = vpop.permute.xlu0 %4740  ;;  %v6353_v38 = vpop.permute.xlu1 %4760  ;;  %v1279_v23 = vsel %vm645_vm5, %v1271_v3, %v1159_v47  ;;  %v4757_v28 = vunpack.i.l.bf16 %v6321_v6  ;;  %v9650_v57 = vpack.c.bf16 %v6157_v25, %v6157_v25  ;;  %v1280_v4 = vsel %vm645_vm5, %v1272_v21, %v1160_v44 }
 0x19c   :  { %781 = vmatprep.subr.bf16.mxu1 %v689_v48  ;;  %v6369_v22 = vsel %vm9499_vm11, %v1304_v30, %v1255_v5  ;;  %v9475_v31 = vunpack.i.h.bf16 %v6321_v6  ;;  %v697_v47 = vpack.c.bf16 %v544_v49, %v544_v49  ;;  %v9651_v3 = vrot.slane %v6221_v62, 4 }
 0x19d   :  { %v721_v15 = vsel %vm713_vm10, %v9650_v57, 0  ;;  %5016 = vrot.lane.b32.xlu1 %v6149_v45, %s5524_s30  ;;  %782 = vmatpush1.bf16.msra.mxu1 %v688_v53  ;;  %v1329_v14 = vpack.c.bf16 %v1122_v9, %v1122_v9  ;;  %v4742_v25 = vunpack.i.l.bf16 %v6351_v17  ;;  %v6384_v21 = vsel %vm9499_vm11, %v1279_v23, %v1183_v37 }
 0x19e   :  { %v1281_v16 = vsel %vm645_vm5, %v1273_v61, %v9651_v3  ;;  %9652 = vst [vmem:[#allocation42_spill] sm:$0xff] %v6384_v21  ;;  %v9653_v5 = vunpack.i.l.bf16 %v6118_v8  ;;  %v9474_v61 = vunpack.i.h.bf16 %v6319_v60  ;;  %4468 = vmatprep.subr.msk.bf16.mxu1 %vm713_vm10, %v697_v47  ;;  %v9654_v50 = vunpack.i.h.bf16 %v5937_v19  ;;  %v6421_v19 = vld [vmem:[%s9390_s4] sm:$0x3]  ;;  %s5538_s4 = smov 42  }
 0x19f   :  { %v6381_v30 = vsel %vm9499_vm11, %v1281_v16, %v1185_v32  ;;  %v6396_v48 = vpop.permute.xlu0 %4750  ;;  %v6398_v53 = vpop.permute.xlu1 %4770  ;;  %v6401_v32 = vsel %vm9499_vm11, %v1280_v4, %v1184_v33  ;;  %v441_v33 = vsel %vm9502_vm1, %v9475_v31, %v4757_v28  ;;  %v4762_v57 = vunpack.i.l.bf16 %v6353_v38 }
 0x1a0   :  { %v6392_v62 = vsel %vm490_vm8, %v9653_v5, %v9473_v46  ;;  %v448_v18 = vsel %vm9502_vm1, %v4757_v28, %v9654_v50  ;;  %v9476_v9 = vunpack.i.h.bf16 %v6396_v48  ;;  %v4752_v13 = vunpack.i.l.bf16 %v6396_v48 }
 0x1a1   :  { %v4772_v49 = vunpack.i.l.bf16 %v6398_v53  ;;  %784 = vmatpush1.bf16.msra.mxu1 %v721_v15  ;;  %v6424_v4 = vsel %vm9493_vm12, %v1329_v14, 0  ;;  %v9655_v3 = vunpack.i.h.bf16 %v5939_v27  ;;  %v9477_v28 = vunpack.i.h.bf16 %v6398_v53 }
 0x1a2   :  { %v547_v15 = vsel %vm540_vm9, %v9474_v61, %v4742_v25  ;;  %v581_v5 = vrot.slane %v448_v18, 4  ;;  %v9481_v50 = vunpack.i.h.bf16 %v6353_v38  ;;  %v391_v14 = vsel %vm9498_vm2, %v9476_v9, %v4752_v13 }
 0x1a3   :  { %v398_v16 = vsel %vm9498_vm2, %v4752_v13, %v9655_v3  ;;  %v9656_v27 = vunpack.i.h.bf16 %v6036_v51  ;;  %v6445_v37 = vpop.permute.xlu0 %4765  ;;  %v4781_v2 = vpop.permute.xlu1 %4780  ;;  %v588_v47 = vrot.slane %v441_v33, 4  ;;  %v9657_v18 = vunpack.i.l.bf16 %v6045_v56 }
 0x1a4   :  { %v557_v46 = vrot.slane %v398_v16, 4  ;;  %v4767_v61 = vunpack.i.l.bf16 %v6445_v37  ;;  %4469 = vmatmul.mubr.msk.bf16.vlgmr.msra.gmra.mrb[8].mxu1 %vm709_vm13, %v6421_v19  ;;  %v9658_v13 = vunpack.i.h.bf16 %v6005_v12  ;;  %v694_v16 = vpack.c.bf16 %v547_v15, %v547_v15 }
 0x1a5   :  { %v472_v3 = vsel %vm465_vm7, %v4772_v49, %v9656_v27  ;;  %v6452_v23 = vsel %vm540_vm9, %v4742_v25, %v9657_v18  ;;  %v9659_v31 = vmov 0   ;;  %v564_v56 = vrot.slane %v391_v14, 4 }
 0x1a6   :  { %v373_v27 = vsel %vm365_vm4, %v4762_v57, %v9658_v13  ;;  %893 = vmatprep.mubr.bf16.mxu1 %v9659_v31  ;;  %v473_v25 = vsel %vm465_vm7, %v9477_v28, %v4772_v49  ;;  %v605_v18 = vrot.slane %v472_v3, 4  ;;  %v9660_v9 = vunpack.i.h.bf16 %v6003_v43 }
 0x1a7   :  { %v4783_v51 = vunpack.i.h.bf16 %v4781_v2  ;;  %v6471_v44 = vpop.permute.xlu0 %4775  ;;  %v4791_v13 = vpop.permute.xlu1 %4790  ;;  %v366_v14 = vsel %vm365_vm4, %v9481_v50, %v4762_v57  ;;  %v695_v49 = vpack.c.bf16 %v6452_v23, %v6452_v23  ;;  %v4782_v3 = vunpack.i.l.bf16 %v4781_v2 }
 0x1a8   :  { %v423_v12 = vsel %vm415_vm3, %v4767_v61, %v9660_v9  ;;  %v4778_v43 = vunpack.i.h.bf16 %v6471_v44  ;;  %v4777_v28 = vunpack.i.l.bf16 %v6471_v44  ;;  %v646_v9 = vsel %vm645_vm5, %v373_v27, %v557_v46 }
 0x1a9   :  { %v654_v15 = vsel %vm645_vm5, %v423_v12, %v581_v5  ;;  %v612_v33 = vrot.slane %v473_v25, 4  ;;  %v4792_v45 = vunpack.i.l.bf16 %v4791_v13  ;;  %v9661_v5 = vunpack.i.h.bf16 %v6445_v37 }
 0x1aa   :  { %v678_v21 = vpack.c.bf16 %v654_v15, %v646_v9  ;;  %v9662_v57 = vunpack.i.h.bf16 %v6034_v63  ;;  %v653_v2 = vsel %vm645_vm5, %v366_v14, %v564_v56  ;;  %v662_v50 = vsel %vm645_vm5, %v5760_v52, %v605_v18 }
 0x1ab   :  { %v416_v12 = vsel %vm415_vm3, %v9661_v5, %v4767_v61  ;;  %v715_v46 = vsel %vm713_vm10, %v694_v16, 0  ;;  %v9663_v27 = vunpack.i.h.bf16 %v5927_v11  ;;  %v523_v63 = vsel %vm9494_vm6, %v4778_v43, %v4777_v28  ;;  %v4786_v15 = vpop.permute.xlu0 %4785  ;;  %v4801_v14 = vpop.permute.xlu1 %4800 }
 0x1ac   :  { %v522_v23 = vsel %vm9494_vm6, %v4777_v28, %v9662_v57  ;;  %739 = vmatpush1.bf16.msra.mxu0 %v678_v21  ;;  %v661_v56 = vsel %vm645_vm5, %v416_v12, %v588_v47  ;;  %v393_v52 = vsel %vm9498_vm2, %v4783_v51, %v4782_v3  ;;  %v4788_v11 = vunpack.i.h.bf16 %v4786_v15 }
 0x1ad   :  { %v6499_v25 = vsel %vm9498_vm2, %v9663_v27, %v4783_v51  ;;  %v629_v61 = vrot.slane %v522_v23, 4  ;;  %v685_v16 = vpack.c.bf16 %v661_v56, %v653_v2  ;;  %v4787_v18 = vunpack.i.l.bf16 %v4786_v15 }
 0x1ae   :  { %v9664_v9 = vpack.c.bf16 %v6206_v34, %v6195_v36  ;;  %v9665_v5 = vunpack.i.h.bf16 %v6396_v48  ;;  %v4793_v21 = vunpack.i.h.bf16 %v4791_v13  ;;  %v9666_v47 = vunpack.i.h.bf16 %v6043_v54 }
 0x1af   :  { %v6521_v51 = vsel %vm645_vm5, %v5841_v20, %v612_v33  ;;  %v561_v57 = vrot.slane %v6499_v25, 4  ;;  %v636_v23 = vrot.slane %v523_v63, 4  ;;  %861 = vmatprep.subr.bf16.mxu1 %v685_v16  ;;  %v443_v34 = vsel %vm9502_vm1, %v4788_v11, %v4787_v18  ;;  %v4796_v27 = vpop.permute.xlu0 %4795  ;;  %v4811_v20 = vpop.permute.xlu1 %4810 }
 0x1b0   :  { %740 = vmatprep.subr.bf16.mxu0 %v9664_v9  ;;  %v392_v28 = vsel %vm9498_vm2, %v4782_v3, %v9665_v5  ;;  %v497_v12 = vsel %vm490_vm8, %v4792_v45, %v9666_v47  ;;  %v562_v48 = vrot.slane %v393_v52, 4  ;;  %v9667_v13 = vunpack.i.h.bf16 %v5925_v10 }
 0x1b1   :  { %v670_v36 = vsel %vm645_vm5, %v497_v12, %v629_v61  ;;  %v4803_v3 = vunpack.i.h.bf16 %v4801_v14  ;;  %v4802_v2 = vunpack.i.l.bf16 %v4801_v14  ;;  %v9668_v33 = vunpack.i.h.bf16 %v6321_v6 }
 0x1b2   :  { %v444_v54 = vsel %vm9502_vm1, %v9667_v13, %v4788_v11  ;;  %v4798_v56 = vunpack.i.h.bf16 %v4796_v27  ;;  %v4797_v15 = vunpack.i.l.bf16 %v4796_v27  ;;  %v4813_v16 = vunpack.i.h.bf16 %v4811_v20 }
 0x1b3   :  { %v442_v63 = vsel %vm9502_vm1, %v4787_v18, %v9668_v33  ;;  %v563_v9 = vrot.slane %v392_v28, 4  ;;  %v586_v61 = vrot.slane %v443_v34, 4  ;;  %v686_v52 = vpack.c.bf16 %v670_v36, %v662_v50  ;;  %v4806_v34 = vpop.permute.xlu0 %4805  ;;  %v6550_v36 = vpop.permute.xlu1 %4820 }
 0x1b4   :  { %v498_v10 = vsel %vm490_vm8, %v4793_v21, %v4792_v45  ;;  %v9669_v11 = vunpack.i.l.bf16 %v6291_v55  ;;  %v9670_v5 = vunpack.i.h.bf16 %v6353_v38  ;;  %v4812_v18 = vunpack.i.l.bf16 %v4811_v20 }
 0x1b5   :  { %v677_v47 = vsel %vm645_vm5, %v498_v10, %v636_v23  ;;  %v585_v12 = vrot.slane %v444_v54, 4  ;;  %v587_v28 = vrot.slane %v442_v63, 4  ;;  %v9671_v50 = vunpack.i.h.bf16 %v5965_v40  ;;  %741 = vmatpush1.bf16.msra.mxu0 %v686_v52 }
 0x1b6   :  { %v491_v14 = vsel %vm490_vm8, %v9669_v11, %v4793_v21  ;;  %v367_v6 = vsel %vm365_vm4, %v4797_v15, %v9670_v5  ;;  %v368_v38 = vsel %vm365_vm4, %v4798_v56, %v4797_v15  ;;  %v9672_v21 = vunpack.i.h.bf16 %v6289_v0  ;;  %4466 = vmatprep.subr.msk.bf16.mxu0 %vm713_vm10, %v695_v49 }
 0x1b7   :  { %v419_v45 = vsel %vm415_vm3, %v9671_v50, %v4803_v3  ;;  %v4808_v23 = vunpack.i.h.bf16 %v4806_v34  ;;  %v4807_v40 = vunpack.i.l.bf16 %v4806_v34  ;;  %v418_v54 = vsel %vm415_vm3, %v4803_v3, %v4802_v2 }
 0x1b8   :  { %v6558_v13 = vsel %vm9494_vm6, %v9672_v21, %v4813_v16  ;;  %v4822_v27 = vunpack.i.l.bf16 %v6550_v36  ;;  %v651_v20 = vsel %vm645_vm5, %v368_v38, %v562_v48  ;;  %v659_v33 = vsel %vm645_vm5, %v418_v54, %v586_v61 }
 0x1b9   :  { %v652_v63 = vsel %vm645_vm5, %v367_v6, %v563_v9  ;;  %v9673_v0 = vunpack.i.h.bf16 %v6445_v37  ;;  %v516_v49 = vsel %vm9494_vm6, %v4812_v18, %v4778_v43  ;;  %v9674_v3 = vunpack.i.h.bf16 %v6398_v53  ;;  %743 = vmatpush1.bf16.msra.mxu0 %v715_v46  ;;  %v6587_v43 = vpop.permute.xlu1 %4830 }
 0x1ba   :  { %v683_v48 = vpack.c.bf16 %v659_v33, %v651_v20  ;;  %v9675_v61 = vunpack.i.h.bf16 %v5967_v41  ;;  %v4823_v10 = vunpack.i.h.bf16 %v6550_v36  ;;  %v633_v53 = vrot.slane %v6558_v13, 4 }
 0x1bb   :  { %v417_v15 = vsel %vm415_vm3, %v4802_v2, %v9673_v0  ;;  %v466_v52 = vsel %vm465_vm7, %v4807_v40, %v9674_v3  ;;  %v6585_v2 = vpop.permute.xlu0 %4815  ;;  %v517_v11 = vsel %vm9494_vm6, %v4813_v16, %v4812_v18  ;;  %v693_v5 = vpack.c.bf16 %v677_v47, %v6521_v51 }
 0x1bc   :  { %v369_v9 = vsel %vm365_vm4, %v9675_v61, %v4798_v56  ;;  %v611_v37 = vrot.slane %v466_v52, 4  ;;  %v660_v44 = vsel %vm645_vm5, %v417_v15, %v587_v28  ;;  %820 = vmatprep.subr.bf16.mxu0 %v683_v48  ;;  %v635_v56 = vrot.slane %v516_v49, 4  ;;  %4467 = vmatmul.mubr.msk.bf16.vlgmr.msra.gmra.mrb[8].mxu0 %vm709_vm13, %v6421_v19 }
 0x1bd   :  { %v684_v41 = vpack.c.bf16 %v660_v44, %v652_v63  ;;  %v9676_v6 = vunpack.i.h.bf16 %v6201_v39  ;;  %v9677_v28 = vunpack.i.l.bf16 %v6072_v59  ;;  %v4817_v34 = vunpack.i.l.bf16 %v6585_v2  ;;  %852 = vmatprep.mubr.bf16.mxu0 %v9659_v31 }
 0x1be   :  { %v467_v16 = vsel %vm465_vm7, %v4808_v23, %v4807_v40  ;;  %v4832_v18 = vunpack.i.l.bf16 %v6587_v43  ;;  %v650_v39 = vsel %vm645_vm5, %v369_v9, %v561_v57  ;;  %v658_v51 = vsel %vm645_vm5, %v419_v45, %v585_v12 }
 0x1bf   :  { %v468_v46 = vsel %vm465_vm7, %v9676_v6, %v4808_v23  ;;  %v1050_v50 = vsel %vm465_vm7, %v9677_v28, %v4822_v27  ;;  %862 = vmatpush1.bf16.msra.mxu1 %v684_v41  ;;  %v634_v47 = vrot.slane %v517_v11, 4  ;;  %v6615_v38 = vsel %vm465_vm7, %v4822_v27, %v4823_v10  ;;  %v6617_v13 = vpop.permute.xlu0 %4825  ;;  %v6619_v23 = vpop.permute.xlu1 %4835 }
 0x1c0   :  { %863 = vmatprep.subr.bf16.mxu1 %v693_v5  ;;  %v682_v21 = vpack.c.bf16 %v658_v51, %v650_v39  ;;  %v668_v25 = vsel %vm645_vm5, %v5836_v35, %v611_v37  ;;  %v609_v40 = vrot.slane %v468_v46, 4  ;;  %v1208_v57 = vrot.slane %v1050_v50, 6 }
 0x1c1   :  { %v4828_v12 = vunpack.i.h.bf16 %v6617_v13  ;;  %v4827_v45 = vunpack.i.l.bf16 %v6617_v13  ;;  %v610_v54 = vrot.slane %v467_v16, 4  ;;  %v4833_v27 = vunpack.i.h.bf16 %v6587_v43  ;;  %v9708_v13 = vld [vmem:[#allocation35_spill] sm:$0xff] }
 0x1c2   :  { %821 = vmatpush1.bf16.msra.mxu0 %v682_v21  ;;  %v676_v20 = vsel %vm645_vm5, %v491_v14, %v635_v56  ;;  %v9678_v33 = vunpack.i.h.bf16 %v6319_v60  ;;  %v1209_v35 = vrot.slane %v6615_v38, 6  ;;  %v9679_v0 = vunpack.i.l.bf16 %v6199_v42 }
 0x1c3   :  { %v692_v49 = vpack.c.bf16 %v676_v20, %v668_v25  ;;  %v9680_v52 = vunpack.i.h.bf16 %v6249_v29  ;;  %v9681_v48 = vunpack.i.h.bf16 %v6291_v55  ;;  %v6649_v9 = vpop.permute.xlu0 %4845  ;;  %v6651_v37 = vpop.permute.xlu1 %4840  ;;  %v9682_v44 = vunpack.i.h.bf16 %v6351_v17 }
 0x1c4   :  { %v548_v63 = vsel %vm540_vm9, %v4817_v34, %v9678_v33  ;;  %v6637_v15 = vsel %vm9494_vm6, %v9679_v0, %v4832_v18  ;;  %v9683_v29 = vunpack.i.l.bf16 %v6291_v55  ;;  %v1297_v5 = vsel %vm713_vm10, %v5787_v1, %v1208_v57 }
 0x1c5   :  { %v701_v3 = vpack.c.bf16 %v548_v63, %v548_v63  ;;  %v493_v14 = vsel %vm490_vm8, %v9680_v52, %v4828_v12  ;;  %v1073_v61 = vsel %vm490_vm8, %v9681_v48, %v4827_v45  ;;  %v541_v11 = vsel %vm540_vm9, %v9682_v44, %v4817_v34  ;;  %864 = vmatpush1.bf16.msra.mxu1 %v692_v49 }
 0x1c6   :  { %v492_v41 = vsel %vm490_vm8, %v4828_v12, %v9683_v29  ;;  %v4818_v56 = vunpack.i.h.bf16 %v6585_v2  ;;  %v4848_v6 = vunpack.i.h.bf16 %v6649_v9  ;;  %v4847_v46 = vunpack.i.l.bf16 %v6649_v9  ;;  %v6827_v9 = vld [vmem:[%s9391_s6] sm:$0x3]  ;;  %s5531_s6 = smov 82  }
 0x1c7   :  { %v1097_v28 = vsel %vm9494_vm6, %v4832_v18, %v4833_v27  ;;  %v1256_v55 = vrot.slane %v6637_v15, 2  ;;  %4472 = vmatprep.subr.msk.bf16.mxu1 %vm713_vm10, %v701_v3  ;;  %v700_v50 = vpack.c.bf16 %v541_v11, %v541_v11  ;;  %v675_v34 = vsel %vm645_vm5, %v492_v41, %v634_v47  ;;  %v6688_v25 = vpop.permute.xlu0 %4855  ;;  %v6690_v57 = vpop.permute.xlu1 %4850  ;;  %v9688_v11 = vld [vmem:[#allocation16_spill] sm:$0xff] }
 0x1c8   :  { %v1233_v1 = vrot.slane %v1073_v61, 4  ;;  %v4843_v16 = vunpack.i.h.bf16 %v6651_v37  ;;  %v4842_v39 = vunpack.i.l.bf16 %v6651_v37  ;;  %v674_v51 = vsel %vm645_vm5, %v493_v14, %v633_v53 }
 0x1c9   :  { %v9684_v38 = vunpack.i.h.bf16 %v6072_v59  ;;  %v6684_v18 = vsel %vm465_vm7, %v4848_v6, %v4847_v46  ;;  %v667_v47 = vsel %vm645_vm5, %v5860_v24, %v610_v54  ;;  %v666_v53 = vsel %vm645_vm5, %v5818_v26, %v609_v40  ;;  %v9685_v40 = vld [vmem:[#allocation30_spill] sm:$0xff] }
 0x1ca   :  { %v733_v59 = vsel %vm713_vm10, %v700_v50, 0  ;;  %v691_v12 = vpack.c.bf16 %v675_v34, %v667_v47  ;;  %v4858_v20 = vunpack.i.h.bf16 %v6688_v25  ;;  %v4857_v33 = vunpack.i.l.bf16 %v6688_v25 }
 0x1cb   :  { %v1052_v21 = vsel %vm465_vm7, %v4847_v46, %v9684_v38  ;;  %v1257_v63 = vrot.slane %v1097_v28, 2  ;;  %v4838_v0 = vunpack.i.h.bf16 %v6619_v23  ;;  %866 = vmatpush1.bf16.msra.mxu1 %v733_v59  ;;  %v4852_v24 = vunpack.i.l.bf16 %v6690_v57  ;;  %v4866_v41 = vpop.permute.xlu0 %4865  ;;  %v6720_v46 = vpop.permute.xlu1 %4860 }
 0x1cc   :  { %v690_v54 = vpack.c.bf16 %v674_v51, %v666_v53  ;;  %v4837_v15 = vunpack.i.l.bf16 %v6619_v23  ;;  %v6704_v26 = vsel %vm9498_vm2, %v4843_v16, %v4842_v39  ;;  %v9686_v49 = vunpack.i.h.bf16 %v9685_v40  ;;  %822 = vmatprep.subr.bf16.mxu0 %v691_v12 }
 0x1cd   :  { %v9687_v52 = vmov %v9682_v44  ;;  %v1206_v48 = vrot.slane %v1052_v21, 6  ;;  %v1213_v61 = vrot.slane %v6684_v18, 6  ;;  %v4853_v44 = vunpack.i.h.bf16 %v6690_v57 }
 0x1ce   :  { %v981_v3 = vsel %vm9498_vm2, %v4842_v39, %v9686_v49  ;;  %v542_v14 = vsel %vm540_vm9, %v4818_v56, %v9687_v52  ;;  %823 = vmatpush1.bf16.msra.mxu0 %v690_v54  ;;  %v1298_v29 = vsel %vm713_vm10, %v9688_v11, %v1209_v35  ;;  %v9689_v28 = vunpack.i.h.bf16 %v6118_v8  ;;  %4473 = vmatmul.mubr.msk.bf16.vlgmr.msra.gmra.mrb[12].mxu1 %vm709_vm13, %v6421_v19  ;;  %v9690_v35 = vld [vmem:[#allocation34_spill] sm:$0xff]  ;;  %v9693_v54 = vld [vmem:[#allocation15_spill] sm:$0xff] }
 0x1cf   :  { %v6732_v50 = vsel %vm490_vm8, %v4858_v20, %v4857_v33  ;;  %v699_v34 = vpack.c.bf16 %v542_v14, %v542_v14  ;;  %v1306_v39 = vsel %vm645_vm5, %v1298_v29, %v1233_v1  ;;  %v9691_v51 = vunpack.i.h.bf16 %v9690_v35  ;;  %1444 = vmatprep.mubr.bf16.mxu1 %v9659_v31  ;;  %v4876_v49 = vpop.permute.xlu0 %4875  ;;  %v6758_v52 = vpop.permute.xlu1 %4870 }
 0x1d0   :  { %v6726_v17 = vsel %vm490_vm8, %v4857_v33, %v9689_v28  ;;  %v1314_v38 = vsel %vm9499_vm11, %v1306_v39, %v1257_v63  ;;  %v9692_v21 = vrot.slane %v6392_v62, 4  ;;  %v4868_v53 = vunpack.i.h.bf16 %v4866_v41  ;;  %v9698_v39 = vld [vmem:[#allocation39_spill] sm:$0xff] }
 0x1d1   :  { %v6741_v8 = vsel %vm415_vm3, %v4852_v24, %v9691_v51  ;;  %v1134_v1 = vrot.slane %v981_v3, 6  ;;  %4470 = vmatprep.subr.msk.bf16.mxu0 %vm713_vm10, %v699_v34  ;;  %v1322_v59 = vpack.c.bf16 %v1314_v38, %v6381_v30  ;;  %v4862_v33 = vunpack.i.l.bf16 %v6720_v46 }
 0x1d2   :  { %v1305_v47 = vsel %vm645_vm5, %v1297_v5, %v9692_v21  ;;  %v6754_v63 = vsel %vm713_vm10, %v9693_v54, %v1206_v48  ;;  %v1141_v62 = vrot.slane %v6704_v26, 6  ;;  %v4867_v40 = vunpack.i.l.bf16 %v4866_v41  ;;  %v9694_v48 = vld [vmem:[#allocation29_spill] sm:$0xff] }
 0x1d3   :  { %v1313_v12 = vsel %vm9499_vm11, %v1305_v47, %v1256_v55  ;;  %v1230_v3 = vrot.slane %v6726_v17, 4  ;;  %v1237_v30 = vrot.slane %v6732_v50, 4  ;;  %v6766_v55 = vsel %vm415_vm3, %v4853_v44, %v4852_v24  ;;  %1412 = vmatprep.subr.bf16.mxu1 %v1322_v59  ;;  %v4886_v59 = vpop.permute.xlu0 %4885  ;;  %v9710_v26 = vld [vmem:[#allocation21_spill] sm:$0xff] }
 0x1d4   :  { %v1321_v5 = vpack.c.bf16 %v1313_v12, %v6401_v32  ;;  %v1158_v14 = vrot.slane %v6741_v8, 4  ;;  %v9695_v32 = vunpack.i.h.bf16 %v9694_v48  ;;  %v9696_v29 = vunpack.i.l.bf16 %v6319_v60  ;;  %v4881_v12 = vpop.permute.xlu1 %4880 }
 0x1d5   :  { %v9697_v24 = vunpack.i.h.bf16 %v6247_v58  ;;  %v4878_v34 = vunpack.i.h.bf16 %v4876_v49  ;;  %v9699_v35 = vunpack.i.h.bf16 %v9698_v39  ;;  %v4877_v38 = vunpack.i.l.bf16 %v4876_v49 }
 0x1d6   :  { %1413 = vmatpush1.bf16.msra.mxu1 %v1321_v5  ;;  %v6773_v11 = vsel %vm9498_vm2, %v9695_v32, %v4868_v53  ;;  %v543_v41 = vsel %vm540_vm9, %v9696_v29, %v4818_v56  ;;  %v6795_v60 = vsel %vm9498_vm2, %v4867_v40, %v4843_v16  ;;  %v6799_v56 = vsel %vm9498_vm2, %v4868_v53, %v4867_v40 }
 0x1d7   :  { %v1121_v28 = vsel %vm540_vm9, %v9697_v24, %v4837_v15  ;;  %v957_v51 = vsel %vm365_vm4, %v4862_v33, %v9699_v35  ;;  %v698_v8 = vpack.c.bf16 %v543_v41, %v543_v41  ;;  %v4873_v21 = vunpack.i.h.bf16 %v6758_v52  ;;  %v9702_v41 = vld [vmem:[#allocation40_spill] sm:$0xff]  ;;  %v4896_v39 = vpop.permute.xlu0 %4895 }
 0x1d8   :  { %v1330_v2 = vpack.c.bf16 %v1121_v28, %v1121_v28  ;;  %v4872_v47 = vunpack.i.l.bf16 %v6758_v52  ;;  %v1165_v54 = vrot.slane %v6766_v55, 4  ;;  %v4863_v5 = vunpack.i.h.bf16 %v6720_v46  ;;  %v4891_v35 = vpop.permute.xlu1 %4890 }
 0x1d9   :  { %v727_v37 = vsel %vm713_vm10, %v698_v8, 0  ;;  %v1046_v16 = vsel %vm465_vm7, %v4877_v38, %v4848_v6  ;;  %v1138_v53 = vrot.slane %v6773_v11, 6  ;;  %v1270_v40 = vsel %vm713_vm10, %v957_v51, %v1134_v1 }
 0x1da   :  { %4476 = vmatprep.subr.msk.bf16.mxu1 %vm9493_vm12, %v1330_v2  ;;  %825 = vmatpush1.bf16.msra.mxu0 %v727_v37  ;;  %v6816_v49 = vsel %vm465_vm7, %v4878_v34, %v4877_v38  ;;  %v6822_v46 = vsel %vm465_vm7, %v4823_v10, %v4878_v34  ;;  %v1139_v6 = vrot.slane %v6799_v56, 6  ;;  %v1140_v1 = vrot.slane %v6795_v60, 6  ;;  %v9704_v38 = vld [vmem:[#allocation32_spill] sm:$0xff] }
 0x1db   :  { %1415 = vmatpush1.bf16.msra.mxu1 %v6424_v4  ;;  %v9700_v4 = vld [vmem:[#allocation42_spill] sm:$0xff]  ;;  %v4888_v32 = vunpack.i.h.bf16 %v4886_v59  ;;  %v4887_v29 = vunpack.i.l.bf16 %v4886_v59  ;;  %v1212_v36 = vrot.slane %v1046_v16, 6  ;;  %v6838_v10 = vsel %vm9502_vm1, %v4873_v21, %v4872_v47 }
 0x1dc   :  { %v9701_v48 = vpack.c.bf16 %v6369_v22, %v9700_v4  ;;  %v9703_v24 = vunpack.i.h.bf16 %v9702_v41  ;;  %v4882_v34 = vunpack.i.l.bf16 %v4881_v12  ;;  %v950_v22 = vsel %vm365_vm4, %v4863_v5, %v4862_v33  ;;  %v9707_v41 = vld [vmem:[#allocation22_spill] sm:$0xff] }
 0x1dd   :  { %v1210_v51 = vrot.slane %v6822_v46, 6  ;;  %v1211_v8 = vrot.slane %v6816_v49, 6  ;;  %4471 = vmatmul.mubr.msk.bf16.vlgmr.msra.gmra.mrb[12].mxu0 %vm709_vm13, %v6421_v19  ;;  %v1278_v2 = vsel %vm645_vm5, %v1270_v40, %v1158_v14  ;;  %v9705_v60 = vunpack.i.h.bf16 %v9704_v38  ;;  %v4901_v38 = vpop.permute.xlu1 %4900 }
 0x1de   :  { %1371 = vmatprep.subr.bf16.mxu0 %v9701_v48  ;;  %v1029_v28 = vsel %vm9502_vm1, %v4872_v47, %v9703_v24  ;;  %4477 = vmatmul.mubr.msk.bf16.vlgmr.msra.gmra.mrb[16].mxu1 %vm9492_vm14, %v6827_v9  ;;  %v6861_v33 = vsel %vm415_vm3, %v4888_v32, %v4887_v29  ;;  %v4883_v59 = vunpack.i.h.bf16 %v4881_v12  ;;  %v9706_v37 = vunpack.i.h.bf16 %v6199_v42  ;;  %v1091_v42 = vpop.permute.xlu0 %1090 }
 0x1df   :  { %v6857_v47 = vsel %vm415_vm3, %v9705_v60, %v4888_v32  ;;  %1403 = vmatprep.mubr.bf16.mxu0 %v9659_v31  ;;  %1526 = vmatprep.mubr.bf16.mxu1 %v9659_v31  ;;  %v1182_v14 = vrot.slane %v1029_v28, 2  ;;  %v1189_v16 = vrot.slane %v6838_v10, 2  ;;  %v999_v40 = vsel %vm415_vm3, %v4887_v29, %v4853_v44 }
 0x1e0   :  { %v1100_v19 = vsel %vm9494_vm6, %v4882_v34, %v9706_v37  ;;  %v4897_v4 = vunpack.i.l.bf16 %v4896_v39  ;;  %v4893_v12 = vunpack.i.h.bf16 %v4891_v35  ;;  %v4892_v32 = vunpack.i.l.bf16 %v4891_v35 }
 0x1e1   :  { %v1254_v48 = vrot.slane %v1100_v19, 2  ;;  %v1301_v24 = vsel %vm713_vm10, %v9707_v41, %v1212_v36  ;;  %v1162_v60 = vrot.slane %v6857_v47, 4  ;;  %v1163_v28 = vrot.slane %v6861_v33, 4  ;;  %v6900_v19 = vpop.permute.xlu1 %4905 }
 0x1e2   :  { %v4898_v37 = vunpack.i.h.bf16 %v4896_v39  ;;  %v1303_v57 = vsel %vm645_vm5, %v6754_v63, %v1230_v3  ;;  %v1164_v44 = vrot.slane %v999_v40, 4  ;;  %v1101_v29 = vsel %vm9494_vm6, %v4883_v59, %v4882_v34 }
 0x1e3   :  { %v951_v10 = vsel %vm365_vm4, %v4897_v4, %v4863_v5  ;;  %v1070_v36 = vsel %vm490_vm8, %v4892_v32, %v4858_v20  ;;  %v1072_v17 = vsel %vm490_vm8, %v4827_v45, %v4893_v12  ;;  %v1094_v63 = vsel %vm9494_vm6, %v1091_v42, %v4883_v59 }
 0x1e4   :  { %v1236_v39 = vrot.slane %v1070_v36, 4  ;;  %v4903_v3 = vunpack.i.h.bf16 %v4901_v38  ;;  %v1071_v34 = vsel %vm490_vm8, %v4893_v12, %v4892_v32  ;;  %v4902_v35 = vunpack.i.l.bf16 %v4901_v38  ;;  %v1089_v32 = vpop.permute.xlu0 %1088 }
 0x1e5   :  { %v1287_v5 = vsel %vm9499_vm11, %v1278_v2, %v1182_v14  ;;  %v1311_v25 = vsel %vm9499_vm11, %v1303_v57, %v1254_v48  ;;  %v1261_v20 = vrot.slane %v1101_v29, 2  ;;  %v9709_v40 = vunpack.i.h.bf16 %v9708_v13 }
 0x1e6   :  { %v1319_v41 = vpack.c.bf16 %v1311_v25, %v1287_v5  ;;  %v1277_v59 = vsel %vm713_vm10, %v950_v22, %v1141_v62  ;;  %v952_v12 = vsel %vm365_vm4, %v4898_v37, %v4897_v4  ;;  %v1276_v2 = vsel %vm713_vm10, %v951_v10, %v1140_v1  ;;  %v1117_v4 = vpop.permute.xlu1 %1116 }
 0x1e7   :  { %v953_v45 = vsel %vm365_vm4, %v9709_v40, %v4898_v37  ;;  %v1234_v14 = vrot.slane %v1072_v17, 4  ;;  %v1023_v48 = vsel %vm9502_vm1, %v4902_v35, %v4873_v21  ;;  %v1235_v38 = vrot.slane %v1071_v34, 4 }
 0x1e8   :  { %v1260_v57 = vrot.slane %v1094_v63, 2  ;;  %v1309_v29 = vsel %vm645_vm5, %v1301_v24, %v1236_v39  ;;  %1372 = vmatpush1.bf16.msra.mxu0 %v1319_v41  ;;  %v1302_v62 = vsel %vm713_vm10, %v9710_v26, %v1213_v61  ;;  %v1024_v1 = vsel %vm9502_vm1, %v4903_v3, %v4902_v35  ;;  %v9711_v24 = vld [vmem:[#allocation38_spill] sm:$0xff]  ;;  %v9714_v41 = vld [vmem:[#allocation20_spill] sm:$0xff] }
 0x1e9   :  { %v1188_v22 = vrot.slane %v1023_v48, 2  ;;  %v1285_v52 = vsel %vm645_vm5, %v1277_v59, %v1165_v54  ;;  %v1310_v21 = vsel %vm645_vm5, %v1302_v62, %v1237_v30  ;;  %v9712_v37 = vunpack.i.h.bf16 %v9711_v24 }
 0x1ea   :  { %v1294_v61 = vsel %vm9499_vm11, %v1285_v52, %v1189_v16  ;;  %v1318_v10 = vsel %vm9499_vm11, %v1310_v21, %v1261_v20  ;;  %v1096_v55 = vsel %vm9494_vm6, %v4833_v27, %v1089_v32  ;;  %v1095_v50 = vsel %vm9494_vm6, %v1089_v32, %v1091_v42 }
 0x1eb   :  { %v1025_v18 = vsel %vm9502_vm1, %v9712_v37, %v4903_v3  ;;  %v1326_v54 = vpack.c.bf16 %v1318_v10, %v1294_v61  ;;  %v4908_v30 = vunpack.i.h.bf16 %v6900_v19  ;;  %v4907_v36 = vunpack.i.l.bf16 %v6900_v19 }
 0x1ec   :  { %v1317_v17 = vsel %vm9499_vm11, %v1309_v29, %v1260_v57  ;;  %v1187_v39 = vrot.slane %v1024_v1, 2  ;;  %v1125_v16 = vsel %vm540_vm9, %v1117_v4, %v4838_v0  ;;  %v1284_v43 = vsel %vm645_vm5, %v1276_v2, %v1164_v44 }
 0x1ed   :  { %1494 = vmatprep.subr.bf16.mxu1 %v1326_v54  ;;  %v1258_v27 = vrot.slane %v1096_v55, 2  ;;  %v1118_v63 = vsel %vm540_vm9, %v4908_v30, %v1117_v4  ;;  %v1334_v42 = vpack.c.bf16 %v1125_v16, %v1125_v16  ;;  %v1293_v3 = vsel %vm9499_vm11, %v1284_v43, %v1188_v22 }
 0x1ee   :  { %v1259_v34 = vrot.slane %v1095_v50, 2  ;;  %v1333_v35 = vpack.c.bf16 %v1118_v63, %v1118_v63  ;;  %v1325_v5 = vpack.c.bf16 %v1317_v17, %v1293_v3  ;;  %v9713_v25 = vunpack.i.l.bf16 %v6247_v58  ;;  %v1113_v58 = vpop.permute.xlu0 %1112 }
 0x1ef   :  { %v1274_v44 = vsel %vm713_vm10, %v953_v45, %v1138_v53  ;;  %v1186_v20 = vrot.slane %v1025_v18, 2  ;;  %v1124_v40 = vsel %vm540_vm9, %v4838_v0, %v4907_v36  ;;  %v1299_v59 = vsel %vm713_vm10, %v9714_v41, %v1210_v51  ;;  %v9715_v53 = vld [vmem:[#allocation23_spill] sm:$0xff] }
 0x1f0   :  { %v1123_v19 = vsel %vm540_vm9, %v4907_v36, %v9713_v25  ;;  %1495 = vmatpush1.bf16.msra.mxu1 %v1325_v5  ;;  %v1327_v2 = vpack.c.bf16 %v1124_v40, %v1124_v40  ;;  %v1275_v11 = vsel %vm713_vm10, %v952_v12, %v1139_v6  ;;  %v1300_v45 = vsel %vm713_vm10, %v9715_v53, %v1211_v8  ;;  %v7019_v37 = vpop.permute.xlu1 %1339 }
 0x1f1   :  { %v1328_v13 = vpack.c.bf16 %v1123_v19, %v1123_v19  ;;  %v1307_v48 = vsel %vm645_vm5, %v1299_v59, %v1234_v14  ;;  %v1283_v0 = vsel %vm645_vm5, %v1275_v11, %v1163_v28  ;;  %v1308_v46 = vsel %vm645_vm5, %v1300_v45, %v1235_v38  ;;  %4480 = vmatprep.subr.msk.bf16.mxu1 %vm9493_vm12, %v1334_v42  ;;  %v9725_v42 = vld [vmem:[#allocation12_spill] sm:$0xff]  ;;  %v9726_v11 = vld [vmem:[#allocation13_spill] sm:$0xff]  ;;  %v9727_v45 = vld [vmem:[#allocation14_spill] sm:$0xff] }
 0x1f2   :  { %v1366_v56 = vsel %vm9493_vm12, %v1333_v35, 0  ;;  %v1315_v6 = vsel %vm9499_vm11, %v1307_v48, %v1258_v27  ;;  %v1348_v49 = vsel %vm9493_vm12, %v1327_v2, 0  ;;  %v1292_v51 = vsel %vm9499_vm11, %v1283_v0, %v1187_v39  ;;  %v9724_v27 = vld [vmem:[#allocation11_spill] sm:$0xff] }
 0x1f3   :  { %4474 = vmatprep.subr.msk.bf16.mxu0 %vm9493_vm12, %v1328_v13  ;;  %v1316_v8 = vsel %vm9499_vm11, %v1308_v46, %v1259_v34  ;;  %v1119_v12 = vsel %vm540_vm9, %v1113_v58, %v4908_v30  ;;  %v1120_v33 = vsel %vm540_vm9, %v4837_v15, %v1113_v58  ;;  %v1282_v14 = vsel %vm645_vm5, %v1274_v44, %v1162_v60 }
 0x1f4   :  { %1374 = vmatpush1.bf16.msra.mxu0 %v1348_v49  ;;  %v1324_v28 = vpack.c.bf16 %v1316_v8, %v1292_v51  ;;  %1497 = vmatpush1.bf16.msra.mxu1 %v1366_v56  ;;  %v1291_v32 = vsel %vm9499_vm11, %v1282_v14, %v1186_v20  ;;  %v1331_v57 = vpack.c.bf16 %v1120_v33, %v1120_v33  ;;  %v9728_v14 = vld [vmem:[#allocation19_spill] sm:$0xff] }
 0x1f5   :  { %v1323_v38 = vpack.c.bf16 %v1315_v6, %v1291_v32  ;;  %v1332_v29 = vpack.c.bf16 %v1119_v12, %v1119_v12 }
 0x1f6   :  { %1453 = vmatprep.subr.bf16.mxu0 %v1324_v28  ;;  %v1360_v23 = vsel %vm9493_vm12, %v1331_v57, 0 }
 0x1f7   :  { %4475 = vmatmul.mubr.msk.bf16.vlgmr.msra.gmra.mrb[16].mxu0 %vm9492_vm14, %v6827_v9  ;;  %4481 = vmatmul.mubr.msk.bf16.vlgmr.msra.gmra.mrb[20].mxu1 %vm9492_vm14, %v6827_v9 }
 0x1f8   :  { %1454 = vmatpush1.bf16.msra.mxu0 %v1323_v38  ;;  %1485 = vmatprep.mubr.bf16.mxu0 %v9659_v31 }
 0x1f9   :  { %4478 = vmatprep.subr.msk.bf16.mxu0 %vm9493_vm12, %v1332_v29  ;;  %2010 = vmatprep.mubr.bf16.mxu1 %v9659_v31  ;;  %v9729_v29 = vld [vmem:[#allocation18_spill] sm:$0xff]  ;;  %vm1617_vm12 = vcmp.lt.s32.totalorder %v5923_v7, 42 }
 0x1fc   :  { %1456 = vmatpush1.bf16.msra.mxu0 %v1360_v23 }
 0x1ff   :  { %4479 = vmatmul.mubr.msk.bf16.vlgmr.msra.gmra.mrb[20].mxu0 %vm9492_vm14, %v6827_v9  ;;  %vm1567_vm14 = vcmp.lt.s32.totalorder %v5923_v7, 46 }
 0x200   :  { %1969 = vmatprep.mubr.bf16.mxu0 %v9659_v31 }
 0x277   :  { %v7007_v15 = vpop.f32.mrb[8].mxu1 }
 0x278   :  { %9716 = vst [vmem:[#allocation30_spill] sm:$0xff] %v7007_v15  ;;  %v7009_v47 = vpop.f32.mrb[9].mxu1 }
 0x279   :  { %9717 = vst [vmem:[#allocation16_spill] sm:$0xff] %v7009_v47  ;;  %v817_v60 = vpop.f32.mrb[10].mxu1 }
 0x27a   :  { %v818_v26 = vpop.f32.mrb[11].mxu1 }
 0x28f   :  { %v7011_v62 = vpop.f32.mrb[8].mxu0 }
 0x290   :  { %9718 = vst [vmem:[#allocation34_spill] sm:$0xff] %v7011_v62  ;;  %v7013_v1 = vpop.f32.mrb[9].mxu0 }
 0x291   :  { %9719 = vst [vmem:[#allocation15_spill] sm:$0xff] %v7013_v1  ;;  %v776_v22 = vpop.f32.mrb[10].mxu0 }
 0x292   :  { %v777_v52 = vpop.f32.mrb[11].mxu0 }
 0x2a1   :  { %v7015_v21 = vpop.f32.mrb[12].mxu1 }
 0x2a2   :  { %9720 = vst [vmem:[#allocation29_spill] sm:$0xff] %v7015_v21  ;;  %v7017_v4 = vpop.f32.mrb[13].mxu1 }
 0x2a3   :  { %9721 = vst [vmem:[#allocation39_spill] sm:$0xff] %v7017_v4  ;;  %v899_v24 = vpop.f32.mrb[14].mxu1 }
 0x2a4   :  { %v900_v9 = vpop.f32.mrb[15].mxu1  ;;  %v9730_v24 = vld [vmem:[#allocation17_spill] sm:$0xff] }
 0x2b0   :  { %v7021_v18 = vpop.f32.mrb[12].mxu0 }
 0x2b1   :  { %9722 = vst [vmem:[#allocation42_spill] sm:$0xff] %v7021_v18  ;;  %v1446_v61 = vpop.f32.mrb[16].mxu1  ;;  %v7023_v10 = vpop.f32.mrb[13].mxu0 }
 0x2b2   :  { %9723 = vst [vmem:[#allocation40_spill] sm:$0xff] %v7023_v10  ;;  %v1447_v55 = vadd.f32 %v1446_v61, %v7019_v37  ;;  %v1448_v54 = vpop.f32.mrb[17].mxu1  ;;  %v858_v50 = vpop.f32.mrb[14].mxu0 }
 0x2b3   :  { %v1449_v30 = vadd.f32 %v1448_v54, %v7019_v37  ;;  %v1450_v36 = vpop.f32.mrb[18].mxu1  ;;  %v859_v17 = vpop.f32.mrb[15].mxu0 }
 0x2b4   :  { %v1537_v39 = vmax.f32 %v1447_v55, 0.0  ;;  %v1451_v16 = vpop.f32.mrb[19].mxu1  ;;  %v9731_v55 = vld [vmem:[#allocation10_spill] sm:$0xff]  ;;  %v7102_v17 = vpop.permute.xlu1 %4911 }
 0x2b5   :  { %v1538_v43 = vmax.f32 %v1449_v30, 0.0  ;;  %v4917_v30 = vpop.permute.xlu0 %4916 }
 0x2b6   :  { %v7028_v63 = vmul.f32 %v1537_v39, %v9724_v27 }
 0x2b7   :  { %v7031_v3 = vmul.f32 %v1538_v43, %v9725_v42 }
 0x2b8   :  { %v7110_v43 = vpop.permute.xlu1 %4921 }
 0x2b9   :  { %v5020_v34 = vpack.i.bf16 %v7031_v3, %v7028_v63  ;;  %v7100_v36 = vpop.permute.xlu0 %4926 }
 0x2bb   :  { %5021 = vrot.lane.b32.xlu0 %v5020_v34, %s5531_s6  ;;  %v9732_v34 = vld [vmem:[#allocation37_spill] sm:$0xff] }
 0x2bd   :  { %v7108_v16 = vpop.permute.xlu0 %4936 }
 0x2be   :  { %v9745_v18 = vunpack.i.l.bf16 %v7108_v16 }
 0x2ca   :  { %v1405_v35 = vpop.f32.mrb[16].mxu0  ;;  %v1528_v19 = vpop.f32.mrb[20].mxu1 }
 0x2cb   :  { %v1406_v5 = vadd.f32 %v1405_v35, %v7019_v37  ;;  %v1407_v25 = vpop.f32.mrb[17].mxu0  ;;  %v1530_v13 = vpop.f32.mrb[21].mxu1  ;;  %v1529_v28 = vadd.f32 %v1528_v19, %v7019_v37  ;;  %v9733_v35 = vld [vmem:[#allocation33_spill] sm:$0xff] }
 0x2cc   :  { %v1408_v44 = vadd.f32 %v1407_v25, %v7019_v37  ;;  %v1409_v20 = vpop.f32.mrb[18].mxu0  ;;  %v1532_v59 = vpop.f32.mrb[22].mxu1  ;;  %v1531_v8 = vadd.f32 %v1530_v13, %v7019_v37  ;;  %v9736_v13 = vld [vmem:[#allocation27_spill] sm:$0xff] }
 0x2cd   :  { %v1535_v40 = vmax.f32 %v1406_v5, 0.0  ;;  %v1410_v41 = vpop.f32.mrb[19].mxu0  ;;  %v1533_v2 = vpop.f32.mrb[23].mxu1  ;;  %v1541_v38 = vmax.f32 %v1529_v28, 0.0  ;;  %v5175_v5 = vpack.i.bf16 %v9733_v35, %v9732_v34  ;;  %v9735_v20 = vld [vmem:[#allocation26_spill] sm:$0xff]  ;;  %v9482_v28 = vunpack.i.l.bf16 %v7100_v36 }
 0x2ce   :  { %v1536_v58 = vmax.f32 %v1408_v44, 0.0  ;;  %v1542_v12 = vmax.f32 %v1531_v8, 0.0  ;;  %v7118_v25 = vpop.permute.xlu0 %4956  ;;  %v7120_v19 = vpop.permute.xlu1 %4931  ;;  %v9734_v44 = vld [vmem:[#allocation41_spill] sm:$0xff]  ;;  %v2526_v8 = vld [vmem:[%s9392_s11] sm:$0x7] }
 0x2cf   :  { %v7039_v53 = vmul.f32 %v1535_v40, %v9726_v11  ;;  %v7070_v23 = vmul.f32 %v1541_v38, %v9729_v29  ;;  %v5200_v40 = vpack.i.bf16 %v9736_v13, %v9735_v20 }
 0x2d0   :  { %v7042_v48 = vmul.f32 %v1536_v58, %v9727_v45  ;;  %v7061_v32 = vmul.f32 %v1542_v12, %v9728_v14  ;;  %v9737_v58 = vld [vmem:[#allocation28_spill] sm:$0xff] }
 0x2d1   :  { %v5030_v0 = vpack.i.bf16 %v7031_v3, %v7039_v53 }
 0x2d2   :  { %v1487_v46 = vpop.f32.mrb[20].mxu0  ;;  %v5040_v49 = vpack.i.bf16 %v7042_v48, %v7039_v53  ;;  %v5065_v33 = vpack.i.bf16 %v7028_v63, %v7042_v48  ;;  %v5080_v57 = vpack.i.bf16 %v7028_v63, %v7061_v32  ;;  %v5100_v52 = vpack.i.bf16 %v7061_v32, %v7070_v23  ;;  %v7127_v41 = vpop.permute.xlu0 %4961 }
 0x2d3   :  { %v1489_v56 = vpop.f32.mrb[21].mxu0  ;;  %5031 = vrot.lane.b32.xlu1 %v5030_v0, %s5532_s7  ;;  %5026 = vrot.lane.b32.xlu0 %v5030_v0, %s5533_s25  ;;  %v1488_v60 = vadd.f32 %v1487_v46, %v7019_v37  ;;  %v7129_v59 = vpop.permute.xlu1 %4941  ;;  %v9738_v46 = vld [vmem:[#allocation31_spill] sm:$0xff] }
 0x2d4   :  { %v1491_v6 = vpop.f32.mrb[22].mxu0  ;;  %v1490_v22 = vadd.f32 %v1489_v56, %v7019_v37 }
 0x2d5   :  { %v1492_v51 = vpop.f32.mrb[23].mxu0  ;;  %v1539_v26 = vmax.f32 %v1488_v60, 0.0 }
 0x2d6   :  { %v1540_v61 = vmax.f32 %v1490_v22, 0.0  ;;  %v7138_v2 = vpop.permute.xlu0 %4971  ;;  %v4918_v51 = vunpack.i.l.bf16 %v4917_v30 }
 0x2d7   :  { %5036 = vrot.lane.b32.xlu1 %v5030_v0, %s5534_s1  ;;  %5041 = vrot.lane.b32.xlu0 %v5040_v49, %s5535_s26  ;;  %v7081_v9 = vmul.f32 %v1539_v26, %v9730_v24  ;;  %v7140_v0 = vpop.permute.xlu1 %4946  ;;  %v9752_v29 = vunpack.i.l.bf16 %v7138_v2 }
 0x2d8   :  { %v7086_v54 = vmul.f32 %v1540_v61, %v9731_v55  ;;  %v2243_v22 = vsel %vm465_vm7, %v9482_v28, %v4918_v51  ;;  %v9484_v61 = vunpack.i.l.bf16 %v7118_v25  ;;  %v9744_v28 = vunpack.i.h.bf16 %v7108_v16 }
 0x2d9   :  { %v5130_v37 = vpack.i.bf16 %v7081_v9, %v7031_v3 }
 0x2da   :  { %v5140_v50 = vpack.i.bf16 %v7086_v54, %v7081_v9  ;;  %v5155_v39 = vpack.i.bf16 %v7070_v23, %v7086_v54  ;;  %v7146_v56 = vpop.permute.xlu0 %4981 }
 0x2db   :  { %5046 = vrot.lane.b32.xlu1 %v5040_v49, %s5536_s27  ;;  %5051 = vrot.lane.b32.xlu0 %v5040_v49, %s5537_s23  ;;  %v7148_v6 = vpop.permute.xlu1 %4951 }
 0x2de   :  { %v7163_v38 = vpop.permute.xlu0 %4986 }
 0x2df   :  { %5066 = vrot.lane.b32.xlu1 %v5065_v33, %s5532_s7  ;;  %5056 = vrot.lane.b32.xlu0 %v5040_v49, %s5538_s4 }
 0x2e3   :  { %5071 = vrot.lane.b32.xlu1 %v5065_v33, %s5534_s1  ;;  %5061 = vrot.lane.b32.xlu0 %v5065_v33, %s5533_s25  ;;  %v9483_v33 = vunpack.i.h.bf16 %v7100_v36 }
 0x2e7   :  { %5076 = vrot.lane.b32.xlu1 %v5040_v49, %s5531_s6  ;;  %5081 = vrot.lane.b32.xlu0 %v5080_v57, %s5535_s26  ;;  %v4919_v49 = vunpack.i.h.bf16 %v4917_v30  ;;  %v4924_v30 = vunpack.i.h.bf16 %v7110_v43 }
 0x2e9   :  { %v2242_v12 = vsel %vm465_vm7, %v4918_v51, %v4919_v49  ;;  %v2241_v26 = vsel %vm465_vm7, %v4919_v49, %v9483_v33  ;;  %v2397_v49 = vrot.slane %v2243_v22, 6  ;;  %v4963_v22 = vunpack.i.l.bf16 %v7127_v41 }
 0x2ea   :  { %v2398_v60 = vrot.slane %v2242_v12, 6  ;;  %v2399_v51 = vrot.slane %v2241_v26, 6  ;;  %v4984_v33 = vunpack.i.h.bf16 %v7146_v56  ;;  %v4989_v12 = vunpack.i.h.bf16 %v7163_v38 }
 0x2eb   :  { %5086 = vrot.lane.b32.xlu1 %v5080_v57, %s5536_s27  ;;  %5091 = vrot.lane.b32.xlu0 %v5080_v57, %s5537_s23  ;;  %v9743_v26 = vunpack.i.l.bf16 %v7120_v19 }
 0x2ec   :  { %v7255_v14 = vsel %vm415_vm3, %v4924_v30, %v4989_v12 }
 0x2ef   :  { %5096 = vrot.lane.b32.xlu1 %v5080_v57, %s5538_s4  ;;  %5101 = vrot.lane.b32.xlu0 %v5100_v52, %s5533_s25  ;;  %v7165_v57 = vpop.permute.xlu1 %4966 }
 0x2f0   :  { %9739 = vst [vmem:[#allocation32_spill] sm:$0xff] %v7165_v57 }
 0x2f3   :  { %5106 = vrot.lane.b32.xlu1 %v5100_v52, %s5532_s7  ;;  %5111 = vrot.lane.b32.xlu0 %v5100_v52, %s5534_s1 }
 0x2f7   :  { %5116 = vrot.lane.b32.xlu1 %v5100_v52, %s5531_s6  ;;  %5131 = vrot.lane.b32.xlu0 %v5130_v37, %s5537_s23  ;;  %v9485_v52 = vunpack.i.h.bf16 %v7118_v25 }
 0x2fb   :  { %5121 = vrot.lane.b32.xlu1 %v5130_v37, %s5535_s26  ;;  %5141 = vrot.lane.b32.xlu0 %v5140_v50, %s5533_s25 }
 0x2ff   :  { %5126 = vrot.lane.b32.xlu1 %v5130_v37, %s5536_s27  ;;  %5146 = vrot.lane.b32.xlu0 %v5140_v50, %s5532_s7 }
 0x303   :  { %5136 = vrot.lane.b32.xlu1 %v5130_v37, %s5538_s4  ;;  %5151 = vrot.lane.b32.xlu0 %v5140_v50, %s5534_s1  ;;  %v4914_v37 = vunpack.i.h.bf16 %v7102_v17  ;;  %s5547_s1 = smov 125  }
 0x307   :  { %5156 = vrot.lane.b32.xlu1 %v5155_v39, %s5535_s26  ;;  %5161 = vrot.lane.b32.xlu0 %v5155_v39, %s5536_s27 }
 0x30b   :  { %5166 = vrot.lane.b32.xlu1 %v5140_v50, %s5531_s6  ;;  %5171 = vrot.lane.b32.xlu0 %v5155_v39, %s5537_s23  ;;  %v4913_v50 = vunpack.i.l.bf16 %v7102_v17 }
 0x30f   :  { %5181 = vrot.lane.b32.xlu1 %v5155_v39, %s5538_s4  ;;  %5176 = vrot.lane.b32.xlu0 %v5175_v5, %s5528_s22  ;;  %v4923_v39 = vunpack.i.l.bf16 %v7110_v43  ;;  %v4943_v43 = vunpack.i.l.bf16 %v7129_v59 }
 0x311   :  { %v2195_v17 = vsel %vm415_vm3, %v4923_v39, %v4924_v30  ;;  %v9751_v30 = vunpack.i.h.bf16 %v7138_v2 }
 0x313   :  { %5186 = vrot.lane.b32.xlu1 %v9734_v44, %s5525_s0  ;;  %5191 = vrot.lane.b32.xlu0 %v5175_v5, %s5529_s24  ;;  %v7181_v5 = vpop.permute.xlu0 %4991 }
 0x314   :  { %v4993_v21 = vunpack.i.l.bf16 %v7181_v5 }
 0x317   :  { %5196 = vrot.lane.b32.xlu1 %v9737_v58, %s5530_s2  ;;  %5201 = vrot.lane.b32.xlu0 %v5200_v40, %s5530_s2  ;;  %v9740_v40 = vld [vmem:[#allocation25_spill] sm:$0xff]  ;;  %v7233_v62 = vpop.permute.xlu0 %5006 }
 0x318   :  { %v2486_v58 = vsel %vm713_vm10, %v9740_v40, %v2398_v60  ;;  %v2290_v60 = vsel %vm9494_vm6, %v9484_v61, %v9485_v52  ;;  %v2171_v40 = vsel %vm9498_vm2, %v4913_v50, %v4914_v37  ;;  %v7214_v61 = vsel %vm713_vm10, %v9735_v20, %v2399_v51  ;;  %9747 = vst [vmem:[#allocation22_spill] sm:$0xff] %v7233_v62 }
 0x319   :  { %v9742_v52 = vunpack.i.h.bf16 %v7120_v19  ;;  %v2326_v1 = vrot.slane %v2171_v40, 6  ;;  %v9746_v20 = vunpack.i.h.bf16 %v7129_v59  ;;  %v9749_v40 = vunpack.i.l.bf16 %v7146_v56 }
 0x31a   :  { %v9760_v27 = vunpack.i.h.bf16 %v7233_v62 }
 0x31b   :  { %5206 = vrot.lane.b32.xlu1 %v9734_v44, %s5526_s21  ;;  %5211 = vrot.lane.b32.xlu0 %v9734_v44, %s5523_s29  ;;  %v2266_v10 = vsel %vm490_vm8, %v9743_v26, %v9742_v52  ;;  %v2168_v51 = vsel %vm9498_vm2, %v4943_v43, %v9746_v20  ;;  %v9748_v52 = vunpack.i.h.bf16 %v7127_v41  ;;  %v7251_v20 = vsel %vm9498_vm2, %v9749_v40, %v4913_v50 }
 0x31c   :  { %v2422_v15 = vrot.slane %v2266_v10, 4  ;;  %v9757_v10 = vunpack.i.h.bf16 %v7140_v0 }
 0x31d   :  { %v2192_v26 = vsel %vm415_vm3, %v4963_v22, %v9748_v52  ;;  %v9750_v52 = vunpack.i.l.bf16 %v7163_v38 }
 0x31e   :  { %v2353_v55 = vrot.slane %v2192_v26, 4  ;;  %v7279_v26 = vsel %vm415_vm3, %v4989_v12, %v4963_v22  ;;  %v9756_v22 = vunpack.i.h.bf16 %v7100_v36 }
 0x31f   :  { %2281 = vrot.lane.b32.xlu1 %v9732_v34, %s5527_s3  ;;  %2301 = vrot.lane.b32.xlu0 %v9738_v46, %s5530_s2 }
 0x323   :  { %2283 = vrot.lane.b32.xlu1 %v9733_v35, %s5527_s3  ;;  %5216 = vrot.lane.b32.xlu0 %v9734_v44, %s5530_s2  ;;  %v7183_v44 = vpop.permute.xlu1 %4976 }
 0x327   :  { %2307 = vrot.lane.b32.xlu1 %v9733_v35, %s5530_s2  ;;  %2529 = vperm.xlu0 %4598, %v2526_v8   ;;  %v9741_v8 = vld [vmem:[#allocation24_spill] sm:$0xff]  ;;  %v7235_v47 = vpop.permute.xlu1 %4996  ;;  %v9768_v35 = vunpack.i.h.bf16 %v7183_v44 }
 0x328   :  { %v7210_v4 = vsel %vm713_vm10, %v9741_v8, %v2397_v49  ;;  %v2147_v49 = vsel %vm365_vm4, %v9745_v18, %v9744_v28  ;;  %v2446_v8 = vrot.slane %v2290_v60, 2  ;;  %v2350_v28 = vrot.slane %v2195_v17, 4 }
 0x329   :  { %v7245_v60 = vsel %vm9498_vm2, %v4914_v37, %v4984_v33  ;;  %v7261_v17 = vsel %vm415_vm3, %v9750_v52, %v4923_v39  ;;  %v2329_v18 = vrot.slane %v2168_v51, 6  ;;  %v2462_v40 = vsel %vm713_vm10, %v2147_v49, %v2326_v1  ;;  %v7283_v49 = vpop.permute.xlu0 %5011 }
 0x32a   :  { %v2144_v39 = vsel %vm365_vm4, %v9752_v29, %v9751_v30  ;;  %v2470_v37 = vsel %vm645_vm5, %v2462_v40, %v2350_v28  ;;  %9753 = vst [vmem:[#allocation35_spill] sm:$0xff] %v7283_v49  ;;  %v2494_v29 = vsel %vm645_vm5, %v2486_v58, %v2422_v15  ;;  %v7290_v30 = vsel %vm9498_vm2, %v4984_v33, %v4943_v43 }
 0x32b   :  { %v7285_v50 = vpop.permute.xlu1 %5001  ;;  %v2465_v28 = vsel %vm713_vm10, %v2144_v39, %v2329_v18  ;;  %v9755_v40 = vunpack.i.h.bf16 %v7181_v5  ;;  %v2240_v1 = vsel %vm465_vm7, %v9756_v22, %v4993_v21  ;;  %v9758_v15 = vunpack.i.l.bf16 %v7140_v0 }
 0x32c   :  { %9754 = vst [vmem:[#allocation21_spill] sm:$0xff] %v7285_v50  ;;  %v5008_v43 = vunpack.i.l.bf16 %v7233_v62  ;;  %v4954_v18 = vunpack.i.h.bf16 %v7148_v6  ;;  %v5013_v52 = vunpack.i.l.bf16 %v7283_v49  ;;  %v2328_v51 = vrot.slane %v7290_v30, 6 }
 0x32d   :  { %v2239_v12 = vsel %vm465_vm7, %v4993_v21, %v9755_v40  ;;  %v2219_v33 = vsel %vm9502_vm1, %v9758_v15, %v9757_v10  ;;  %v4969_v21 = vunpack.i.h.bf16 %v7165_v57  ;;  %v7317_v15 = vpop.permute.xlu0 %5021  ;;  %v7320_v58 = vsel %vm9499_vm11, %v2494_v29, %v2446_v8 }
 0x32e   :  { %9759 = vst [vmem:[#allocation38_spill] sm:$0xff] %v7320_v58  ;;  %v2401_v24 = vrot.slane %v2239_v12, 6  ;;  %v2374_v42 = vrot.slane %v2219_v33, 2  ;;  %v4978_v40 = vunpack.i.l.bf16 %v7183_v44  ;;  %v2400_v45 = vrot.slane %v2240_v1, 6 }
 0x32f   :  { %v2263_v22 = vsel %vm490_vm8, %v5008_v43, %v9760_v27  ;;  %v2264_v30 = vsel %vm490_vm8, %v4954_v18, %v5008_v43  ;;  %v7330_v10 = vpop.permute.xlu1 %5016  ;;  %v2473_v8 = vsel %vm645_vm5, %v2465_v28, %v2353_v55  ;;  %v9761_v29 = vunpack.i.h.bf16 %v7120_v19 }
 0x330   :  { %v9762_v33 = vunpack.i.l.bf16 %v7120_v19  ;;  %v9763_v1 = vunpack.i.l.bf16 %v7148_v6  ;;  %v9764_v27 = vunpack.i.h.bf16 %v7283_v49  ;;  %v2288_v55 = vsel %vm9494_vm6, %v4969_v21, %v5013_v52 }
 0x331   :  { %v2265_v12 = vsel %vm490_vm8, %v9761_v29, %v4954_v18  ;;  %v9765_v28 = vunpack.i.h.bf16 %v7118_v25  ;;  %v9766_v19 = vunpack.i.l.bf16 %v7118_v25  ;;  %v9767_v29 = vunpack.i.l.bf16 %v7165_v57 }
 0x332   :  { %v2267_v39 = vsel %vm490_vm8, %v9763_v1, %v9762_v33  ;;  %v2287_v43 = vsel %vm9494_vm6, %v5013_v52, %v9764_v27  ;;  %v4999_v1 = vunpack.i.h.bf16 %v7235_v47  ;;  %v2489_v27 = vsel %vm713_vm10, %v9738_v46, %v2401_v24 }
 0x333   :  { %v2289_v18 = vsel %vm9494_vm6, %v9765_v28, %v4969_v21  ;;  %v2291_v33 = vsel %vm9494_vm6, %v9767_v29, %v9766_v19  ;;  %v2424_v52 = vrot.slane %v2264_v30, 4  ;;  %v2216_v21 = vsel %vm9502_vm1, %v4978_v40, %v9768_v35 }
 0x334   :  { %v7368_v25 = vsel %vm9499_vm11, %v2470_v37, %v2374_v42  ;;  %v2425_v28 = vrot.slane %v2263_v22, 4  ;;  %v2421_v34 = vrot.slane %v2267_v39, 4  ;;  %v2423_v57 = vrot.slane %v2265_v12, 4 }
 0x335   :  { %9769 = vst [vmem:[#allocation20_spill] sm:$0xff] %v7368_v25  ;;  %v2448_v19 = vrot.slane %v2288_v55, 2  ;;  %v2449_v11 = vrot.slane %v2287_v43, 2  ;;  %v2447_v62 = vrot.slane %v2289_v18, 2  ;;  %v2445_v24 = vrot.slane %v2291_v33, 2 }
 0x336   :  { %v2488_v46 = vsel %vm713_vm10, %v9736_v13, %v2400_v45  ;;  %v2377_v30 = vrot.slane %v2216_v21, 2  ;;  %v9770_v35 = vunpack.i.l.bf16 %v7138_v2  ;;  %v9771_v37 = vunpack.i.l.bf16 %v7108_v16 }
 0x337   :  { %v9772_v39 = vunpack.i.l.bf16 %v7235_v47  ;;  %v5004_v12 = vunpack.i.h.bf16 %v7285_v50  ;;  %v9773_v43 = vunpack.i.h.bf16 %v7108_v16  ;;  %v9495_v13 = vunpack.i.l.bf16 %v7285_v50 }
 0x338   :  { %v2145_v42 = vsel %vm365_vm4, %v4999_v1, %v9770_v35  ;;  %v2496_v18 = vsel %vm645_vm5, %v2488_v46, %v2424_v52  ;;  %v2493_v16 = vsel %vm645_vm5, %v7210_v4, %v2421_v34  ;;  %vm1742_vm6 = vcmp.lt.s32.totalorder %v5923_v7, 82 }
 0x339   :  { %v2148_v22 = vsel %vm365_vm4, %v9772_v39, %v9771_v37  ;;  %v2146_v45 = vsel %vm365_vm4, %v9773_v43, %v4999_v1  ;;  %v7400_v35 = vsel %vm9499_vm11, %v2496_v18, %v2448_v19  ;;  %v2495_v1 = vsel %vm645_vm5, %v7214_v61, %v2423_v57 }
 0x33a   :  { %9774 = vst [vmem:[#allocation23_spill] sm:$0xff] %v7400_v35  ;;  %v2497_v37 = vsel %vm645_vm5, %v2489_v27, %v2425_v28  ;;  %v9775_v39 = vrot.slane %v7251_v20, 6  ;;  %v2464_v52 = vsel %vm713_vm10, %v2145_v42, %v2328_v51  ;;  %v7412_v46 = vsel %vm9499_vm11, %v2493_v16, %v2445_v24 }
 0x33b   :  { %9776 = vst [vmem:[#allocation41_spill] sm:$0xff] %v7412_v46  ;;  %v7415_v19 = vsel %vm9499_vm11, %v2495_v1, %v2447_v62  ;;  %v9778_v18 = vrot.slane %v7245_v60, 6  ;;  %v2217_v34 = vsel %vm9502_vm1, %v5004_v12, %v4978_v40  ;;  %v7423_v57 = vsel %vm9499_vm11, %v2473_v8, %v2377_v30 }
 0x33c   :  { %v2461_v43 = vsel %vm713_vm10, %v2148_v22, %v9775_v39  ;;  %9777 = vst [vmem:[#allocation26_spill] sm:$0xff] %v7415_v19  ;;  %9779 = vst [vmem:[#allocation27_spill] sm:$0xff] %v7423_v57  ;;  %v7426_v61 = vsel %vm9499_vm11, %v2497_v37, %v2449_v11  ;;  %v9781_v20 = vunpack.i.h.bf16 %v7140_v0  ;;  %v9782_v62 = vunpack.i.l.bf16 %v7140_v0 }
 0x33d   :  { %v2463_v4 = vsel %vm713_vm10, %v2146_v45, %v9778_v18  ;;  %9780 = vst [vmem:[#allocation28_spill] sm:$0xff] %v7426_v61  ;;  %v9783_v28 = vrot.slane %v7279_v26, 4  ;;  %v9784_v24 = vrot.slane %v7261_v17, 4  ;;  %v2376_v37 = vrot.slane %v2217_v34, 2 }
 0x33e   :  { %v2218_v51 = vsel %vm9502_vm1, %v9781_v20, %v5004_v12  ;;  %v2220_v60 = vsel %vm9502_vm1, %v9495_v13, %v9782_v62  ;;  %v5019_v26 = vunpack.i.h.bf16 %v7330_v10  ;;  %v5018_v39 = vunpack.i.l.bf16 %v7330_v10 }
 0x33f   :  { %v2472_v0 = vsel %vm645_vm5, %v2464_v52, %v9783_v28  ;;  %v2469_v30 = vsel %vm645_vm5, %v2461_v43, %v9784_v24  ;;  %v2373_v16 = vrot.slane %v2220_v60, 2  ;;  %v2375_v1 = vrot.slane %v2218_v51, 2 }
 0x340   :  { %v9500_v52 = vunpack.i.h.bf16 %v7317_v15  ;;  %v9504_v18 = vunpack.i.l.bf16 %v7317_v15  ;;  %v9785_v20 = vrot.slane %v7255_v14, 4  ;;  %v7489_v13 = vsel %vm9499_vm11, %v2472_v0, %v2376_v37 }
 0x341   :  { %9786 = vst [vmem:[#allocation31_spill] sm:$0xff] %v7489_v13  ;;  %v7492_v14 = vsel %vm9499_vm11, %v2469_v30, %v2373_v16  ;;  %vm1692_vm1 = vcmp.lt.s32.totalorder %v5923_v7, 86  ;;  %v9803_v35 = vunpack.i.l.bf16 %v7317_v15 }
 0x342   :  { %v2471_v51 = vsel %vm645_vm5, %v2463_v4, %v9785_v20  ;;  %9787 = vst [vmem:[#allocation25_spill] sm:$0xff] %v7492_v14  ;;  %v9788_v4 = vunpack.i.l.bf16 %v7146_v56  ;;  %v9791_v56 = vunpack.i.h.bf16 %v7129_v59 }
 0x343   :  { %v7511_v30 = vsel %vm9499_vm11, %v2471_v51, %v2375_v1  ;;  %v1747_v1 = vsel %vm1742_vm6, %v9504_v18, %v9500_v52  ;;  %vm1667_vm11 = vcmp.lt.s32.totalorder %v5923_v7, 126 }
 0x344   :  { %v7498_v20 = vsel %vm9498_vm2, %v5019_v26, %v9788_v4  ;;  %9790 = vst [vmem:[#allocation43_spill] sm:$0xff] %v7511_v30  ;;  %v7517_v16 = vsel %vm9498_vm2, %v9791_v56, %v5018_v39  ;;  %v1897_v56 = vpack.c.bf16 %v1747_v1, %v1747_v1 }
 0x345   :  { %v7370_v29 = vpop.permute.xlu1 %5031  ;;  %v7372_v49 = vpop.permute.xlu0 %5026  ;;  %9792 = vst [vmem:[#allocation44_spill] sm:$0xff] %v7517_v16 }
 0x349   :  { %v7395_v33 = vpop.permute.xlu1 %5036  ;;  %v7397_v21 = vpop.permute.xlu0 %5041 }
 0x34a   :  { %v9506_v40 = vunpack.i.h.bf16 %v7397_v21  ;;  %v5043_v8 = vunpack.i.l.bf16 %v7397_v21 }
 0x34c   :  { %v1599_v17 = vsel %vm1592_vm15, %v5043_v8, %v9506_v40  ;;  %v9511_v40 = vunpack.i.l.bf16 %v7395_v33 }
 0x34d   :  { %v7442_v11 = vpop.permute.xlu1 %5046  ;;  %v7444_v27 = vpop.permute.xlu0 %5051  ;;  %v1760_v24 = vrot.slane %v1599_v17, 4 }
 0x34e   :  { %v9496_v42 = vunpack.i.h.bf16 %v7442_v11  ;;  %v9509_v22 = vunpack.i.l.bf16 %v7442_v11  ;;  %v9501_v12 = vunpack.i.h.bf16 %v7444_v27  ;;  %v9508_v45 = vunpack.i.l.bf16 %v7444_v27 }
 0x34f   :  { %v9795_v61 = vunpack.i.l.bf16 %v7442_v11 }
 0x350   :  { %v1649_v43 = vsel %vm1642_vm0, %v9509_v22, %v9496_v42  ;;  %v1574_v28 = vsel %vm1567_vm14, %v9508_v45, %v9501_v12  ;;  %v7502_v42 = vsel %vm9498_vm2, %v5018_v39, %v5019_v26  ;;  %vm1717_vm2 = vcmp.lt.s32.totalorder %v5923_v7, 84 }
 0x351   :  { %v5067_v34 = vpop.permute.xlu1 %5066  ;;  %v7473_v10 = vpop.permute.xlu0 %5056  ;;  %v1784_v55 = vrot.slane %v1649_v43, 4  ;;  %9789 = vst [vmem:[#allocation24_spill] sm:$0xff] %v7502_v42  ;;  %v1848_v26 = vsel %vm645_vm5, %v1574_v28, %v1760_v24  ;;  %v9503_v24 = vunpack.i.h.bf16 %v7370_v29 }
 0x352   :  { %v9497_v62 = vunpack.i.h.bf16 %v7473_v10  ;;  %v9507_v60 = vunpack.i.l.bf16 %v7473_v10  ;;  %v5069_v51 = vunpack.i.h.bf16 %v5067_v34  ;;  %v5068_v4 = vunpack.i.l.bf16 %v5067_v34 }
 0x354   :  { %v1624_v0 = vsel %vm1617_vm12, %v9507_v60, %v9497_v62  ;;  %v7548_v1 = vsel %vm1717_vm2, %v5069_v51, %v9503_v24  ;;  %v5028_v24 = vunpack.i.l.bf16 %v7372_v49 }
 0x355   :  { %v5072_v37 = vpop.permute.xlu1 %5071  ;;  %v5062_v17 = vpop.permute.xlu0 %5061  ;;  %v1856_v43 = vsel %vm645_vm5, %v1624_v0, %v1784_v55  ;;  %v9505_v0 = vunpack.i.l.bf16 %v7370_v29  ;;  %v9510_v55 = vunpack.i.h.bf16 %v7372_v49 }
 0x356   :  { %v5064_v59 = vunpack.i.h.bf16 %v5062_v17  ;;  %v5063_v62 = vunpack.i.l.bf16 %v5062_v17  ;;  %v1880_v39 = vpack.c.bf16 %v1856_v43, %v1848_v26  ;;  %v1723_v26 = vsel %vm1717_vm2, %v5068_v4, %v5069_v51 }
 0x357   :  { %v5074_v43 = vunpack.i.h.bf16 %v5072_v37  ;;  %v5073_v34 = vunpack.i.l.bf16 %v5072_v37 }
 0x358   :  { %1937 = vmatprep.subr.bf16.mxu0 %v1880_v39  ;;  %v1724_v39 = vsel %vm1717_vm2, %v9505_v0, %v5068_v4  ;;  %v1673_v28 = vsel %vm1667_vm11, %v5063_v62, %v5064_v59  ;;  %v7564_v0 = vsel %vm713_vm10, %v1897_v56, 0  ;;  %v1832_v4 = vrot.slane %v1723_v26, 4 }
 0x359   :  { %v7536_v17 = vpop.permute.xlu1 %5076  ;;  %v7538_v12 = vpop.permute.xlu0 %5081  ;;  %v1831_v45 = vrot.slane %v1724_v39, 4  ;;  %v1808_v22 = vrot.slane %v1673_v28, 4  ;;  %v1672_v52 = vsel %vm1667_vm11, %v5064_v59, %v9510_v55  ;;  %v1674_v56 = vsel %vm1667_vm11, %v5028_v24, %v5063_v62 }
 0x35a   :  { %v1699_v28 = vsel %vm1692_vm1, %v9511_v40, %v5073_v34  ;;  %v9793_v39 = vunpack.i.l.bf16 %v7538_v12  ;;  %v1698_v59 = vsel %vm1692_vm1, %v5073_v34, %v5074_v43  ;;  %v9794_v62 = vunpack.i.h.bf16 %v7395_v33 }
 0x35b   :  { %v5079_v18 = vunpack.i.h.bf16 %v7536_v17  ;;  %v1809_v60 = vrot.slane %v1672_v52, 4  ;;  %v1872_v14 = vsel %vm645_vm5, %v1698_v59, %v1832_v4  ;;  %v1871_v46 = vsel %vm645_vm5, %v1699_v28, %v1831_v45 }
 0x35c   :  { %v1600_v26 = vsel %vm1592_vm15, %v9793_v39, %v5043_v8  ;;  %v1697_v55 = vsel %vm1692_vm1, %v5074_v43, %v9794_v62  ;;  %v1807_v39 = vrot.slane %v1674_v56, 4  ;;  %v1864_v43 = vsel %vm645_vm5, %v7042_v48, %v1808_v22 }
 0x35d   :  { %v7568_v51 = vpop.permute.xlu1 %5086  ;;  %v7570_v37 = vpop.permute.xlu0 %5091  ;;  %v1759_v62 = vrot.slane %v1600_v26, 4  ;;  %v9797_v56 = vunpack.i.l.bf16 %v7444_v27  ;;  %v9799_v48 = vunpack.i.l.bf16 %v7473_v10  ;;  %v9800_v28 = vunpack.i.l.bf16 %v7536_v17 }
 0x35e   :  { %v9796_v57 = vunpack.i.l.bf16 %v7568_v51  ;;  %v9798_v34 = vunpack.i.l.bf16 %v7570_v37  ;;  %v9801_v59 = vunpack.i.h.bf16 %v7538_v12  ;;  %v1863_v4 = vsel %vm645_vm5, %v7039_v53, %v1807_v39 }
 0x35f   :  { %v1749_v26 = vsel %vm1742_vm6, %v9800_v28, %v5079_v18  ;;  %v1888_v53 = vpack.c.bf16 %v1872_v14, %v1864_v43  ;;  %v9810_v14 = vunpack.i.h.bf16 %v7473_v10 }
 0x360   :  { %v1650_v8 = vsel %vm1642_vm0, %v9796_v57, %v9795_v61  ;;  %v1575_v13 = vsel %vm1567_vm14, %v9798_v34, %v9797_v56  ;;  %v9805_v56 = vunpack.i.h.bf16 %v7442_v11  ;;  %v1895_v39 = vpack.c.bf16 %v1749_v26, %v1749_v26 }
 0x361   :  { %v7605_v30 = vpop.permute.xlu1 %5096  ;;  %v7607_v19 = vpop.permute.xlu0 %5101  ;;  %v1783_v61 = vrot.slane %v1650_v8, 4  ;;  %v9802_v8 = vunpack.i.h.bf16 %v7397_v21  ;;  %v1847_v21 = vsel %vm645_vm5, %v1575_v13, %v1759_v62  ;;  %v9806_v57 = vunpack.i.h.bf16 %v7570_v37 }
 0x362   :  { %v9517_v40 = vunpack.i.l.bf16 %v7605_v30  ;;  %v5104_v45 = vunpack.i.h.bf16 %v7607_v19  ;;  %v9807_v13 = vunpack.i.h.bf16 %v7444_v27  ;;  %v9811_v27 = vunpack.i.l.bf16 %v7370_v29 }
 0x363   :  { %v1598_v34 = vsel %vm1592_vm15, %v9802_v8, %v9801_v59  ;;  %v1748_v59 = vsel %vm1742_vm6, %v5079_v18, %v9803_v35  ;;  %v9804_v8 = vunpack.i.h.bf16 %v7568_v51  ;;  %v9808_v35 = vunpack.i.l.bf16 %v7607_v19 }
 0x364   :  { %v1625_v22 = vsel %vm1617_vm12, %v9517_v40, %v9799_v48  ;;  %v1761_v25 = vrot.slane %v1598_v34, 4  ;;  %v1573_v62 = vsel %vm1567_vm14, %v9807_v13, %v9806_v57  ;;  %v1675_v11 = vsel %vm1667_vm11, %v5104_v45, %v5028_v24 }
 0x365   :  { %v7641_v52 = vpop.permute.xlu1 %5106  ;;  %v7643_v48 = vpop.permute.xlu0 %5111  ;;  %v1855_v40 = vsel %vm645_vm5, %v1625_v22, %v1783_v61  ;;  %v1648_v61 = vsel %vm1642_vm0, %v9805_v56, %v9804_v8  ;;  %v1668_v18 = vsel %vm1667_vm11, %v9808_v35, %v5104_v45  ;;  %v1887_v56 = vpack.c.bf16 %v1871_v46, %v1863_v4 }
 0x366   :  { %v5109_v28 = vunpack.i.h.bf16 %v7641_v52  ;;  %v1879_v22 = vpack.c.bf16 %v1855_v40, %v1847_v21  ;;  %v9809_v40 = vunpack.i.h.bf16 %v7605_v30  ;;  %v1896_v21 = vpack.c.bf16 %v1748_v59, %v1748_v59 }
 0x367   :  { %v1785_v24 = vrot.slane %v1648_v61, 4  ;;  %v9812_v45 = vunpack.i.l.bf16 %v7641_v52  ;;  %v7693_v8 = vsel %vm645_vm5, %v7028_v63, %v1809_v60  ;;  %v9813_v13 = vrot.slane %v7548_v1, 4 }
 0x368   :  { %v1623_v43 = vsel %vm1617_vm12, %v9810_v14, %v9809_v40  ;;  %v1725_v57 = vsel %vm1717_vm2, %v5109_v28, %v9811_v27  ;;  %1938 = vmatpush1.bf16.msra.mxu0 %v1879_v22  ;;  %v1813_v35 = vrot.slane %v1668_v18, 4  ;;  %v1814_v40 = vrot.slane %v1675_v11, 4 }
 0x369   :  { %v7683_v26 = vpop.permute.xlu1 %5116  ;;  %v7685_v34 = vpop.permute.xlu0 %5131  ;;  %v1718_v10 = vsel %vm1717_vm2, %v9812_v45, %v5109_v28  ;;  %1939 = vmatprep.subr.bf16.mxu0 %v1888_v53  ;;  %v7698_v22 = vsel %vm645_vm5, %v1697_v55, %v9813_v13  ;;  %v1914_v46 = vsel %vm713_vm10, %v1895_v39, 0  ;;  %v7702_v4 = vsel %vm645_vm5, %v1573_v62, %v1761_v25 }
 0x36a   :  { %v1838_v59 = vrot.slane %v1725_v57, 4  ;;  %v5114_v28 = vunpack.i.h.bf16 %v7643_v48  ;;  %v9522_v61 = vunpack.i.l.bf16 %v7643_v48  ;;  %v7707_v63 = vsel %vm645_vm5, %v1623_v43, %v1785_v24 }
 0x36b   :  { %v1837_v60 = vrot.slane %v1718_v10, 4  ;;  %v5119_v1 = vunpack.i.h.bf16 %v7683_v26  ;;  %v9524_v55 = vunpack.i.l.bf16 %v7683_v26  ;;  %v9521_v53 = vunpack.i.h.bf16 %v7685_v34 }
 0x36c   :  { %1940 = vmatpush1.bf16.msra.mxu0 %v1887_v56  ;;  %v5133_v62 = vunpack.i.l.bf16 %v7685_v34  ;;  %v7724_v56 = vsel %vm645_vm5, %v7061_v32, %v1814_v40  ;;  %v1693_v24 = vsel %vm1692_vm1, %v9522_v61, %v5114_v28  ;;  %v9814_v45 = vunpack.i.h.bf16 %v7538_v12 }
 0x36d   :  { %v7712_v39 = vpop.permute.xlu1 %5121  ;;  %v5142_v25 = vpop.permute.xlu0 %5141  ;;  %4482 = vmatprep.subr.msk.bf16.mxu0 %vm713_vm10, %v1896_v21  ;;  %v9815_v13 = vunpack.i.l.bf16 %v7395_v33  ;;  %v9816_v40 = vunpack.i.h.bf16 %v7372_v49  ;;  %v7761_v49 = vsel %vm645_vm5, %v1693_v24, %v1837_v60  ;;  %v9819_v24 = vunpack.i.l.bf16 %v7607_v19 }
 0x36e   :  { %v9520_v18 = vunpack.i.h.bf16 %v7712_v39  ;;  %v5123_v11 = vunpack.i.l.bf16 %v7712_v39  ;;  %v5143_v14 = vunpack.i.l.bf16 %v5142_v25  ;;  %v5144_v43 = vunpack.i.h.bf16 %v5142_v25 }
 0x36f   :  { %v1700_v32 = vsel %vm1692_vm1, %v5114_v28, %v9815_v13  ;;  %v7758_v28 = vsel %vm645_vm5, %v7070_v23, %v1813_v35  ;;  %v9817_v13 = vunpack.i.l.bf16 %v7536_v17  ;;  %v1743_v23 = vsel %vm1742_vm6, %v9524_v55, %v5119_v1 }
 0x370   :  { %v1596_v21 = vsel %vm1592_vm15, %v5123_v11, %v9520_v18  ;;  %v1597_v10 = vsel %vm1592_vm15, %v9814_v45, %v5123_v11  ;;  %v1671_v25 = vsel %vm1667_vm11, %v9816_v40, %v5143_v14  ;;  %1942 = vmatpush1.bf16.msra.mxu0 %v1914_v46  ;;  %v7751_v18 = vld [vmem:[%s9393_s8] sm:$0x3]  ;;  %v7754_v11 = vsel %vm645_vm5, %v1700_v32, %v1838_v59 }
 0x371   :  { %v7746_v57 = vpop.permute.xlu1 %5126  ;;  %v5147_v27 = vpop.permute.xlu0 %5146  ;;  %v1571_v46 = vsel %vm1567_vm14, %v5133_v62, %v9521_v53  ;;  %v7772_v59 = vsel %vm1742_vm6, %v5119_v1, %v9817_v13  ;;  %v1762_v35 = vrot.slane %v1597_v10, 4  ;;  %v1763_v60 = vrot.slane %v1596_v21, 4 }
 0x372   :  { %v5128_v45 = vunpack.i.l.bf16 %v7746_v57  ;;  %9818 = vst [vmem:[#allocation45_spill] sm:$0xff] %v7772_v59  ;;  %v1669_v32 = vsel %vm1667_vm11, %v5144_v43, %v9819_v24  ;;  %v1670_v40 = vsel %vm1667_vm11, %v5143_v14, %v5144_v43  ;;  %v1810_v17 = vrot.slane %v1671_v25, 4 }
 0x373   :  { %v5148_v13 = vunpack.i.l.bf16 %v5147_v27  ;;  %v9820_v61 = vunpack.i.h.bf16 %v7570_v37  ;;  %4483 = vmatmul.mubr.msk.bf16.vlgmr.msra.gmra.mrb[24].mxu0 %vm709_vm13, %v7751_v18  ;;  %v5149_v1 = vunpack.i.h.bf16 %v5147_v27  ;;  %v1811_v25 = vrot.slane %v1670_v40, 4 }
 0x374   :  { %2051 = vmatprep.mubr.bf16.mxu0 %v9659_v31  ;;  %v1901_v24 = vpack.c.bf16 %v1743_v23, %v1743_v23  ;;  %v7807_v14 = vsel %vm645_vm5, %v1571_v46, %v1763_v60  ;;  %v9822_v43 = vunpack.i.h.bf16 %v7746_v57 }
 0x375   :  { %v1572_v58 = vsel %vm1567_vm14, %v9820_v61, %v5133_v62  ;;  %v7791_v19 = vpop.permute.xlu1 %5136  ;;  %v5152_v21 = vpop.permute.xlu0 %5151  ;;  %v1812_v61 = vrot.slane %v1669_v32, 4  ;;  %v9821_v62 = vunpack.i.h.bf16 %v7568_v51  ;;  %v9823_v32 = vunpack.i.h.bf16 %v7370_v29 }
 0x376   :  { %v5138_v55 = vunpack.i.l.bf16 %v7791_v19  ;;  %v5153_v53 = vunpack.i.l.bf16 %v5152_v21  ;;  %v1850_v10 = vsel %vm645_vm5, %v1572_v58, %v1762_v35  ;;  %v1646_v40 = vsel %vm1642_vm0, %v5128_v45, %v9822_v43 }
 0x377   :  { %v1647_v27 = vsel %vm1642_vm0, %v9821_v62, %v5128_v45  ;;  %v1721_v50 = vsel %vm1717_vm2, %v9823_v32, %v5148_v13  ;;  %v5139_v23 = vunpack.i.h.bf16 %v7791_v19  ;;  %v1866_v62 = vsel %vm645_vm5, %v7031_v3, %v1810_v17 }
 0x378   :  { %v1786_v59 = vrot.slane %v1647_v27, 4  ;;  %v9824_v58 = vunpack.i.l.bf16 %v7641_v52  ;;  %v7828_v45 = vsel %vm1717_vm2, %v5148_v13, %v5149_v1  ;;  %v9825_v29 = vunpack.i.h.bf16 %v7605_v30 }
 0x379   :  { %v5157_v60 = vpop.permute.xlu1 %5156  ;;  %v5162_v19 = vpop.permute.xlu0 %5161  ;;  %v5154_v43 = vunpack.i.h.bf16 %v5152_v21  ;;  %v9826_v3 = vunpack.i.h.bf16 %v7395_v33  ;;  %v1787_v32 = vrot.slane %v1646_v40, 4  ;;  %v1835_v42 = vrot.slane %v7828_v45, 4  ;;  %v9844_v45 = vld [vmem:[#allocation22_spill] sm:$0xff] }
 0x37a   :  { %v7824_v46 = vsel %vm1717_vm2, %v5149_v1, %v9824_v58  ;;  %v1622_v35 = vsel %vm1617_vm12, %v9825_v29, %v5138_v55  ;;  %v5159_v17 = vunpack.i.h.bf16 %v5157_v60  ;;  %v5158_v27 = vunpack.i.l.bf16 %v5157_v60 }
 0x37b   :  { %v1696_v52 = vsel %vm1692_vm1, %v9826_v3, %v5153_v53  ;;  %v1834_v58 = vrot.slane %v1721_v50, 4  ;;  %v1858_v13 = vsel %vm645_vm5, %v1622_v35, %v1786_v59  ;;  %v7841_v1 = vsel %vm645_vm5, %v7086_v54, %v1812_v61 }
 0x37c   :  { %v1836_v29 = vrot.slane %v7824_v46, 4  ;;  %v1621_v33 = vsel %vm1617_vm12, %v5138_v55, %v5139_v23  ;;  %v5164_v21 = vunpack.i.h.bf16 %v5162_v19  ;;  %v5163_v16 = vunpack.i.l.bf16 %v5162_v19 }
 0x37d   :  { %v7847_v3 = vpop.permute.xlu1 %5166  ;;  %v5172_v60 = vpop.permute.xlu0 %5171  ;;  %v1874_v50 = vsel %vm645_vm5, %v1696_v52, %v1834_v58  ;;  %v7852_v59 = vsel %vm645_vm5, %v7081_v9, %v1811_v25  ;;  %v7855_v54 = vsel %vm713_vm10, %v1901_v24, 0  ;;  %v9827_v61 = vunpack.i.l.bf16 %v7643_v48 }
 0x37e   :  { %v1594_v55 = vsel %vm1592_vm15, %v5158_v27, %v5159_v17  ;;  %v9828_v46 = vunpack.i.h.bf16 %v7712_v39  ;;  %v1882_v19 = vpack.c.bf16 %v1858_v13, %v1850_v10  ;;  %v7869_v9 = vsel %vm1692_vm1, %v5153_v53, %v5154_v43 }
 0x37f   :  { %v1694_v40 = vsel %vm1692_vm1, %v5154_v43, %v9827_v61  ;;  %v5169_v25 = vunpack.i.h.bf16 %v7847_v3  ;;  %v5168_v48 = vunpack.i.l.bf16 %v7847_v3  ;;  %v7874_v24 = vsel %vm645_vm5, %v1621_v33, %v1787_v32 }
 0x380   :  { %v1595_v35 = vsel %vm1592_vm15, %v9828_v46, %v5158_v27  ;;  %v9829_v52 = vunpack.i.l.bf16 %v7538_v12  ;;  %v9830_v58 = vunpack.i.l.bf16 %v7568_v51  ;;  %1978 = vmatprep.subr.bf16.mxu1 %v1882_v19  ;;  %v5173_v53 = vunpack.i.l.bf16 %v5172_v60 }
 0x381   :  { %v1890_v43 = vpack.c.bf16 %v1874_v50, %v1866_v62  ;;  %v1764_v27 = vrot.slane %v1595_v35, 4  ;;  %v1765_v13 = vrot.slane %v1594_v55, 4  ;;  %v9831_v61 = vunpack.i.h.bf16 %v7746_v57  ;;  %v5182_v33 = vpop.permute.xlu1 %5181  ;;  %v5177_v62 = vpop.permute.xlu0 %5176 }
 0x382   :  { %v1593_v39 = vsel %vm1592_vm15, %v5159_v17, %v9829_v52  ;;  %v1643_v10 = vsel %vm1642_vm0, %v5164_v21, %v9830_v58  ;;  %v9832_v12 = vunpack.i.h.bf16 %v7317_v15  ;;  %v9833_v17 = vpack.c.bf16 %v7707_v63, %v7702_v4 }
 0x383   :  { %v1645_v32 = vsel %vm1642_vm0, %v9831_v61, %v5163_v16  ;;  %v1644_v50 = vsel %vm1642_vm0, %v5163_v16, %v5164_v21  ;;  %v5174_v55 = vunpack.i.h.bf16 %v5172_v60  ;;  %v5184_v46 = vunpack.i.h.bf16 %v5182_v33 }
 0x384   :  { %v1746_v51 = vsel %vm1742_vm6, %v9832_v12, %v5168_v48  ;;  %1979 = vmatpush1.bf16.msra.mxu1 %v9833_v17  ;;  %v1766_v35 = vrot.slane %v1593_v39, 4  ;;  %v9834_v19 = vunpack.i.l.bf16 %v7683_v26  ;;  %v5183_v4 = vunpack.i.l.bf16 %v5182_v33 }
 0x385   :  { %v1898_v57 = vpack.c.bf16 %v1746_v51, %v1746_v51  ;;  %1980 = vmatprep.subr.bf16.mxu1 %v1890_v43  ;;  %v5179_v63 = vunpack.i.h.bf16 %v5177_v62  ;;  %v1790_v52 = vrot.slane %v1643_v10, 4  ;;  %v1788_v58 = vrot.slane %v1645_v32, 4  ;;  %v5187_v10 = vpop.permute.xlu1 %5186  ;;  %v5192_v32 = vpop.permute.xlu0 %5191 }
 0x386   :  { %v7905_v15 = vsel %vm1742_vm6, %v5169_v25, %v9834_v19  ;;  %v9835_v61 = vunpack.i.h.bf16 %v7685_v34  ;;  %v5178_v21 = vunpack.i.l.bf16 %v5177_v62  ;;  %v1789_v60 = vrot.slane %v1644_v50, 4 }
 0x387   :  { %v9836_v39 = vunpack.i.l.bf16 %v7605_v30  ;;  %v1620_v43 = vsel %vm1617_vm12, %v5139_v23, %v5183_v4  ;;  %v9837_v12 = vpack.c.bf16 %v7698_v22, %v7693_v8  ;;  %v1883_v34 = vpack.c.bf16 %v7874_v24, %v7807_v14 }
 0x388   :  { %v1570_v16 = vsel %vm1567_vm14, %v9835_v61, %v5173_v53  ;;  %v1900_v51 = vpack.c.bf16 %v7905_v15, %v7905_v15  ;;  %v9838_v30 = vunpack.i.l.bf16 %v7570_v37  ;;  %v1569_v23 = vsel %vm1567_vm14, %v5173_v53, %v5174_v55  ;;  %v9860_v15 = vld [vmem:[#allocation45_spill] sm:$0xff] }
 0x389   :  { %v1618_v26 = vsel %vm1617_vm12, %v5184_v46, %v9836_v39  ;;  %1981 = vmatpush1.bf16.msra.mxu1 %v9837_v12  ;;  %v5189_v8 = vunpack.i.h.bf16 %v5187_v10  ;;  %v1619_v22 = vsel %vm1617_vm12, %v5183_v4, %v5184_v46  ;;  %v9839_v33 = vunpack.i.l.bf16 %v7100_v36  ;;  %v7963_v19 = vpop.permute.xlu0 %5201 }
 0x38a   :  { %v1568_v17 = vsel %vm1567_vm14, %v5174_v55, %v9838_v30  ;;  %4484 = vmatprep.subr.msk.bf16.mxu1 %vm713_vm10, %v1898_v57  ;;  %v1852_v37 = vsel %vm645_vm5, %v1570_v16, %v1764_v27  ;;  %v1876_v24 = vsel %vm645_vm5, %v1694_v40, %v1836_v29  ;;  %v7943_v62 = vsel %vm465_vm7, %v5178_v21, %v5179_v63  ;;  %v7961_v27 = vpop.permute.xlu1 %5196 }
 0x38b   :  { %v7937_v14 = vsel %vm465_vm7, %v5179_v63, %v9839_v33  ;;  %v5188_v53 = vunpack.i.l.bf16 %v5187_v10  ;;  %v1860_v50 = vsel %vm645_vm5, %v1620_v43, %v1788_v58  ;;  %v1862_v57 = vsel %vm645_vm5, %v1618_v26, %v1790_v52 }
 0x38c   :  { %v9840_v55 = vunpack.i.h.bf16 %v7181_v5  ;;  %v9841_v46 = vunpack.i.l.bf16 %v7163_v38  ;;  %v1854_v40 = vsel %vm645_vm5, %v1568_v17, %v1766_v35  ;;  %v1853_v5 = vsel %vm645_vm5, %v1569_v23, %v1765_v13 }
 0x38d   :  { %1983 = vmatpush1.bf16.msra.mxu1 %v7564_v0  ;;  %v2404_v4 = vrot.slane %v7937_v14, 6  ;;  %v5194_v63 = vunpack.i.h.bf16 %v5192_v32  ;;  %v1861_v52 = vsel %vm645_vm5, %v1619_v22, %v1789_v60  ;;  %v1892_v38 = vpack.c.bf16 %v1876_v24, %v7841_v1  ;;  %v2525_v14 = vld [vmem:[%s9394_s10] sm:$0x3] }
 0x38e   :  { %v7951_v36 = vsel %vm465_vm7, %v9840_v55, %v5178_v21  ;;  %v7957_v29 = vsel %vm415_vm3, %v5189_v8, %v9841_v46  ;;  %v2403_v58 = vrot.slane %v7943_v62, 6  ;;  %v5193_v61 = vunpack.i.l.bf16 %v5192_v32  ;;  %v5207_v12 = vpop.permute.xlu1 %5206 }
 0x38f   :  { %v1884_v16 = vpack.c.bf16 %v1860_v50, %v1852_v37  ;;  %v1886_v0 = vpack.c.bf16 %v1862_v57, %v1854_v40  ;;  %v2402_v35 = vrot.slane %v7951_v36, 6  ;;  %v2356_v21 = vrot.slane %v7957_v29, 4 }
 0x390   :  { %v9842_v39 = vunpack.i.h.bf16 %v7127_v41  ;;  %4485 = vmatmul.mubr.msk.bf16.vlgmr.msra.gmra.mrb[24].mxu1 %vm709_vm13, %v7751_v18  ;;  %v5199_v1 = vunpack.i.h.bf16 %v7961_v27  ;;  %v7983_v60 = vsel %vm415_vm3, %v5188_v53, %v5189_v8  ;;  %v5203_v26 = vunpack.i.l.bf16 %v7963_v19  ;;  %v5212_v41 = vpop.permute.xlu0 %5211 }
 0x391   :  { %2019 = vmatprep.subr.bf16.mxu0 %v1884_v16  ;;  %2060 = vmatprep.subr.bf16.mxu1 %v1886_v0  ;;  %v1885_v43 = vpack.c.bf16 %v1861_v52, %v1853_v5  ;;  %v1875_v10 = vsel %vm645_vm5, %v7869_v9, %v1835_v42  ;;  %v9843_v32 = vunpack.i.l.bf16 %v7148_v6  ;;  %v5209_v17 = vunpack.i.h.bf16 %v5207_v12 }
 0x392   :  { %v7976_v13 = vsel %vm415_vm3, %v9842_v39, %v5188_v53  ;;  %2020 = vmatpush1.bf16.msra.mxu0 %v1883_v34  ;;  %v5208_v23 = vunpack.i.l.bf16 %v5207_v12  ;;  %v1745_v8 = vsel %vm1742_vm6, %v5168_v48, %v5169_v25  ;;  %2092 = vmatprep.mubr.bf16.mxu1 %v9659_v31  ;;  %v8006_v6 = vsel %vm490_vm8, %v5193_v61, %v5194_v63  ;;  %v2282_v46 = vpop.permute.xlu1 %2281 }
 0x393   :  { %v7994_v30 = vsel %vm490_vm8, %v5194_v63, %v9843_v32  ;;  %v2354_v42 = vrot.slane %v7976_v13, 4  ;;  %v9845_v9 = vunpack.i.h.bf16 %v9844_v45  ;;  %2061 = vmatpush1.bf16.msra.mxu1 %v1885_v43  ;;  %2021 = vmatprep.subr.bf16.mxu0 %v1892_v38  ;;  %v5213_v22 = vunpack.i.l.bf16 %v5212_v41  ;;  %v9856_v13 = vld [vmem:[#allocation44_spill] sm:$0xff] }
 0x394   :  { %v5198_v3 = vunpack.i.l.bf16 %v7961_v27  ;;  %v8015_v25 = vsel %vm540_vm9, %v5199_v1, %v5203_v26  ;;  %v9846_v48 = vpack.c.bf16 %v7754_v11, %v7724_v56  ;;  %v5214_v33 = vunpack.i.h.bf16 %v5212_v41  ;;  %v8031_v40 = vpop.permute.xlu0 %2301 }
 0x395   :  { %v2262_v34 = vsel %vm490_vm8, %v9845_v9, %v5193_v61  ;;  %v1891_v37 = vpack.c.bf16 %v1875_v10, %v7852_v59  ;;  %v9847_v24 = vunpack.i.l.bf16 %v7235_v47  ;;  %v2142_v50 = vsel %vm365_vm4, %v5208_v23, %v5209_v17 }
 0x396   :  { %2062 = vmatprep.subr.bf16.mxu1 %v9846_v48  ;;  %v9848_v57 = vunpack.i.h.bf16 %v7138_v2  ;;  %v1899_v56 = vpack.c.bf16 %v1745_v8, %v1745_v8  ;;  %v2355_v11 = vrot.slane %v7983_v60, 4  ;;  %v2428_v59 = vrot.slane %v7994_v30, 4  ;;  %v2284_v8 = vpop.permute.xlu1 %2283 }
 0x397   :  { %v2141_v53 = vsel %vm365_vm4, %v5209_v17, %v9847_v24  ;;  %v2427_v47 = vrot.slane %v8006_v6, 4  ;;  %v5204_v5 = vunpack.i.h.bf16 %v7963_v19  ;;  %2022 = vmatpush1.bf16.msra.mxu0 %v1891_v37  ;;  %v2426_v63 = vrot.slane %v2262_v34, 4  ;;  %v9852_v19 = vld [vmem:[#allocation35_spill] sm:$0xff] }
 0x398   :  { %v2143_v55 = vsel %vm365_vm4, %v9848_v57, %v5208_v23  ;;  %v2518_v2 = vpack.c.bf16 %v8015_v25, %v8015_v25  ;;  %v9849_v52 = vunpack.i.h.bf16 %v7183_v44  ;;  %vm9850_vm0 = vcmp.lt.s32.totalorder %v5923_v7, 1  ;;  %4486 = vmatprep.subr.msk.bf16.mxu0 %vm713_vm10, %v1900_v51  ;;  %v5217_v6 = vpop.permute.xlu0 %5216 }
 0x399   :  { %v9851_v61 = vpack.c.bf16 %v7761_v49, %v7758_v28  ;;  %v9853_v16 = vunpack.i.h.bf16 %v9852_v19  ;;  %vm9854_vm1 = vcmp.lt.s32.totalorder %v5923_v7, 106  ;;  %v9855_v39 = vrot.slane %v7498_v20, 6  ;;  %v9858_v28 = vld [vmem:[#allocation24_spill] sm:$0xff]  ;;  %v9862_v20 = vld [vmem:[#allocation21_spill] sm:$0xff]  ;;  %vm9864_vm2 = vmmov %vm9850_vm0 }
 0x39a   :  { %v2215_v38 = vsel %vm9850_vm0, %v9849_v52, %v5213_v22  ;;  %v9857_v60 = vrot.slane %v9856_v13, 6  ;;  %v9859_v49 = vrot.slane %v9858_v28, 6  ;;  %v9861_v51 = vpack.c.bf16 %v9860_v15, %v9860_v15  ;;  %vm9865_vm6 = vmmov %vm9850_vm0  ;;  %v9874_v52 = vld [vmem:[#allocation31_spill] sm:$0xff]  ;;  %v9882_v15 = vld [vmem:[#allocation26_spill] sm:$0xff] }
 0x39b   :  { %2063 = vmatpush1.bf16.msra.mxu1 %v9851_v61  ;;  %v2286_v0 = vsel %vm9854_vm1, %v9853_v16, %v2282_v46  ;;  %v2468_v44 = vsel %vm713_vm10, %v2141_v53, %v9855_v39  ;;  %v2312_v41 = vsel %vm540_vm9, %v5204_v5, %v8031_v40  ;;  %v9863_v10 = vunpack.i.l.bf16 %v9862_v20  ;;  %vm9866_vm11 = vmmov %vm9854_vm1  ;;  %v9870_v53 = vld [vmem:[#allocation32_spill] sm:$0xff]  ;;  %v9877_v16 = vld [vmem:[#allocation37_spill] sm:$0xff] }
 0x39c   :  { %v2466_v43 = vsel %vm713_vm10, %v2143_v55, %v9857_v60  ;;  %v2467_v12 = vsel %vm713_vm10, %v2142_v50, %v9859_v49  ;;  %4488 = vmatprep.subr.msk.bf16.mxu1 %vm713_vm10, %v9861_v51  ;;  %v2214_v17 = vsel %vm9865_vm6, %v5213_v22, %v5214_v33  ;;  %v1926_v23 = vsel %vm713_vm10, %v1899_v56, 0  ;;  %v9867_v22 = vld [vmem:[#allocation38_spill] sm:$0xff]  ;;  %vm9872_vm12 = vmmov %vm9854_vm1  ;;  %v9873_v56 = vld [vmem:[#allocation23_spill] sm:$0xff]  ;;  %v2308_v49 = vpop.permute.xlu1 %2307 }
 0x39d   :  { %v2213_v32 = vsel %vm9864_vm2, %v5214_v33, %v9863_v10  ;;  %v2315_v45 = vsel %vm540_vm9, %v5198_v3, %v5199_v1  ;;  %v2378_v9 = vrot.slane %v2215_v38, 2  ;;  %v2450_v34 = vrot.slane %v2286_v0, 2  ;;  %2024 = vmatpush1.bf16.msra.mxu0 %v1926_v23  ;;  %v9868_v33 = vld [vmem:[#allocation20_spill] sm:$0xff]  ;;  %v9883_v51 = vld [vmem:[#allocation43_spill] sm:$0xff]  ;;  %v9890_v10 = vld [vmem:[#allocation33_spill] sm:$0xff] }
 0x39e   :  { %v2285_v25 = vsel %vm9866_vm11, %v2282_v46, %v2284_v8  ;;  %v2313_v48 = vsel %vm540_vm9, %v5203_v26, %v5204_v5  ;;  %v2520_v37 = vpack.c.bf16 %v2312_v41, %v2312_v41  ;;  %v9869_v24 = vpack.c.bf16 %v9867_v22, %v9868_v33 }
 0x39f   :  { %2065 = vmatpush1.bf16.msra.mxu1 %v7855_v54  ;;  %v9871_v50 = vunpack.i.l.bf16 %v9870_v53  ;;  %v5219_v57 = vunpack.i.h.bf16 %v5217_v6  ;;  %v5218_v55 = vunpack.i.l.bf16 %v5217_v6  ;;  %v9875_v46 = vpack.c.bf16 %v9873_v56, %v9874_v52  ;;  %v9876_v54 = vld [vmem:[#allocation36_spill] sm:$0xff] }
 0x3a0   :  { %2559 = vmatprep.subr.bf16.mxu0 %v9869_v24  ;;  %v2451_v38 = vrot.slane %v2285_v25, 2  ;;  %v2517_v26 = vpack.c.bf16 %v2315_v45, %v2315_v45  ;;  %v2474_v5 = vsel %vm645_vm5, %v2466_v43, %v2354_v42  ;;  %v2490_v61 = vsel %vm713_vm10, %v9876_v54, %v2402_v35  ;;  %4487 = vmatmul.mubr.msk.bf16.vlgmr.msra.gmra.mrb[28].mxu0 %vm709_vm13, %v7751_v18  ;;  %v9878_v35 = vld [vmem:[#allocation41_spill] sm:$0xff]  ;;  %v9896_v6 = vld [vmem:[#allocation28_spill] sm:$0xff] }
 0x3a1   :  { %v2292_v1 = vsel %vm9872_vm12, %v2284_v8, %v9871_v50  ;;  %2600 = vmatprep.subr.bf16.mxu1 %v9875_v46  ;;  %v2380_v19 = vrot.slane %v2213_v32, 2  ;;  %v2491_v0 = vsel %vm713_vm10, %v9877_v16, %v2403_v58  ;;  %v2519_v39 = vpack.c.bf16 %v2313_v48, %v2313_v48  ;;  %v9879_v43 = vld [vmem:[#allocation25_spill] sm:$0xff]  ;;  %2591 = vmatprep.mubr.bf16.mxu0 %v9659_v31  ;;  %v9895_v8 = vld [vmem:[#allocation27_spill] sm:$0xff] }
 0x3a2   :  { %v2498_v13 = vsel %vm645_vm5, %v2490_v61, %v2426_v63  ;;  %v2379_v60 = vrot.slane %v2214_v17, 2  ;;  %4489 = vmatmul.mubr.msk.bf16.vlgmr.msra.gmra.mrb[28].mxu1 %vm709_vm13, %v7751_v18  ;;  %v2452_v36 = vrot.slane %v2292_v1, 2  ;;  %v2499_v42 = vsel %vm645_vm5, %v2491_v0, %v2427_v47 }
 0x3a3   :  { %v9880_v28 = vpack.c.bf16 %v9878_v35, %v9879_v43  ;;  %vm9881_vm14 = vcmask 1045504   ;;  %v2310_v58 = vsel %vm540_vm9, %v5218_v55, %v5219_v57  ;;  %v9884_v63 = vpack.c.bf16 %v9882_v15, %v9883_v51  ;;  %2632 = vmatprep.mubr.bf16.mxu1 %v9659_v31  ;;  %v9907_v51 = vld [vmem:[#allocation13_spill] sm:$0xff] }
 0x3a4   :  { %v2506_v62 = vsel %vm9881_vm14, %v2498_v13, %v2450_v34  ;;  %vm9885_vm15 = vcmask 1040384   ;;  %vm9886_vm0 = vmmov %vm9881_vm14  ;;  %v2476_v47 = vsel %vm645_vm5, %v2468_v44, %v2356_v21  ;;  %v2492_v32 = vsel %vm713_vm10, %v9890_v10, %v2404_v4 }
 0x3a5   :  { %2560 = vmatpush1.bf16.msra.mxu0 %v9880_v28  ;;  %2601 = vmatpush1.bf16.msra.mxu1 %v9884_v63  ;;  %v2482_v18 = vsel %vm9886_vm0, %v2474_v5, %v2378_v9  ;;  %vm9887_vm1 = vmmov %vm9886_vm0  ;;  %v2316_v29 = vsel %vm540_vm9, %v2308_v49, %v5198_v3  ;;  %v2500_v17 = vsel %vm645_vm5, %v2492_v32, %v2428_v59  ;;  %v9910_v32 = vld [vmem:[#allocation12_spill] sm:$0xff] }
 0x3a6   :  { %4490 = vmatprep.subr.msk.bf16.mxu0 %vm9885_vm15, %v2518_v2  ;;  %v2507_v41 = vsel %vm9887_vm1, %v2499_v42, %v2451_v38  ;;  %vm9888_vm2 = vmmov %vm9885_vm15  ;;  %v2475_v2 = vsel %vm645_vm5, %v2467_v12, %v2355_v11  ;;  %v2514_v44 = vpack.c.bf16 %v2506_v62, %v2482_v18  ;;  %v2311_v11 = vsel %vm540_vm9, %v8031_v40, %v5218_v55  ;;  %v2530_v61 = vpop.permute.xlu0 %2529 }
 0x3a7   :  { %4492 = vmatprep.subr.msk.bf16.mxu1 %vm9888_vm2, %v2520_v37  ;;  %vm9889_vm6 = vmmov %vm9888_vm2  ;;  %v2309_v30 = vsel %vm540_vm9, %v5219_v57, %v2308_v49  ;;  %v2524_v23 = vpack.c.bf16 %v2316_v29, %v2316_v29  ;;  %v2513_v45 = vpack.c.bf16 %v9896_v6, %v9895_v8  ;;  %v2522_v9 = vpack.c.bf16 %v2310_v58, %v2310_v58 }
 0x3a8   :  { %v2536_v20 = vsel %vm9889_vm6, %v2517_v26, 0  ;;  %vm9891_vm11 = vmmov %vm9888_vm2  ;;  %v2521_v34 = vpack.c.bf16 %v2311_v11, %v2311_v11  ;;  %v2523_v25 = vpack.c.bf16 %v2309_v30, %v2309_v30 }
 0x3a9   :  { %v2542_v21 = vsel %vm9891_vm11, %v2519_v39, 0  ;;  %2562 = vmatpush1.bf16.msra.mxu0 %v2536_v20  ;;  %vm9892_vm12 = vmmov %vm9886_vm0  ;;  %v9909_v20 = vld [vmem:[#allocation14_spill] sm:$0xff] }
 0x3aa   :  { %v2484_v4 = vsel %vm9892_vm12, %v2476_v47, %v2380_v19  ;;  %vm9893_vm14 = vmmov %vm9886_vm0  ;;  %2603 = vmatpush1.bf16.msra.mxu1 %v2542_v21  ;;  %2641 = vmatprep.subr.bf16.mxu0 %v2514_v44  ;;  %v9908_v47 = vld [vmem:[#allocation11_spill] sm:$0xff] }
 0x3ab   :  { %v2508_v27 = vsel %vm9893_vm14, %v2500_v17, %v2452_v36  ;;  %vm9894_vm15 = vmmov %vm9886_vm0  ;;  %vm9897_vm0 = vcmask 146432  }
 0x3ac   :  { %v2483_v3 = vsel %vm9894_vm15, %v2475_v2, %v2379_v60  ;;  %v2516_v59 = vpack.c.bf16 %v2508_v27, %v2484_v4  ;;  %4491 = vmatmul.mubr.msk.bf16.vlgmr.msra.gmra.mrb[32].mxu0 %vm9897_vm0, %v2525_v14  ;;  %vm9898_vm1 = vmmov %vm9897_vm0 }
 0x3ad   :  { %v2515_v12 = vpack.c.bf16 %v2507_v41, %v2483_v3  ;;  %4493 = vmatmul.mubr.msk.bf16.vlgmr.msra.gmra.mrb[32].mxu1 %vm9898_vm1, %v2525_v14  ;;  %2642 = vmatpush1.bf16.msra.mxu0 %v2513_v45  ;;  %vm9899_vm6 = vmmov %vm9888_vm2 }
 0x3ae   :  { %2682 = vmatprep.subr.bf16.mxu1 %v2516_v59  ;;  %4494 = vmatprep.subr.msk.bf16.mxu0 %vm9888_vm2, %v2522_v9  ;;  %vm9900_vm11 = vmmov %vm9888_vm2 }
 0x3af   :  { %2683 = vmatpush1.bf16.msra.mxu1 %v2515_v12  ;;  %2673 = vmatprep.mubr.bf16.mxu0 %v9659_v31  ;;  %v2548_v40 = vsel %vm9900_vm11, %v2521_v34, 0  ;;  %vm9901_vm12 = vmmov %vm9888_vm2 }
 0x3b0   :  { %4496 = vmatprep.subr.msk.bf16.mxu1 %vm9899_vm6, %v2524_v23  ;;  %2714 = vmatprep.mubr.bf16.mxu1 %v9659_v31  ;;  %v2554_v48 = vsel %vm9901_vm12, %v2523_v25, 0  ;;  %vm9902_vm14 = vmmov %vm9897_vm0  ;;  %v9911_v25 = vld [vmem:[#allocation17_spill] sm:$0xff]  ;;  %vm3099_vm6 = vcmask 1042432   ;;  %vm3132_vm12 = vcmask 1046528  }
 0x3b1   :  { %2644 = vmatpush1.bf16.msra.mxu0 %v2548_v40  ;;  %vm9903_vm15 = vmmov %vm9897_vm0  ;;  %vm9915_vm0 = vcmp.lt.s32.totalorder %v5923_v7, 1 }
 0x3b2   :  { %vm9916_vm1 = vmmov %vm9915_vm0 }
 0x3b3   :  { %2685 = vmatpush1.bf16.msra.mxu1 %v2554_v48  ;;  %vm9917_vm2 = vmmov %vm9915_vm0 }
 0x3b4   :  { %4495 = vmatmul.mubr.msk.bf16.vlgmr.msra.gmra.mrb[36].mxu0 %vm9902_vm14, %v2525_v14  ;;  %vm9918_vm14 = vcmp.lt.s32.totalorder %v5923_v7, 22 }
 0x3b5   :  { %3243 = vmatprep.mubr.bf16.mxu0 %v9659_v31 }
 0x3b6   :  { %4497 = vmatmul.mubr.msk.bf16.vlgmr.msra.gmra.mrb[36].mxu1 %vm9903_vm15, %v2525_v14  ;;  %vm9919_vm15 = vmmov %vm9918_vm14 }
 0x3b7   :  { %3284 = vmatprep.mubr.bf16.mxu1 %v9659_v31 }
 0x446   :  { %v8168_v37 = vpop.f32.mrb[24].mxu0 }
 0x447   :  { %v8170_v22 = vpop.f32.mrb[25].mxu0 }
 0x448   :  { %v1975_v33 = vpop.f32.mrb[26].mxu0 }
 0x449   :  { %v1976_v24 = vpop.f32.mrb[27].mxu0  ;;  %v9912_v33 = vld [vmem:[#allocation18_spill] sm:$0xff] }
 0x463   :  { %v8172_v53 = vpop.f32.mrb[24].mxu1 }
 0x464   :  { %v8174_v50 = vpop.f32.mrb[25].mxu1 }
 0x465   :  { %v2016_v1 = vpop.f32.mrb[26].mxu1 }
 0x466   :  { %v2017_v57 = vpop.f32.mrb[27].mxu1  ;;  %v9913_v1 = vld [vmem:[#allocation10_spill] sm:$0xff] }
 0x473   :  { %v8176_v55 = vpop.f32.mrb[28].mxu0 }
 0x474   :  { %v8180_v52 = vpop.f32.mrb[29].mxu0 }
 0x475   :  { %v8178_v56 = vpop.f32.mrb[28].mxu1  ;;  %9905 = vst [vmem:[#allocation35_spill] sm:$0xff] %v8180_v52  ;;  %v2057_v38 = vpop.f32.mrb[30].mxu0 }
 0x476   :  { %9904 = vst [vmem:[#allocation22_spill] sm:$0xff] %v8178_v56  ;;  %v8182_v46 = vpop.f32.mrb[29].mxu1  ;;  %v2058_v5 = vpop.f32.mrb[31].mxu0  ;;  %v9914_v38 = vld [vmem:[#allocation19_spill] sm:$0xff] }
 0x477   :  { %9906 = vst [vmem:[#allocation44_spill] sm:$0xff] %v8182_v46  ;;  %v2098_v26 = vpop.f32.mrb[30].mxu1 }
 0x478   :  { %v2099_v54 = vpop.f32.mrb[31].mxu1 }
 0x47f   :  { %v2593_v19 = vpop.f32.mrb[32].mxu0 }
 0x480   :  { %v2594_v16 = vadd.f32 %v2593_v19, %v2530_v61  ;;  %v2634_v0 = vpop.f32.mrb[32].mxu1  ;;  %v2595_v39 = vpop.f32.mrb[33].mxu0 }
 0x481   :  { %v2635_v13 = vadd.f32 %v2634_v0, %v2530_v61  ;;  %v2596_v60 = vadd.f32 %v2595_v39, %v2530_v61  ;;  %v2636_v36 = vpop.f32.mrb[33].mxu1  ;;  %v2597_v42 = vpop.f32.mrb[34].mxu0  ;;  %v3175_v0 = vld [vmem:[%s9395_s13] sm:$0xf] }
 0x482   :  { %v2723_v35 = vmax.f32 %v2594_v16, 0.0  ;;  %v2637_v43 = vadd.f32 %v2636_v36, %v2530_v61  ;;  %v2638_v28 = vpop.f32.mrb[34].mxu1  ;;  %v2598_v49 = vpop.f32.mrb[35].mxu0 }
 0x483   :  { %v2725_v62 = vmax.f32 %v2635_v13, 0.0  ;;  %v2724_v58 = vmax.f32 %v2596_v60, 0.0  ;;  %v2639_v15 = vpop.f32.mrb[35].mxu1 }
 0x484   :  { %v8185_v63 = vmul.f32 %v2723_v35, %v9907_v51  ;;  %v2726_v18 = vmax.f32 %v2637_v43, 0.0 }
 0x485   :  { %v8188_v41 = vmul.f32 %v2725_v62, %v9908_v47  ;;  %v8191_v10 = vmul.f32 %v2724_v58, %v9909_v20 }
 0x486   :  { %v8194_v2 = vmul.f32 %v2726_v18, %v9910_v32 }
 0x487   :  { %v2675_v29 = vpop.f32.mrb[36].mxu0  ;;  %v5235_v21 = vpack.i.bf16 %v8185_v63, %v8191_v10  ;;  %v5255_v44 = vpack.i.bf16 %v8191_v10, %v8188_v41 }
 0x488   :  { %v2676_v17 = vadd.f32 %v2675_v29, %v2530_v61  ;;  %v2677_v4 = vpop.f32.mrb[37].mxu0  ;;  %v5225_v27 = vpack.i.bf16 %v8194_v2, %v8188_v41 }
 0x489   :  { %v2716_v14 = vpop.f32.mrb[36].mxu1  ;;  %v2678_v11 = vadd.f32 %v2677_v4, %v2530_v61  ;;  %v2679_v59 = vpop.f32.mrb[38].mxu0  ;;  %v3012_v4 = vrot.slane %v8191_v10, 4 }
 0x48a   :  { %v2717_v3 = vadd.f32 %v2716_v14, %v2530_v61  ;;  %v2718_v30 = vpop.f32.mrb[37].mxu1  ;;  %v2727_v12 = vmax.f32 %v2676_v17, 0.0  ;;  %5226 = vrot.lane.b32.xlu0 %v5225_v27, %s5523_s29  ;;  %5221 = vrot.lane.b32.xlu1 %v5225_v27, %s5525_s0  ;;  %v2680_v8 = vpop.f32.mrb[39].mxu0 }
 0x48b   :  { %v2719_v23 = vadd.f32 %v2718_v30, %v2530_v61  ;;  %v2720_v6 = vpop.f32.mrb[38].mxu1  ;;  %v2728_v9 = vmax.f32 %v2678_v11, 0.0  ;;  %v3014_v11 = vrot.slane %v8194_v2, 4  ;;  %v3013_v30 = vrot.slane %v8188_v41, 4 }
 0x48c   :  { %v2729_v45 = vmax.f32 %v2717_v3, 0.0  ;;  %v2721_v34 = vpop.f32.mrb[39].mxu1  ;;  %v8205_v40 = vmul.f32 %v2727_v12, %v9911_v25 }
 0x48d   :  { %v2730_v48 = vmax.f32 %v2719_v23, 0.0  ;;  %v8211_v57 = vmul.f32 %v2728_v9, %v9913_v1 }
 0x48e   :  { %v8208_v24 = vmul.f32 %v2729_v45, %v9912_v33  ;;  %5236 = vrot.lane.b32.xlu0 %v5235_v21, %s5525_s0  ;;  %5231 = vrot.lane.b32.xlu1 %v5225_v27, %s5524_s30  ;;  %v5280_v5 = vpack.i.bf16 %v8205_v40, %v8194_v2 }
 0x48f   :  { %v8214_v26 = vmul.f32 %v2730_v48, %v9914_v38  ;;  %v5335_v54 = vpack.i.bf16 %v8205_v40, %v8211_v57 }
 0x490   :  { %v5350_v16 = vpack.i.bf16 %v8211_v57, %v8208_v24 }
 0x491   :  { %v5300_v61 = vpack.i.bf16 %v8208_v24, %v8214_v26  ;;  %v5315_v19 = vpack.i.bf16 %v8214_v26, %v8185_v63 }
 0x492   :  { %5246 = vrot.lane.b32.xlu0 %v5235_v21, %s5524_s30  ;;  %5241 = vrot.lane.b32.xlu1 %v5235_v21, %s5523_s29 }
 0x496   :  { %5251 = vrot.lane.b32.xlu0 %v5225_v27, %s5526_s21  ;;  %5256 = vrot.lane.b32.xlu1 %v5255_v44, %s5528_s22 }
 0x49a   :  { %5266 = vrot.lane.b32.xlu0 %v5255_v44, %s5529_s24  ;;  %5261 = vrot.lane.b32.xlu1 %v5235_v21, %s5526_s21 }
 0x49e   :  { %5271 = vrot.lane.b32.xlu0 %v5255_v44, %s5527_s3  ;;  %5281 = vrot.lane.b32.xlu1 %v5280_v5, %s5528_s22 }
 0x4a2   :  { %5276 = vrot.lane.b32.xlu0 %v5255_v44, %s5530_s2  ;;  %5291 = vrot.lane.b32.xlu1 %v5280_v5, %s5527_s3 }
 0x4a6   :  { %5286 = vrot.lane.b32.xlu0 %v5280_v5, %s5529_s24  ;;  %5296 = vrot.lane.b32.xlu1 %v5280_v5, %s5530_s2 }
 0x4aa   :  { %5301 = vrot.lane.b32.xlu0 %v5300_v61, %s5525_s0  ;;  %5306 = vrot.lane.b32.xlu1 %v5300_v61, %s5523_s29 }
 0x4ae   :  { %5316 = vrot.lane.b32.xlu0 %v5315_v19, %s5528_s22  ;;  %5311 = vrot.lane.b32.xlu1 %v5300_v61, %s5524_s30 }
 0x4b2   :  { %5321 = vrot.lane.b32.xlu0 %v5300_v61, %s5526_s21  ;;  %5326 = vrot.lane.b32.xlu1 %v5315_v19, %s5529_s24 }
 0x4b6   :  { %5336 = vrot.lane.b32.xlu0 %v5335_v54, %s5523_s29  ;;  %5331 = vrot.lane.b32.xlu1 %v5335_v54, %s5525_s0  ;;  %s5541_s0 = smov 66  }
 0x4ba   :  { %5346 = vrot.lane.b32.xlu0 %v5335_v54, %s5524_s30  ;;  %5341 = vrot.lane.b32.xlu1 %v5315_v19, %s5527_s3 }
 0x4be   :  { %5356 = vrot.lane.b32.xlu0 %v5335_v54, %s5526_s21  ;;  %5351 = vrot.lane.b32.xlu1 %v5350_v16, %s5528_s22  ;;  %s5542_s21 = smov 3   ;;  %s5544_s22 = smov 63  }
 0x4c2   :  { %5366 = vrot.lane.b32.xlu0 %v5315_v19, %s5530_s2  ;;  %5361 = vrot.lane.b32.xlu1 %v5350_v16, %s5529_s24  ;;  %s5545_s24 = smov 65  }
 0x4c6   :  { %2919 = vrot.lane.b32.xlu0 %v8208_v24, %s5530_s2  ;;  %5371 = vrot.lane.b32.xlu1 %v5350_v16, %s5527_s3  ;;  %s5543_s3 = smov 69  }
 0x4ca   :  { %3178 = vperm.xlu0 %4598, %v3175_v0   ;;  %2917 = vrot.lane.b32.xlu1 %v8211_v57, %s5530_s2  ;;  %s5546_s2 = smov 62  }
 0x4fc   :  { %v8262_v39 = vpop.permute.xlu0 %5226  ;;  %v8264_v13 = vpop.permute.xlu1 %5221 }
 0x4fd   :  { %v9532_v60 = vunpack.i.h.bf16 %v8262_v39  ;;  %v5228_v36 = vunpack.i.l.bf16 %v8262_v39  ;;  %v9531_v42 = vunpack.i.h.bf16 %v8264_v13  ;;  %v5223_v35 = vunpack.i.l.bf16 %v8264_v13 }
 0x4fe   :  { %v9951_v52 = vunpack.i.h.bf16 %v8262_v39 }
 0x4ff   :  { %v2831_v49 = vsel %vm9915_vm0, %v5228_v36, %v9532_v60  ;;  %v8282_v62 = vsel %vm415_vm3, %v5223_v35, %v9531_v42  ;;  %vm9920_vm0 = vmmov %vm9918_vm14 }
 0x500   :  { %v8270_v43 = vpop.permute.xlu0 %5236  ;;  %v8272_v28 = vpop.permute.xlu1 %5231  ;;  %v2990_v18 = vrot.slane %v2831_v49, 7  ;;  %v9541_v29 = vrot.slane %v8282_v62, 2 }
 0x501   :  { %v9538_v58 = vunpack.i.h.bf16 %v8270_v43  ;;  %v5238_v15 = vunpack.i.l.bf16 %v8270_v43  ;;  %v9530_v27 = vunpack.i.h.bf16 %v8272_v28  ;;  %v5233_v3 = vunpack.i.l.bf16 %v8272_v28 }
 0x502   :  { %v3119_v9 = vsel %vm9900_vm11, %v9541_v29, %v2990_v18 }
 0x503   :  { %v2809_v59 = vsel %vm415_vm3, %v9538_v58, %v5238_v15  ;;  %v2808_v61 = vsel %vm415_vm3, %v5238_v15, %v5223_v35  ;;  %v2783_v16 = vsel %vm9918_vm14, %v5233_v3, %v9530_v27  ;;  %v3127_v49 = vsel %vm645_vm5, %v3119_v9, %v3014_v11 }
 0x504   :  { %v8287_v21 = vpop.permute.xlu0 %5246  ;;  %v8289_v44 = vpop.permute.xlu1 %5241  ;;  %v2964_v19 = vrot.slane %v2809_v59, 2  ;;  %vm9923_vm14 = vcmask 1045504  }
 0x505   :  { %v9537_v17 = vunpack.i.h.bf16 %v8289_v44  ;;  %v5243_v14 = vunpack.i.l.bf16 %v8289_v44  ;;  %v9534_v12 = vunpack.i.h.bf16 %v8287_v21  ;;  %v5248_v23 = vunpack.i.l.bf16 %v8287_v21 }
 0x507   :  { %v2833_v10 = vsel %vm9916_vm1, %v9537_v17, %v5243_v14  ;;  %v2832_v8 = vsel %vm9917_vm2, %v5243_v14, %v5228_v36  ;;  %v2785_v0 = vsel %vm9919_vm15, %v9534_v12, %v5248_v23  ;;  %v2784_v35 = vsel %vm9920_vm0, %v5248_v23, %v5233_v3  ;;  %vm9921_vm1 = vmmov %vm9900_vm11 }
 0x508   :  { %v2988_v2 = vrot.slane %v2833_v10, 7  ;;  %v8310_v6 = vpop.permute.xlu0 %5251  ;;  %v8312_v45 = vpop.permute.xlu1 %5256  ;;  %v2989_v15 = vrot.slane %v2832_v8, 7  ;;  %vm3149_vm2 = vcmask 1044480   ;;  %v2965_v23 = vrot.slane %v2808_v61, 2  ;;  %vm9922_vm11 = vmmov %vm9921_vm1 }
 0x509   :  { %v9533_v34 = vunpack.i.h.bf16 %v8310_v6  ;;  %v5253_v48 = vunpack.i.l.bf16 %v8310_v6  ;;  %v9535_v5 = vunpack.i.h.bf16 %v8312_v45  ;;  %v5258_v54 = vunpack.i.l.bf16 %v8312_v45  ;;  %vm9926_vm0 = vmmov %vm9923_vm14 }
 0x50a   :  { %v3117_v10 = vsel %vm9921_vm1, %v2964_v19, %v2988_v2  ;;  %v2942_v8 = vrot.slane %v2783_v16, 5  ;;  %v2940_v42 = vrot.slane %v2785_v0, 5  ;;  %v3118_v61 = vsel %vm9922_vm11, %v2965_v23, %v2989_v15  ;;  %vm9927_vm1 = vmmov %vm9926_vm0 }
 0x50b   :  { %v2856_v36 = vsel %vm465_vm7, %v9535_v5, %v5258_v54  ;;  %v2759_v18 = vsel %vm365_vm4, %v5253_v48, %v9533_v34  ;;  %v2941_v34 = vrot.slane %v2784_v35, 5  ;;  %v3125_v35 = vsel %vm645_vm5, %v3117_v10, %v3012_v4 }
 0x50c   :  { %v8342_v14 = vpop.permute.xlu0 %5266  ;;  %v8344_v59 = vpop.permute.xlu1 %5261  ;;  %v3036_v60 = vrot.slane %v2856_v36, 1  ;;  %vm9924_vm15 = vcmp.lt.s32.totalorder %v5923_v7, 106 }
 0x50d   :  { %v9536_v27 = vunpack.i.h.bf16 %v8342_v14  ;;  %v9540_v11 = vunpack.i.l.bf16 %v8342_v14  ;;  %v9539_v9 = vunpack.i.h.bf16 %v8344_v59  ;;  %v5263_v3 = vunpack.i.l.bf16 %v8344_v59  ;;  %vm9928_vm11 = vmmov %vm9924_vm15 }
 0x50e   :  { %v3134_v29 = vsel %vm3132_vm12, %v3125_v35, %v3036_v60  ;;  %v9943_v46 = vunpack.i.h.bf16 %v8342_v14 }
 0x50f   :  { %v2880_v2 = vsel %vm490_vm8, %v9536_v27, %v9540_v11  ;;  %v2760_v12 = vsel %vm365_vm4, %v5263_v3, %v5253_v48  ;;  %v2761_v5 = vsel %vm365_vm4, %v9539_v9, %v5263_v3  ;;  %v3103_v27 = vsel %vm3099_vm6, %v2759_v18, %v2942_v8 }
 0x510   :  { %v8364_v16 = vpop.permute.xlu0 %5271  ;;  %v8366_v0 = vpop.permute.xlu1 %5281  ;;  %v3101_v36 = vsel %vm3099_vm6, %v2761_v5, %v2940_v42  ;;  %v3060_v9 = vrot.slane %v2880_v2, 6  ;;  %v3102_v15 = vsel %vm3099_vm6, %v2760_v12, %v2941_v34  ;;  %v3126_v2 = vsel %vm645_vm5, %v3118_v61, %v3013_v30 }
 0x511   :  { %v9546_v17 = vunpack.i.h.bf16 %v8364_v16  ;;  %v5273_v48 = vunpack.i.l.bf16 %v8364_v16  ;;  %v9542_v58 = vunpack.i.h.bf16 %v8366_v0  ;;  %v5283_v3 = vunpack.i.l.bf16 %v8366_v0 }
 0x512   :  { %v3109_v11 = vsel %vm9923_vm14, %v3101_v36, %v2964_v19  ;;  %v3142_v41 = vsel %vm713_vm10, %v3036_v60, %v3060_v9  ;;  %vm9929_vm14 = vmmov %vm9928_vm11 }
 0x513   :  { %v2904_v42 = vsel %vm9924_vm15, %v9546_v17, %v5273_v48  ;;  %v2854_v4 = vsel %vm465_vm7, %v5283_v3, %v9542_v58  ;;  %v2855_v5 = vsel %vm465_vm7, %v5258_v54, %v5283_v3  ;;  %v3159_v18 = vpack.c.bf16 %v3134_v29, %v3109_v11  ;;  %vm9931_vm15 = vmmov %vm9926_vm0 }
 0x514   :  { %v3084_v10 = vrot.slane %v2904_v42, 3  ;;  %v3037_v12 = vrot.slane %v2855_v5, 1  ;;  %v3038_v34 = vrot.slane %v2854_v4, 1  ;;  %v8388_v19 = vpop.permute.xlu0 %5276  ;;  %v8390_v8 = vpop.permute.xlu1 %5291  ;;  %v9925_v29 = vrot.slane %v8282_v62, 2 }
 0x515   :  { %v9543_v36 = vunpack.i.h.bf16 %v8388_v19  ;;  %v5278_v35 = vunpack.i.l.bf16 %v8388_v19  ;;  %v5293_v58 = vunpack.i.l.bf16 %v8390_v8  ;;  %3211 = vmatprep.subr.bf16.mxu0 %v3159_v18  ;;  %v3110_v3 = vsel %vm9927_vm1, %v3102_v15, %v2965_v23 }
 0x516   :  { %v3111_v54 = vsel %vm9926_vm0, %v3103_v27, %v9925_v29  ;;  %v3136_v11 = vsel %vm3132_vm12, %v3127_v49, %v3038_v34  ;;  %v3135_v42 = vsel %vm3132_vm12, %v3126_v2, %v3037_v12  ;;  %v9544_v61 = vunpack.i.h.bf16 %v8390_v8 }
 0x517   :  { %v2928_v30 = vsel %vm540_vm9, %v9543_v36, %v5278_v35  ;;  %v3161_v4 = vpack.c.bf16 %v3136_v11, %v3111_v54  ;;  %v3151_v62 = vsel %vm3149_vm2, %v3142_v41, %v3084_v10  ;;  %v3160_v49 = vpack.c.bf16 %v3135_v42, %v3110_v3 }
 0x518   :  { %v8411_v5 = vpop.permute.xlu0 %5286  ;;  %v8413_v27 = vpop.permute.xlu1 %5296  ;;  %v5539_v23 = vmov 65535   ;;  %v2903_v18 = vsel %vm9928_vm11, %v5273_v48, %v5293_v58  ;;  %v3167_v3 = vpack.c.bf16 %v2928_v30, %v3151_v62  ;;  %v2902_v48 = vsel %vm9929_vm14, %v5293_v58, %v9544_v61 }
 0x519   :  { %v3185_v15 = vsel %vm3149_vm2, 4294967295, %v5539_v23  ;;  %v9545_v2 = vunpack.i.h.bf16 %v8411_v5  ;;  %v5288_v29 = vunpack.i.l.bf16 %v8411_v5  ;;  %3252 = vmatprep.subr.bf16.mxu1 %v3161_v4  ;;  %v9547_v54 = vunpack.i.h.bf16 %v8413_v27 }
 0x51a   :  { %v5298_v11 = vunpack.i.l.bf16 %v8413_v27  ;;  %3253 = vmatpush1.bf16.msra.mxu1 %v3160_v49  ;;  %v9930_v4 = vunpack.i.l.bf16 %v8342_v14  ;;  %v8439_v49 = vsel %vm9931_vm15, %v3185_v15, 0  ;;  %v3085_v30 = vrot.slane %v2903_v18, 3 }
 0x51b   :  { %v2878_v41 = vsel %vm490_vm8, %v5288_v29, %v9545_v2  ;;  %vm9933_vm0 = vcmp.lt.s32.totalorder %v5923_v7, 1  ;;  %vm3181_vm11 = vcmask 220160   ;;  %vm9937_vm14 = vcmask 1040384  }
 0x51c   :  { %v2879_v23 = vsel %vm490_vm8, %v9930_v4, %v5288_v29  ;;  %v3062_v9 = vrot.slane %v2878_v41, 6  ;;  %v8441_v36 = vpop.permute.xlu0 %5301  ;;  %v8443_v42 = vpop.permute.xlu1 %5306  ;;  %v3086_v4 = vrot.slane %v2902_v48, 3  ;;  %v2926_v15 = vsel %vm540_vm9, %v5298_v11, %v9547_v54  ;;  %vm9935_vm1 = vmmov %vm9933_vm0 }
 0x51d   :  { %v3061_v62 = vrot.slane %v2879_v23, 6  ;;  %v9548_v61 = vunpack.i.h.bf16 %v8441_v36  ;;  %v5303_v2 = vunpack.i.l.bf16 %v8441_v36  ;;  %v9549_v17 = vunpack.i.h.bf16 %v8443_v42 }
 0x51e   :  { %v5308_v29 = vunpack.i.l.bf16 %v8443_v42  ;;  %v8456_v41 = vand.u32 %v8439_v49, %v3167_v3  ;;  %v9932_v48 = vunpack.i.h.bf16 %v8270_v43  ;;  %v3144_v54 = vsel %vm713_vm10, %v3038_v34, %v3062_v9 }
 0x51f   :  { %v3143_v18 = vsel %vm713_vm10, %v3037_v12, %v3061_v62  ;;  %v8463_v58 = vsel %vm415_vm3, %v9548_v61, %v5303_v2  ;;  %v2927_v12 = vsel %vm540_vm9, %v5278_v35, %v5298_v11  ;;  %v9934_v62 = vunpack.i.h.bf16 %v8289_v44 }
 0x520   :  { %v3152_v23 = vsel %vm3149_vm2, %v3143_v18, %v3085_v30  ;;  %v2810_v10 = vsel %vm415_vm3, %v5303_v2, %v9932_v48  ;;  %v2827_v30 = vsel %vm9933_vm0, %v9549_v17, %v5308_v29  ;;  %v8480_v43 = vpop.permute.xlu0 %5316  ;;  %v8482_v61 = vpop.permute.xlu1 %5311  ;;  %v3153_v48 = vsel %vm3149_vm2, %v3144_v54, %v3086_v4 }
 0x521   :  { %v2963_v3 = vrot.slane %v2810_v10, 2  ;;  %v2834_v18 = vsel %vm9935_vm1, %v5308_v29, %v9934_v62  ;;  %v3168_v2 = vpack.c.bf16 %v2927_v12, %v3152_v23  ;;  %v9550_v9 = vunpack.i.h.bf16 %v8480_v43  ;;  %vm9947_vm1 = vmmov %vm9937_vm14 }
 0x522   :  { %v2987_v34 = vrot.slane %v2834_v18, 7  ;;  %v5318_v35 = vunpack.i.l.bf16 %v8480_v43  ;;  %v9551_v11 = vunpack.i.h.bf16 %v8482_v61  ;;  %v5313_v44 = vunpack.i.l.bf16 %v8482_v61 }
 0x523   :  { %v2994_v29 = vrot.slane %v2827_v30, 7  ;;  %v9936_v62 = vunpack.i.h.bf16 %v8312_v45  ;;  %v3169_v18 = vpack.c.bf16 %v2926_v15, %v3153_v48  ;;  %vm9938_vm15 = vcmp.lt.s32.totalorder %v5923_v7, 22 }
 0x524   :  { %v8500_v12 = vsel %vm465_vm7, %v9550_v9, %v5318_v35  ;;  %v3116_v17 = vsel %vm9937_vm14, %v2963_v3, %v2987_v34  ;;  %v2779_v45 = vsel %vm9938_vm15, %v9551_v11, %v5313_v44  ;;  %v9939_v54 = vunpack.i.h.bf16 %v8287_v21  ;;  %vm9940_vm0 = vmmov %vm9938_vm15  ;;  %v8512_v30 = vpop.permute.xlu0 %5321 }
 0x525   :  { %v8494_v23 = vsel %vm465_vm7, %v5318_v35, %v9936_v62  ;;  %v8514_v62 = vpop.permute.xlu1 %5326  ;;  %v9552_v34 = vunpack.i.h.bf16 %v8512_v30  ;;  %v5323_v35 = vunpack.i.l.bf16 %v8512_v30  ;;  %v3194_v48 = vand.u32 %v8439_v49, %v3168_v2 }
 0x526   :  { %v2786_v4 = vsel %vm9940_vm0, %v5313_v44, %v9939_v54  ;;  %v5328_v21 = vunpack.i.l.bf16 %v8514_v62  ;;  %v3197_v10 = vand.u32 %v8439_v49, %v3169_v18  ;;  %v2946_v44 = vrot.slane %v2779_v45, 5 }
 0x527   :  { %v2939_v9 = vrot.slane %v2786_v4, 5  ;;  %v2755_v54 = vsel %vm365_vm4, %v9552_v34, %v5323_v35  ;;  %v9941_v15 = vunpack.i.h.bf16 %v8344_v59  ;;  %v9942_v2 = vrot.slane %v8185_v63, 4 }
 0x528   :  { %v8539_v18 = vsel %vm490_vm8, %v5328_v21, %v9943_v46  ;;  %v9944_v45 = vunpack.i.h.bf16 %v8514_v62  ;;  %3254 = vmatprep.subr.bf16.mxu1 %v3197_v10  ;;  %v9945_v63 = vrot.slane %v8494_v23, 1  ;;  %v8553_v46 = vld [vmem:[%s9396_s12] sm:$0x3]  ;;  %vm9948_vm14 = vcmask 1045504   ;;  %s5540_s12 = smov 59  }
 0x529   :  { %v2762_v60 = vsel %vm365_vm4, %v5323_v35, %v9941_v15  ;;  %v3124_v4 = vsel %vm645_vm5, %v3116_v17, %v9942_v2  ;;  %v5337_v15 = vpop.permute.xlu0 %5336  ;;  %v5332_v35 = vpop.permute.xlu1 %5331  ;;  %3255 = vmatpush1.bf16.msra.mxu1 %v3194_v48  ;;  %v3059_v2 = vrot.slane %v8539_v18, 6  ;;  %vm9950_vm15 = vcmp.lt.s32.totalorder %v5923_v7, 1 }
 0x52a   :  { %v3100_v11 = vsel %vm3099_vm6, %v2762_v60, %v2939_v9  ;;  %v8545_v59 = vsel %vm490_vm8, %v9944_v45, %v5328_v21  ;;  %v3133_v17 = vsel %vm3132_vm12, %v3124_v4, %v9945_v63  ;;  %v5339_v60 = vunpack.i.h.bf16 %v5337_v15  ;;  %vm9952_vm0 = vmmov %vm9950_vm15 }
 0x52b   :  { %v5338_v14 = vunpack.i.l.bf16 %v5337_v15  ;;  %v3107_v9 = vsel %vm3099_vm6, %v2755_v54, %v2946_v44  ;;  %v9946_v21 = vrot.slane %v8463_v58, 2  ;;  %v5334_v45 = vunpack.i.h.bf16 %v5332_v35 }
 0x52c   :  { %v5333_v34 = vunpack.i.l.bf16 %v5332_v35  ;;  %v3108_v4 = vsel %vm9948_vm14, %v3100_v11, %v2963_v3  ;;  %v3066_v48 = vrot.slane %v8545_v59, 6  ;;  %v9949_v15 = vunpack.i.h.bf16 %v8443_v42  ;;  %4499 = vmatmul.mubr.msk.bf16.vlgmr.msra.gmra.mrb[40].mxu1 %vm3181_vm11, %v8553_v46 }
 0x52d   :  { %v3123_v10 = vsel %vm9947_vm1, %v9946_v21, %v2994_v29  ;;  %v2830_v44 = vsel %vm9952_vm0, %v9951_v52, %v5339_v60  ;;  %v3158_v54 = vpack.c.bf16 %v3133_v17, %v3108_v4  ;;  %vm9953_vm1 = vmmov %vm9952_vm0  ;;  %v9954_v3 = vunpack.i.h.bf16 %v8441_v36  ;;  %v5347_v39 = vpop.permute.xlu0 %5346  ;;  %v8582_v11 = vpop.permute.xlu1 %5341  ;;  %3366 = vmatprep.mubr.bf16.mxu1 %v9659_v31 }
 0x52e   :  { %v2828_v63 = vsel %vm9950_vm15, %v5338_v14, %v9949_v15  ;;  %v8572_v29 = vsel %vm9953_vm1, %v5339_v60, %v5338_v14  ;;  %v2991_v18 = vrot.slane %v2830_v44, 7  ;;  %v8586_v52 = vsel %vm415_vm3, %v5334_v45, %v5333_v34 }
 0x52f   :  { %v2993_v35 = vrot.slane %v2828_v63, 7  ;;  %v8578_v42 = vsel %vm415_vm3, %v5333_v34, %v9954_v3  ;;  %v9955_v59 = vunpack.i.h.bf16 %v8264_v13  ;;  %v5349_v60 = vunpack.i.h.bf16 %v5347_v39  ;;  %3212 = vmatpush1.bf16.msra.mxu0 %v3158_v54 }
 0x530   :  { %v2969_v36 = vrot.slane %v8578_v42, 2  ;;  %v5348_v21 = vunpack.i.l.bf16 %v5347_v39  ;;  %v9554_v4 = vunpack.i.h.bf16 %v8582_v11  ;;  %v9956_v34 = vrot.slane %v8463_v58, 2  ;;  %3213 = vmatprep.subr.bf16.mxu0 %v8456_v41 }
 0x531   :  { %v8592_v17 = vsel %vm415_vm3, %v9955_v59, %v5334_v45  ;;  %v9957_v63 = vunpack.i.h.bf16 %v8272_v28  ;;  %vm9958_vm3 = vcmp.lt.s32.totalorder %v5923_v7, 22  ;;  %v5343_v54 = vunpack.i.l.bf16 %v8582_v11  ;;  %v5357_v39 = vpop.permute.xlu0 %5356  ;;  %v5352_v59 = vpop.permute.xlu1 %5351 }
 0x532   :  { %v9553_v14 = vrot.slane %v8592_v17, 2  ;;  %v3115_v15 = vsel %vm9948_vm14, %v3107_v9, %v9956_v34  ;;  %vm9959_vm15 = vcmask 1040384   ;;  %v9960_v42 = vunpack.i.h.bf16 %v8482_v61  ;;  %vm9961_vm0 = vmmov %vm9958_vm3 }
 0x533   :  { %v2782_v44 = vsel %vm9958_vm3, %v9957_v63, %v5349_v60  ;;  %v3122_v3 = vsel %vm9959_vm15, %v2969_v36, %v2993_v35  ;;  %vm9962_vm1 = vmmov %vm9961_vm0  ;;  %v9963_v9 = vrot.slane %v8214_v26, 4  ;;  %v9965_v61 = vunpack.i.h.bf16 %v8364_v16 }
 0x534   :  { %v2780_v58 = vsel %vm9961_vm0, %v5348_v21, %v9960_v42  ;;  %v8616_v41 = vsel %vm9962_vm1, %v5349_v60, %v5348_v21  ;;  %vm9964_vm14 = vmmov %vm9959_vm15  ;;  %v2943_v35 = vrot.slane %v2782_v44, 5  ;;  %vm9966_vm3 = vcmp.lt.s32.totalorder %v5923_v7, 106 }
 0x535   :  { %v3131_v28 = vsel %vm645_vm5, %v3123_v10, %v9963_v9  ;;  %v8624_v34 = vsel %vm9964_vm14, %v9553_v14, %v2991_v18  ;;  %v2905_v63 = vsel %vm9966_vm3, %v5343_v54, %v9965_v61  ;;  %vm9967_vm15 = vmmov %vm9966_vm3  ;;  %v2945_v60 = vrot.slane %v2780_v58, 5 }
 0x536   :  { %v2906_v26 = vsel %vm9967_vm15, %v9554_v4, %v5343_v54  ;;  %v9968_v21 = vrot.slane %v8500_v12, 1  ;;  %v5359_v18 = vunpack.i.h.bf16 %v5357_v39  ;;  %v5358_v44 = vunpack.i.l.bf16 %v5357_v39  ;;  %v8642_v54 = vpop.permute.xlu0 %5366  ;;  %v5362_v4 = vpop.permute.xlu1 %5361  ;;  %vm9984_vm0 = vmmov %vm9966_vm3 }
 0x537   :  { %v5354_v14 = vunpack.i.h.bf16 %v5352_v59  ;;  %v5353_v16 = vunpack.i.l.bf16 %v5352_v59  ;;  %v3083_v45 = vrot.slane %v2905_v63, 3  ;;  %v3090_v13 = vrot.slane %v2906_v26, 3  ;;  %vm9989_vm1 = vmmov %vm9964_vm14 }
 0x538   :  { %v3140_v42 = vsel %vm3132_vm12, %v3131_v28, %v9968_v21  ;;  %v9969_v61 = vunpack.i.h.bf16 %v8310_v6  ;;  %v9970_v58 = vrot.slane %v8494_v23, 1  ;;  %v9972_v39 = vunpack.i.h.bf16 %v8480_v43 }
 0x539   :  { %v3165_v9 = vpack.c.bf16 %v3140_v42, %v3115_v15  ;;  %v9971_v15 = vunpack.i.h.bf16 %v8512_v30  ;;  %v9973_v59 = vrot.slane %v8208_v24, 4  ;;  %v9974_v23 = vmov %v9968_v21 }
 0x53a   :  { %v2758_v56 = vsel %vm365_vm4, %v9969_v61, %v5359_v18  ;;  %v3141_v10 = vsel %vm713_vm10, %v9970_v58, %v3059_v2  ;;  %v2851_v6 = vsel %vm465_vm7, %v5353_v16, %v9972_v39  ;;  %v3148_v2 = vsel %vm713_vm10, %v9974_v23, %v3066_v48 }
 0x53b   :  { %3334 = vmatprep.subr.bf16.mxu1 %v3165_v9  ;;  %v2756_v28 = vsel %vm365_vm4, %v5358_v44, %v9971_v15  ;;  %v3130_v63 = vsel %vm645_vm5, %v3122_v3, %v9973_v59  ;;  %v2757_v26 = vsel %vm365_vm4, %v5359_v18, %v5358_v44  ;;  %v2852_v21 = vsel %vm465_vm7, %v5354_v14, %v5353_v16 }
 0x53c   :  { %v3106_v30 = vsel %vm3099_vm6, %v2756_v28, %v2945_v60  ;;  %v9975_v43 = vunpack.i.h.bf16 %v8366_v0  ;;  %v3104_v24 = vsel %vm3099_vm6, %v2758_v56, %v2943_v35  ;;  %v3041_v3 = vrot.slane %v2851_v6, 1  ;;  %v5372_v60 = vpop.permute.xlu1 %5371 }
 0x53d   :  { %v5369_v12 = vunpack.i.h.bf16 %v8642_v54  ;;  %v5368_v48 = vunpack.i.l.bf16 %v8642_v54  ;;  %v3040_v61 = vrot.slane %v2852_v21, 1  ;;  %v5364_v18 = vunpack.i.h.bf16 %v5362_v4  ;;  %v2920_v21 = vpop.permute.xlu0 %2919 }
 0x53e   :  { %v2853_v42 = vsel %vm465_vm7, %v9975_v43, %v5354_v14  ;;  %v5363_v44 = vunpack.i.l.bf16 %v5362_v4  ;;  %v9976_v58 = vunpack.i.h.bf16 %v8388_v19  ;;  %v3150_v16 = vsel %vm3149_vm2, %v3141_v10, %v3083_v45  ;;  %vm9981_vm7 = vmmov %vm9966_vm3 }
 0x53f   :  { %v3039_v9 = vrot.slane %v2853_v42, 1  ;;  %v5374_v14 = vunpack.i.h.bf16 %v5372_v60  ;;  %vm9977_vm4 = vcmask 1045504   ;;  %v9978_v15 = vunpack.i.h.bf16 %v8411_v5 }
 0x540   :  { %v2929_v0 = vsel %vm540_vm9, %v5368_v48, %v9976_v58  ;;  %v3114_v56 = vsel %vm9977_vm4, %v3106_v30, %v2969_v36  ;;  %v9979_v28 = vunpack.i.h.bf16 %v8514_v62  ;;  %v2876_v19 = vsel %vm490_vm8, %v5364_v18, %v5363_v44  ;;  %v2918_v23 = vpop.permute.xlu1 %2917  ;;  %vm9991_vm14 = vmmov %vm9977_vm4 }
 0x541   :  { %v3166_v35 = vpack.c.bf16 %v2929_v0, %v3150_v16  ;;  %v2877_v54 = vsel %vm490_vm8, %v9978_v15, %v5364_v18  ;;  %v2930_v45 = vsel %vm540_vm9, %v5369_v12, %v5368_v48  ;;  %v3064_v39 = vrot.slane %v2876_v19, 6 }
 0x542   :  { %v2875_v4 = vsel %vm490_vm8, %v5363_v44, %v9979_v28  ;;  %v3063_v10 = vrot.slane %v2877_v54, 6  ;;  %v5373_v36 = vunpack.i.l.bf16 %v5372_v60  ;;  %v9980_v5 = vunpack.i.h.bf16 %v8390_v8  ;;  %vm9983_vm8 = vmmov %vm9966_vm3 }
 0x543   :  { %v3065_v6 = vrot.slane %v2875_v4, 6  ;;  %v3139_v62 = vsel %vm3132_vm12, %v3130_v63, %v3041_v3  ;;  %v3188_v30 = vand.u32 %v8439_v49, %v3166_v35  ;;  %v9982_v43 = vunpack.i.h.bf16 %v8582_v11 }
 0x544   :  { %v2901_v59 = vsel %vm9981_vm7, %v9980_v5, %v5374_v14  ;;  %v2900_v48 = vsel %vm9984_vm0, %v5374_v14, %v5373_v36  ;;  %v3157_v8 = vsel %vm3149_vm2, %v3148_v2, %v3090_v13  ;;  %v3164_v58 = vpack.c.bf16 %v3139_v62, %v3114_v56 }
 0x545   :  { %v2899_v42 = vsel %vm9983_vm8, %v5373_v36, %v9982_v43  ;;  %v3087_v18 = vrot.slane %v2901_v59, 3  ;;  %v3088_v44 = vrot.slane %v2900_v48, 3  ;;  %v2924_v63 = vsel %vm540_vm9, %v2918_v23, %v2920_v21  ;;  %3214 = vmatpush1.bf16.msra.mxu0 %v3188_v30 }
 0x546   :  { %v3089_v60 = vrot.slane %v2899_v42, 3  ;;  %v9985_v0 = vunpack.i.h.bf16 %v8413_v27  ;;  %v3145_v16 = vsel %vm713_vm10, %v3039_v9, %v3063_v10  ;;  %v3146_v35 = vsel %vm713_vm10, %v3040_v61, %v3064_v39  ;;  %3335 = vmatpush1.bf16.msra.mxu1 %v3164_v58 }
 0x547   :  { %v3173_v14 = vpack.c.bf16 %v2930_v45, %v3157_v8  ;;  %v3154_v13 = vsel %vm3149_vm2, %v3145_v16, %v3087_v18  ;;  %v3155_v2 = vsel %vm3149_vm2, %v3146_v35, %v3088_v44  ;;  %v9986_v56 = vrot.slane %v8616_v41, 5 }
 0x548   :  { %v2925_v11 = vsel %vm540_vm9, %v9985_v0, %v2918_v23  ;;  %v9987_v54 = vrot.slane %v8572_v29, 7  ;;  %v9988_v27 = vrot.slane %v8586_v52, 2  ;;  %v3147_v4 = vsel %vm713_vm10, %v3041_v3, %v3065_v6  ;;  %4498 = vmatmul.mubr.msk.bf16.vlgmr.msra.gmra.mrb[40].mxu0 %vm3181_vm11, %v8553_v46 }
 0x549   :  { %v3105_v15 = vsel %vm3099_vm6, %v2757_v26, %v9986_v56  ;;  %v3171_v19 = vpack.c.bf16 %v2924_v63, %v3155_v2  ;;  %v3209_v45 = vand.u32 %v8439_v49, %v3173_v14  ;;  %v9992_v41 = vrot.slane %v8211_v57, 4  ;;  %vm9994_vm6 = vmmov %vm9977_vm4  ;;  %3325 = vmatprep.mubr.bf16.mxu0 %v9659_v31 }
 0x54a   :  { %v3121_v28 = vsel %vm9989_vm1, %v9988_v27, %v9987_v54  ;;  %v9990_v10 = vmov %v9988_v27  ;;  %v9993_v26 = vrot.slane %v8592_v17, 2  ;;  %v9995_v3 = vrot.slane %v8205_v40, 4  ;;  %vm10029_vm8 = vmmov %vm9994_vm6 }
 0x54b   :  { %v3113_v39 = vsel %vm9991_vm14, %v3105_v15, %v9990_v10  ;;  %v3129_v29 = vsel %vm645_vm5, %v3121_v28, %v9992_v41  ;;  %v3156_v52 = vsel %vm3149_vm2, %v3147_v4, %v3089_v60  ;;  %v2923_v5 = vsel %vm540_vm9, %v2920_v21, %v5369_v12  ;;  %3336 = vmatprep.subr.bf16.mxu1 %v3209_v45  ;;  %v8754_v12 = vpop.permute.xlu0 %3178  ;;  %vm10030_vm0 = vmmov %vm9994_vm6 }
 0x54c   :  { %v3112_v36 = vsel %vm9994_vm6, %v3104_v24, %v9993_v26  ;;  %v3128_v6 = vsel %vm645_vm5, %v8624_v34, %v9995_v3  ;;  %v3170_v59 = vpack.c.bf16 %v2925_v11, %v3154_v13  ;;  %v3138_v57 = vsel %vm3132_vm12, %v3129_v29, %v3040_v61  ;;  %vm10031_vm1 = vmmov %vm10030_vm0 }
 0x54d   :  { %v3137_v17 = vsel %vm3132_vm12, %v3128_v6, %v3039_v9  ;;  %v3163_v62 = vpack.c.bf16 %v3138_v57, %v3113_v39  ;;  %v3203_v24 = vand.u32 %v8439_v49, %v3171_v19  ;;  %v3172_v40 = vpack.c.bf16 %v2923_v5, %v3156_v52  ;;  %vm10032_vm14 = vmmov %vm10030_vm0 }
 0x54e   :  { %v3162_v23 = vpack.c.bf16 %v3137_v17, %v3112_v36  ;;  %v3200_v30 = vand.u32 %v8439_v49, %v3170_v59  ;;  %vm3432_vm9 = vcmp.lt.s32.totalorder %v5923_v7, 66  ;;  %vm3482_vm12 = vcmp.lt.s32.totalorder %v5923_v7, 3 }
 0x54f   :  { %3293 = vmatprep.subr.bf16.mxu0 %v3163_v62  ;;  %v3206_v34 = vand.u32 %v8439_v49, %v3172_v40  ;;  %vm3407_vm2 = vcmp.lt.s32.totalorder %v5923_v7, 69  ;;  %vm3582_vm3 = vcmp.lt.s32.totalorder %v5923_v7, 59  ;;  %vm3507_vm15 = vcmp.lt.s32.totalorder %v5923_v7, 125 }
 0x550   :  { %3294 = vmatpush1.bf16.msra.mxu0 %v3162_v23  ;;  %vm3557_vm4 = vcmp.lt.s32.totalorder %v5923_v7, 62  ;;  %vm3532_vm7 = vcmp.lt.s32.totalorder %v5923_v7, 65 }
 0x551   :  { %3295 = vmatprep.subr.bf16.mxu0 %v3203_v24  ;;  %3337 = vmatpush1.bf16.msra.mxu1 %v3206_v34 }
 0x554   :  { %3296 = vmatpush1.bf16.msra.mxu0 %v3200_v30  ;;  %4501 = vmatmul.mubr.msk.bf16.vlgmr.msra.gmra.mrb[44].mxu1 %vm3181_vm11, %v8553_v46 }
 0x555   :  { %3850 = vmatprep.mubr.bf16.mxu1 %v9659_v31 }
 0x557   :  { %4500 = vmatmul.mubr.msk.bf16.vlgmr.msra.gmra.mrb[44].mxu0 %vm3181_vm11, %v8553_v46  ;;  %vm3457_vm11 = vcmp.lt.s32.totalorder %v5923_v7, 63 }
 0x558   :  { %3809 = vmatprep.mubr.bf16.mxu0 %v9659_v31 }
 0x5ff   :  { %v3286_v9 = vpop.f32.mrb[40].mxu1 }
 0x600   :  { %v3287_v61 = vadd.f32 %v3286_v9, %v8754_v12  ;;  %v3288_v49 = vpop.f32.mrb[41].mxu1  ;;  %v3744_v9 = vld [vmem:[%s9398_s15] sm:$0xf] }
 0x601   :  { %v3289_v21 = vadd.f32 %v3288_v49, %v8754_v12  ;;  %v3290_v43 = vpop.f32.mrb[42].mxu1  ;;  %v703_v49 = vld [vmem:[%s9400_s5] sm:$0xf] }
 0x602   :  { %v3377_v42 = vmax.f32 %v3287_v61, 0.0  ;;  %v3291_v48 = vpop.f32.mrb[43].mxu1  ;;  %v3992_v61 = vld [vmem:[%s9399_s17 + $0x8] sm:$0xff]  ;;  %v3991_v43 = vld [vmem:[%s9399_s17] sm:$0xff] }
 0x603   :  { %v3378_v18 = vmax.f32 %v3289_v21, 0.0  ;;  %v4211_v21 = vld [vmem:[%s9401_s19 + $0x8] sm:$0xff] }
 0x604   :  { %v8759_v8 = vmul.f32 %v3377_v42, %v9908_v47  ;;  %v4210_v42 = vld [vmem:[%s9401_s19] sm:$0xff] }
 0x605   :  { %v8762_v44 = vmul.f32 %v3378_v18, %v9910_v32 }
 0x607   :  { %v5395_v46 = vpack.i.bf16 %v8762_v44, %v8759_v8 }
 0x609   :  { %5396 = vrot.lane.b32.xlu1 %v5395_v46, %s5540_s12  ;;  %5376 = vrot.lane.b32.xlu0 %v5395_v46, %s5541_s0 }
 0x60d   :  { %5381 = vrot.lane.b32.xlu0 %v5395_v46, %s5542_s21 }
 0x611   :  { %5386 = vrot.lane.b32.xlu0 %v5395_v46, %s5543_s3 }
 0x615   :  { %5391 = vrot.lane.b32.xlu0 %v5395_v46, %s5544_s22 }
 0x61b   :  { %v3245_v60 = vpop.f32.mrb[40].mxu0 }
 0x61c   :  { %v3246_v58 = vadd.f32 %v3245_v60, %v8754_v12  ;;  %v3247_v63 = vpop.f32.mrb[41].mxu0 }
 0x61d   :  { %v3248_v0 = vadd.f32 %v3247_v63, %v8754_v12  ;;  %v3249_v11 = vpop.f32.mrb[42].mxu0 }
 0x61e   :  { %v3375_v16 = vmax.f32 %v3246_v58, 0.0  ;;  %v3250_v35 = vpop.f32.mrb[43].mxu0 }
 0x61f   :  { %v3376_v14 = vmax.f32 %v3248_v0, 0.0 }
 0x620   :  { %v8774_v13 = vmul.f32 %v3375_v16, %v9907_v51 }
 0x621   :  { %v8777_v2 = vmul.f32 %v3376_v14, %v9909_v20 }
 0x622   :  { %3516 = vrot.lane.b32.xlu1 %v8774_v13, %s5545_s24  ;;  %3541 = vrot.lane.b32.xlu0 %v8774_v13, %s5546_s2 }
 0x623   :  { %v5400_v56 = vpack.i.bf16 %v8777_v2, %v8774_v13  ;;  %v5420_v5 = vpack.i.bf16 %v8759_v8, %v8777_v2 }
 0x626   :  { %5401 = vrot.lane.b32.xlu1 %v5400_v56, %s5541_s0  ;;  %5436 = vrot.lane.b32.xlu0 %v5400_v56, %s5540_s12 }
 0x627   :  { %v3368_v15 = vpop.f32.mrb[44].mxu1 }
 0x628   :  { %v3370_v54 = vpop.f32.mrb[45].mxu1  ;;  %v3369_v52 = vadd.f32 %v3368_v15, %v8754_v12 }
 0x629   :  { %v3371_v27 = vadd.f32 %v3370_v54, %v8754_v12  ;;  %v3372_v28 = vpop.f32.mrb[46].mxu1 }
 0x62a   :  { %v3327_v4 = vpop.f32.mrb[44].mxu0  ;;  %v3373_v19 = vpop.f32.mrb[47].mxu1  ;;  %5406 = vrot.lane.b32.xlu1 %v5400_v56, %s5542_s21  ;;  %v3381_v57 = vmax.f32 %v3369_v52, 0.0 }
 0x62b   :  { %v3328_v45 = vadd.f32 %v3327_v4, %v8754_v12  ;;  %v3382_v10 = vmax.f32 %v3371_v27, 0.0  ;;  %v3329_v39 = vpop.f32.mrb[45].mxu0 }
 0x62c   :  { %v3331_v41 = vpop.f32.mrb[46].mxu0  ;;  %v3330_v17 = vadd.f32 %v3329_v39, %v8754_v12  ;;  %v8810_v62 = vmul.f32 %v3381_v57, %v9912_v33  ;;  %v1904_v12 = vld [vmem:[%s9397_s9] sm:$0xf] }
 0x62d   :  { %v3379_v29 = vmax.f32 %v3328_v45, 0.0  ;;  %v8791_v26 = vmul.f32 %v3382_v10, %v9914_v38  ;;  %v3332_v36 = vpop.f32.mrb[47].mxu0 }
 0x62e   :  { %5411 = vrot.lane.b32.xlu1 %v5400_v56, %s5543_s3  ;;  %v3380_v24 = vmax.f32 %v3330_v17, 0.0 }
 0x62f   :  { %v8794_v3 = vmul.f32 %v3379_v29, %v9911_v25  ;;  %v5440_v40 = vpack.i.bf16 %v8791_v26, %v8810_v62 }
 0x630   :  { %v8818_v23 = vmul.f32 %v3380_v24, %v9913_v1 }
 0x631   :  { %v5450_v6 = vpack.i.bf16 %v8794_v3, %v8791_v26  ;;  %v5465_v59 = vpack.i.bf16 %v8794_v3, %v8762_v44 }
 0x632   :  { %5416 = vrot.lane.b32.xlu1 %v5400_v56, %s5544_s22  ;;  %v5490_v34 = vpack.i.bf16 %v8810_v62, %v8818_v23  ;;  %v5480_v30 = vpack.i.bf16 %v8818_v23, %v8774_v13 }
 0x633   :  { %5451 = vrot.lane.b32.xlu0 %v5450_v6, %s5542_s21 }
 0x636   :  { %5421 = vrot.lane.b32.xlu1 %v5420_v5, %s5547_s1 }
 0x637   :  { %5461 = vrot.lane.b32.xlu0 %v5450_v6, %s5544_s22 }
 0x63a   :  { %5426 = vrot.lane.b32.xlu1 %v5420_v5, %s5546_s2 }
 0x63b   :  { %5466 = vrot.lane.b32.xlu0 %v5465_v59, %s5547_s1 }
 0x63e   :  { %5431 = vrot.lane.b32.xlu1 %v5420_v5, %s5545_s24 }
 0x63f   :  { %5471 = vrot.lane.b32.xlu0 %v5465_v59, %s5546_s2 }
 0x642   :  { %5441 = vrot.lane.b32.xlu1 %v5440_v40, %s5547_s1 }
 0x643   :  { %5476 = vrot.lane.b32.xlu0 %v5465_v59, %s5545_s24 }
 0x646   :  { %5446 = vrot.lane.b32.xlu1 %v5450_v6, %s5541_s0 }
 0x647   :  { %3574 = vrot.lane.b32.xlu0 %v8794_v3, %s5540_s12 }
 0x64a   :  { %5456 = vrot.lane.b32.xlu1 %v5450_v6, %s5543_s3 }
 0x64b   :  { %5491 = vrot.lane.b32.xlu0 %v5490_v34, %s5542_s21 }
 0x64e   :  { %5481 = vrot.lane.b32.xlu1 %v5480_v30, %s5547_s1 }
 0x64f   :  { %5501 = vrot.lane.b32.xlu0 %v5490_v34, %s5544_s22 }
 0x652   :  { %3555 = vrot.lane.b32.xlu1 %v8791_v26, %s5546_s2 }
 0x653   :  { %5506 = vrot.lane.b32.xlu0 %v5490_v34, %s5546_s2 }
 0x656   :  { %5486 = vrot.lane.b32.xlu1 %v5490_v34, %s5541_s0 }
 0x657   :  { %5511 = vrot.lane.b32.xlu0 %v5490_v34, %s5545_s24 }
 0x65a   :  { %5496 = vrot.lane.b32.xlu1 %v5490_v34, %s5543_s3 }
 0x65b   :  { %5516 = vrot.lane.b32.xlu0 %v5490_v34, %s5540_s12 }
 0x65e   :  { %3530 = vrot.lane.b32.xlu1 %v8791_v26, %s5545_s24 }
 0x65f   :  { %1907 = vperm.xlu0 %4598, %v1904_v12  }
 0x662   :  { %3580 = vrot.lane.b32.xlu1 %v8791_v26, %s5540_s12 }
 0x663   :  { %3747 = vperm.xlu0 %4598, %v3744_v9  }
 0x666   :  { %706 = vperm.xlu1 %4909, %v703_v49  }
 0x667   :  { %4000 = vperm.xlu0 %4598, %v3992_v61  }
 0x66a   :  { %3995 = vperm.xlu1 %4909, %v3991_v43  }
 0x66b   :  { %4219 = vperm.xlu0 %4598, %v4211_v21  }
 0x66e   :  { %4214 = vperm.xlu1 %4909, %v4210_v42  }
 0x67b   :  { %v8862_v48 = vpop.permute.xlu0 %5376  ;;  %v8884_v28 = vpop.permute.xlu1 %5396 }
 0x67c   :  { %v9562_v46 = vunpack.i.h.bf16 %v8862_v48  ;;  %v5378_v60 = vunpack.i.l.bf16 %v8862_v48  ;;  %v9565_v9 = vunpack.i.h.bf16 %v8884_v28  ;;  %v5398_v42 = vunpack.i.l.bf16 %v8884_v28 }
 0x67e   :  { %v3437_v35 = vsel %vm3432_vm9, %v5378_v60, %v9562_v46 }
 0x67f   :  { %v5382_v18 = vpop.permute.xlu0 %5381  ;;  %v3602_v4 = vrot.slane %v3437_v35, 4 }
 0x680   :  { %v5384_v58 = vunpack.i.h.bf16 %v5382_v18  ;;  %v5383_v63 = vunpack.i.l.bf16 %v5382_v18 }
 0x682   :  { %v3487_v14 = vsel %vm3482_vm12, %v5383_v63, %v5384_v58 }
 0x683   :  { %v8868_v0 = vpop.permute.xlu0 %5386  ;;  %v3626_v19 = vrot.slane %v3487_v14, 4 }
 0x684   :  { %v9557_v11 = vunpack.i.h.bf16 %v8868_v0  ;;  %v5388_v16 = vunpack.i.l.bf16 %v8868_v0 }
 0x686   :  { %v3412_v15 = vsel %vm3407_vm2, %v5388_v16, %v9557_v11 }
 0x687   :  { %v5392_v56 = vpop.permute.xlu0 %5391  ;;  %v3690_v10 = vsel %vm645_vm5, %v3412_v15, %v3602_v4 }
 0x688   :  { %v5394_v54 = vunpack.i.h.bf16 %v5392_v56  ;;  %v5393_v27 = vunpack.i.l.bf16 %v5392_v56 }
 0x68a   :  { %v3462_v45 = vsel %vm3457_vm11, %v5393_v27, %v5394_v54 }
 0x68b   :  { %v3698_v39 = vsel %vm645_vm5, %v3462_v45, %v3626_v19 }
 0x68c   :  { %v3722_v41 = vpack.c.bf16 %v3698_v39, %v3690_v10 }
 0x68e   :  { %3818 = vmatprep.subr.bf16.mxu1 %v3722_v41 }
 0x694   :  { %v8890_v29 = vpop.permute.xlu1 %3516  ;;  %v8894_v6 = vpop.permute.xlu0 %3541 }
 0x698   :  { %v8892_v36 = vpop.permute.xlu1 %5401  ;;  %v8900_v57 = vpop.permute.xlu0 %5436 }
 0x699   :  { %v5404_v5 = vunpack.i.h.bf16 %v8892_v36  ;;  %v9561_v59 = vunpack.i.l.bf16 %v8892_v36  ;;  %v5439_v18 = vunpack.i.h.bf16 %v8900_v57  ;;  %v9558_v41 = vunpack.i.l.bf16 %v8900_v57 }
 0x69b   :  { %v3439_v12 = vsel %vm3432_vm9, %v9561_v59, %v5404_v5  ;;  %v3438_v61 = vsel %vm3432_vm9, %v5404_v5, %v5378_v60 }
 0x69c   :  { %v8896_v52 = vpop.permute.xlu1 %5406  ;;  %v3601_v19 = vrot.slane %v3438_v61, 4 }
 0x69d   :  { %v5409_v17 = vunpack.i.h.bf16 %v8896_v52  ;;  %v5408_v24 = vunpack.i.l.bf16 %v8896_v52 }
 0x69f   :  { %v3488_v49 = vsel %vm3482_vm12, %v5409_v17, %v5383_v63  ;;  %v3489_v21 = vsel %vm3482_vm12, %v5408_v24, %v5409_v17  ;;  %v3600_v63 = vrot.slane %v3439_v12, 4 }
 0x6a0   :  { %v8904_v40 = vpop.permute.xlu1 %5411  ;;  %v3624_v45 = vrot.slane %v3489_v21, 4  ;;  %v3625_v10 = vrot.slane %v3488_v49, 4 }
 0x6a1   :  { %v5414_v34 = vunpack.i.h.bf16 %v8904_v40  ;;  %v9555_v30 = vunpack.i.l.bf16 %v8904_v40 }
 0x6a3   :  { %v3414_v60 = vsel %vm3407_vm2, %v9555_v30, %v5414_v34  ;;  %v3413_v56 = vsel %vm3407_vm2, %v5414_v34, %v5388_v16 }
 0x6a4   :  { %v8931_v14 = vpop.permute.xlu1 %5416  ;;  %v3688_v34 = vsel %vm645_vm5, %v3414_v60, %v3600_v63  ;;  %v3689_v49 = vsel %vm645_vm5, %v3413_v56, %v3601_v19  ;;  %v3587_v60 = vsel %vm3582_vm3, %v5398_v42, %v9565_v9 }
 0x6a5   :  { %v8922_v43 = vpop.permute.xlu0 %5451  ;;  %v5419_v15 = vunpack.i.h.bf16 %v8931_v14  ;;  %v9563_v4 = vunpack.i.l.bf16 %v8931_v14 }
 0x6a6   :  { %v9556_v35 = vunpack.i.h.bf16 %v8922_v43 }
 0x6a7   :  { %v3463_v17 = vsel %vm3457_vm11, %v5419_v15, %v5393_v27  ;;  %v3464_v16 = vsel %vm3457_vm11, %v9563_v4, %v5419_v15 }
 0x6a8   :  { %v3486_v39 = vsel %vm3482_vm12, %v5384_v58, %v9556_v35  ;;  %v8952_v61 = vpop.permute.xlu1 %5421  ;;  %v3696_v58 = vsel %vm645_vm5, %v3464_v16, %v3624_v45  ;;  %v3697_v21 = vsel %vm645_vm5, %v3463_v17, %v3625_v10 }
 0x6a9   :  { %v8942_v5 = vpop.permute.xlu0 %5461  ;;  %v3627_v30 = vrot.slane %v3486_v39, 4  ;;  %v3720_v35 = vpack.c.bf16 %v3696_v58, %v3688_v34  ;;  %v3721_v27 = vpack.c.bf16 %v3697_v21, %v3689_v49  ;;  %v5424_v45 = vunpack.i.h.bf16 %v8952_v61 }
 0x6aa   :  { %v9559_v12 = vunpack.i.h.bf16 %v8942_v5 }
 0x6ab   :  { %3777 = vmatprep.subr.bf16.mxu0 %v3720_v35  ;;  %3819 = vmatpush1.bf16.msra.mxu1 %v3721_v27  ;;  %v8991_v27 = vsel %vm3582_vm3, %v5439_v18, %v5398_v42 }
 0x6ac   :  { %v3461_v15 = vsel %vm3457_vm11, %v5394_v54, %v9559_v12  ;;  %v5427_v10 = vpop.permute.xlu1 %5426  ;;  %v3589_v54 = vsel %vm3582_vm3, %v9558_v41, %v5439_v18 }
 0x6ad   :  { %v8961_v11 = vpop.permute.xlu0 %5466  ;;  %v8968_v63 = vsel %vm645_vm5, %v3461_v15, %v3627_v30  ;;  %v5429_v35 = vunpack.i.h.bf16 %v5427_v10  ;;  %v3737_v30 = vpack.c.bf16 %v3587_v60, %v3587_v60  ;;  %v3735_v17 = vpack.c.bf16 %v3589_v54, %v3589_v54 }
 0x6ae   :  { %v9560_v56 = vunpack.i.h.bf16 %v8961_v11  ;;  %v5468_v19 = vunpack.i.l.bf16 %v8961_v11  ;;  %v9570_v15 = vunpack.i.l.bf16 %v8922_v43  ;;  %v9569_v60 = vunpack.i.l.bf16 %v8952_v61 }
 0x6af   :  { %v3760_v42 = vsel %vm713_vm10, %v3737_v30, 0 }
 0x6b0   :  { %v3511_v16 = vsel %vm3507_vm15, %v5468_v19, %v9560_v56  ;;  %v3512_v34 = vsel %vm3507_vm15, %v5424_v45, %v5468_v19  ;;  %v5432_v21 = vpop.permute.xlu1 %5431  ;;  %v3513_v18 = vsel %vm3507_vm15, %v9569_v60, %v5424_v45 }
 0x6b1   :  { %v8979_v39 = vpop.permute.xlu0 %5471  ;;  %v5434_v41 = vunpack.i.h.bf16 %v5432_v21  ;;  %v3650_v12 = vrot.slane %v3511_v16, 4  ;;  %v3649_v56 = vrot.slane %v3512_v34, 4  ;;  %v3490_v16 = vsel %vm3482_vm12, %v9570_v15, %v5408_v24 }
 0x6b2   :  { %v9564_v58 = vunpack.i.h.bf16 %v8979_v39  ;;  %v5473_v49 = vunpack.i.l.bf16 %v8979_v39  ;;  %v5428_v34 = vunpack.i.l.bf16 %v5427_v10  ;;  %v5433_v38 = vunpack.i.l.bf16 %v5432_v21 }
 0x6b3   :  { %v3706_v24 = vsel %vm645_vm5, %v8762_v44, %v3650_v12  ;;  %v9996_v21 = vunpack.i.h.bf16 %v8884_v28  ;;  %v3623_v44 = vrot.slane %v3490_v16, 4 }
 0x6b4   :  { %v3561_v54 = vsel %vm3557_vm4, %v5473_v49, %v9564_v58  ;;  %v3562_v19 = vsel %vm3557_vm4, %v5429_v35, %v5473_v49  ;;  %v9009_v58 = vpop.permute.xlu1 %5441  ;;  %v9012_v49 = vsel %vm713_vm10, %v3735_v17, 0  ;;  %v3563_v12 = vsel %vm3557_vm4, %v5428_v34, %v5429_v35 }
 0x6b5   :  { %v9002_v59 = vpop.permute.xlu0 %5476  ;;  %v3674_v30 = vrot.slane %v3561_v54, 4  ;;  %v3673_v9 = vrot.slane %v3562_v19, 4  ;;  %v3705_v54 = vsel %vm645_vm5, %v8759_v8, %v3649_v56  ;;  %v5463_v19 = vunpack.i.l.bf16 %v8942_v5 }
 0x6b6   :  { %v9568_v46 = vunpack.i.h.bf16 %v9002_v59  ;;  %v5478_v4 = vunpack.i.l.bf16 %v9002_v59  ;;  %v9997_v56 = vunpack.i.l.bf16 %v8931_v14  ;;  %v3538_v35 = vsel %vm3532_vm7, %v5433_v38, %v5434_v41 }
 0x6b8   :  { %v3536_v17 = vsel %vm3532_vm7, %v5478_v4, %v9568_v46  ;;  %v3537_v52 = vsel %vm3532_vm7, %v5434_v41, %v5478_v4  ;;  %v9044_v15 = vpop.permute.xlu1 %5446  ;;  %v3465_v28 = vsel %vm3457_vm11, %v5463_v19, %v9997_v56  ;;  %v9999_v41 = vunpack.i.l.bf16 %v8892_v36 }
 0x6b9   :  { %v9030_v1 = vpop.permute.xlu0 %3574  ;;  %v3714_v10 = vsel %vm645_vm5, %v3536_v17, %v3674_v30  ;;  %v3713_v45 = vsel %vm645_vm5, %v3537_v52, %v3673_v9  ;;  %v5449_v8 = vunpack.i.h.bf16 %v9044_v15  ;;  %v5448_v9 = vunpack.i.l.bf16 %v9044_v15 }
 0x6ba   :  { %v3586_v4 = vsel %vm3582_vm3, %v9996_v21, %v9030_v1  ;;  %v3730_v46 = vpack.c.bf16 %v3714_v10, %v3706_v24  ;;  %v3729_v60 = vpack.c.bf16 %v3713_v45, %v3705_v54  ;;  %v3648_v30 = vrot.slane %v3513_v18, 4 }
 0x6bb   :  { %v3564_v17 = vsel %vm3557_vm4, %v8894_v6, %v5428_v34  ;;  %v3738_v16 = vpack.c.bf16 %v3586_v4, %v3586_v4  ;;  %v5444_v52 = vunpack.i.h.bf16 %v9009_v58  ;;  %v5443_v24 = vunpack.i.l.bf16 %v9009_v58 }
 0x6bc   :  { %3820 = vmatprep.subr.bf16.mxu1 %v3730_v46  ;;  %v9998_v10 = vunpack.i.h.bf16 %v8862_v48  ;;  %v3672_v54 = vrot.slane %v3563_v12, 4  ;;  %v3539_v46 = vsel %vm3532_vm7, %v8890_v29, %v5433_v38  ;;  %v3440_v58 = vsel %vm3432_vm9, %v5448_v9, %v9999_v41 }
 0x6bd   :  { %v5492_v14 = vpop.permute.xlu0 %5491  ;;  %3821 = vmatpush1.bf16.msra.mxu1 %v3729_v60  ;;  %v9079_v60 = vpop.permute.xlu1 %5456  ;;  %v3671_v48 = vrot.slane %v3564_v17, 4  ;;  %v3695_v4 = vsel %vm645_vm5, %v3465_v28, %v3623_v44  ;;  %v3704_v36 = vsel %vm645_vm5, %v8777_v2, %v3648_v30  ;;  %v10000_v17 = vunpack.i.h.bf16 %v8868_v0  ;;  %v9100_v2 = vld [vmem:[%s9402_s14] sm:$0x3] }
 0x6be   :  { %v3436_v18 = vsel %vm3432_vm9, %v9998_v10, %v5449_v8  ;;  %v5493_v34 = vunpack.i.l.bf16 %v5492_v14  ;;  %4504 = vmatprep.subr.msk.bf16.mxu1 %vm713_vm10, %v3738_v16  ;;  %v9571_v45 = vunpack.i.h.bf16 %v9079_v60  ;;  %v5458_v21 = vunpack.i.l.bf16 %v9079_v60 }
 0x6bf   :  { %v5494_v38 = vunpack.i.h.bf16 %v5492_v14  ;;  %v3603_v12 = vrot.slane %v3436_v18, 4  ;;  %v3712_v56 = vsel %vm645_vm5, %v3538_v35, %v3672_v54  ;;  %v9089_v10 = vsel %vm3507_vm15, %v5443_v24, %v5444_v52 }
 0x6c0   :  { %v3599_v16 = vrot.slane %v3440_v58, 4  ;;  %v3411_v44 = vsel %vm3407_vm2, %v10000_v17, %v9571_v45  ;;  %v3711_v28 = vsel %vm645_vm5, %v3539_v46, %v3671_v48  ;;  %v10001_v30 = vunpack.i.h.bf16 %v8922_v43 }
 0x6c1   :  { %v5502_v41 = vpop.permute.xlu0 %5501  ;;  %3823 = vmatpush1.bf16.msra.mxu1 %v3760_v42  ;;  %v10002_v14 = vunpack.i.l.bf16 %v8904_v40  ;;  %v5482_v18 = vpop.permute.xlu1 %5481  ;;  %v9114_v54 = vsel %vm645_vm5, %v3411_v44, %v3603_v12  ;;  %v3484_v45 = vsel %vm3482_vm12, %v5493_v34, %v5494_v38  ;;  %v10009_v15 = vunpack.i.h.bf16 %v9002_v59 }
 0x6c2   :  { %v3485_v35 = vsel %vm3482_vm12, %v10001_v30, %v5493_v34  ;;  %v5504_v42 = vunpack.i.h.bf16 %v5502_v41  ;;  %v5484_v58 = vunpack.i.h.bf16 %v5482_v18  ;;  %v5483_v17 = vunpack.i.l.bf16 %v5482_v18 }
 0x6c3   :  { %v3415_v0 = vsel %vm3407_vm2, %v5458_v21, %v10002_v14  ;;  %v10003_v30 = vunpack.i.l.bf16 %v8922_v43  ;;  %v5503_v14 = vunpack.i.l.bf16 %v5502_v41  ;;  %v10005_v43 = vunpack.i.l.bf16 %v8952_v61 }
 0x6c4   :  { %v3687_v46 = vsel %vm645_vm5, %v3415_v0, %v3599_v16  ;;  %4505 = vmatmul.mubr.msk.bf16.vlgmr.msra.gmra.mrb[48].mxu1 %vm709_vm13, %v9100_v2  ;;  %v10004_v16 = vunpack.i.h.bf16 %v8961_v11  ;;  %v3728_v34 = vpack.c.bf16 %v3712_v56, %v3704_v36  ;;  %v3629_v48 = vrot.slane %v3484_v45, 4 }
 0x6c5   :  { %v3483_v40 = vsel %vm3482_vm12, %v5494_v38, %v10003_v30  ;;  %v3719_v12 = vpack.c.bf16 %v3695_v4, %v3687_v46  ;;  %v5507_v18 = vpop.permute.xlu0 %5506  ;;  %v3514_v30 = vsel %vm3507_vm15, %v5483_v17, %v10005_v43  ;;  %3932 = vmatprep.mubr.bf16.mxu1 %v9659_v31  ;;  %v3628_v38 = vrot.slane %v3485_v35, 4  ;;  %v3556_v44 = vpop.permute.xlu1 %3555 }
 0x6c6   :  { %v9132_v0 = vsel %vm3507_vm15, %v10004_v16, %v5484_v58  ;;  %v5509_v41 = vunpack.i.h.bf16 %v5507_v18  ;;  %v5508_v4 = vunpack.i.l.bf16 %v5507_v18  ;;  %v3647_v46 = vrot.slane %v3514_v30, 4 }
 0x6c7   :  { %3778 = vmatpush1.bf16.msra.mxu0 %v3719_v12  ;;  %v3630_v11 = vrot.slane %v3483_v40, 4  ;;  %v3458_v16 = vsel %vm3457_vm11, %v5504_v42, %v5463_v19  ;;  %v3509_v61 = vsel %vm3507_vm15, %v5484_v58, %v5443_v24  ;;  %v3459_v36 = vsel %vm3457_vm11, %v5503_v14, %v5504_v42 }
 0x6c8   :  { %3779 = vmatprep.subr.bf16.mxu0 %v3728_v34  ;;  %v10006_v56 = vunpack.i.h.bf16 %v8942_v5  ;;  %v3515_v45 = vsel %vm3507_vm15, %v5444_v52, %v5483_v17  ;;  %v3651_v40 = vrot.slane %v9132_v0, 4  ;;  %v3559_v19 = vsel %vm3557_vm4, %v5508_v4, %v5509_v41 }
 0x6c9   :  { %v10007_v12 = vunpack.i.h.bf16 %v8979_v39  ;;  %v5512_v42 = vpop.permute.xlu0 %5511  ;;  %v3565_v5 = vsel %vm3557_vm4, %v3556_v44, %v8894_v6  ;;  %v3703_v58 = vsel %vm645_vm5, %v8774_v13, %v3647_v46  ;;  %v3652_v52 = vrot.slane %v3509_v61, 4  ;;  %v5487_v18 = vpop.permute.xlu1 %5486 }
 0x6ca   :  { %v3460_v35 = vsel %vm3457_vm11, %v10006_v56, %v5503_v14  ;;  %v5514_v17 = vunpack.i.h.bf16 %v5512_v42  ;;  %v5513_v14 = vunpack.i.l.bf16 %v5512_v42  ;;  %v3727_v0 = vpack.c.bf16 %v3711_v28, %v3703_v58 }
 0x6cb   :  { %v9160_v24 = vsel %vm3557_vm4, %v10007_v12, %v5508_v4  ;;  %v3654_v43 = vrot.slane %v3515_v45, 4  ;;  %v3558_v39 = vsel %vm3557_vm4, %v5509_v41, %v3556_v44  ;;  %v5489_v30 = vunpack.i.h.bf16 %v5487_v18 }
 0x6cc   :  { %v5488_v34 = vunpack.i.l.bf16 %v5487_v18  ;;  %v3675_v4 = vrot.slane %v9160_v24, 4  ;;  %v3676_v56 = vrot.slane %v3559_v19, 4  ;;  %v3678_v12 = vrot.slane %v3565_v5, 4  ;;  %3780 = vmatpush1.bf16.msra.mxu0 %v3727_v0 }
 0x6cd   :  { %v3700_v6 = vsel %vm645_vm5, %v3460_v35, %v3628_v38  ;;  %v3534_v13 = vsel %vm3532_vm7, %v5513_v14, %v5514_v17  ;;  %v3433_v28 = vsel %vm3432_vm9, %v5489_v30, %v5448_v9  ;;  %v10008_v46 = vpack.c.bf16 %v8991_v27, %v8991_v27  ;;  %v5517_v61 = vpop.permute.xlu0 %5516  ;;  %v5497_v35 = vpop.permute.xlu1 %5496 }
 0x6ce   :  { %v3434_v44 = vsel %vm3432_vm9, %v5488_v34, %v5489_v30  ;;  %v3435_v41 = vsel %vm3432_vm9, %v5449_v8, %v5488_v34  ;;  %v3677_v38 = vrot.slane %v3558_v39, 4  ;;  %v3702_v45 = vsel %vm645_vm5, %v3458_v16, %v3630_v11  ;;  %vm10034_vm9 = vmmov %vm10030_vm0 }
 0x6cf   :  { %4502 = vmatprep.subr.msk.bf16.mxu0 %vm713_vm10, %v10008_v46  ;;  %v3701_v9 = vsel %vm645_vm5, %v3459_v36, %v3629_v48  ;;  %v3708_v19 = vsel %vm645_vm5, %v8818_v23, %v3652_v52  ;;  %v3535_v8 = vsel %vm3532_vm7, %v10009_v15, %v5513_v14  ;;  %v5499_v24 = vunpack.i.h.bf16 %v5497_v35 }
 0x6d0   :  { %v5498_v42 = vunpack.i.l.bf16 %v5497_v35  ;;  %v3710_v27 = vsel %vm645_vm5, %v8791_v26, %v3654_v43  ;;  %v3604_v5 = vrot.slane %v3435_v41, 4  ;;  %v3605_v58 = vrot.slane %v3434_v44, 4  ;;  %3782 = vmatpush1.bf16.msra.mxu0 %v9012_v49 }
 0x6d1   :  { %v3606_v18 = vrot.slane %v3433_v28, 4  ;;  %v3716_v48 = vsel %vm645_vm5, %v3534_v13, %v3676_v56  ;;  %v5519_v11 = vunpack.i.h.bf16 %v5517_v61  ;;  %v3408_v23 = vsel %vm3407_vm2, %v5499_v24, %v5458_v21  ;;  %v3531_v52 = vpop.permute.xlu1 %3530 }
 0x6d2   :  { %v3409_v59 = vsel %vm3407_vm2, %v5498_v42, %v5499_v24  ;;  %v10010_v16 = vunpack.i.h.bf16 %v9079_v60  ;;  %v5518_v36 = vunpack.i.l.bf16 %v5517_v61  ;;  %v3533_v43 = vsel %vm3532_vm7, %v5514_v17, %v3531_v52  ;;  %v10014_v24 = vld [vmem:[#allocation22_spill] sm:$0xff] }
 0x6d3   :  { %v3694_v14 = vsel %vm645_vm5, %v3408_v23, %v3606_v18  ;;  %v3693_v0 = vsel %vm645_vm5, %v3409_v59, %v3605_v58  ;;  %v3540_v21 = vsel %vm3532_vm7, %v3531_v52, %v8890_v29  ;;  %4503 = vmatmul.mubr.msk.bf16.vlgmr.msra.gmra.mrb[48].mxu0 %vm709_vm13, %v9100_v2  ;;  %v3732_v56 = vpack.c.bf16 %v3716_v48, %v3708_v19  ;;  %v10016_v58 = vld [vmem:[#allocation44_spill] sm:$0xff] }
 0x6d4   :  { %v3410_v26 = vsel %vm3407_vm2, %v10010_v16, %v5498_v42  ;;  %v3726_v39 = vpack.c.bf16 %v3702_v45, %v3694_v14  ;;  %v3718_v30 = vsel %vm645_vm5, %v3540_v21, %v3678_v12  ;;  %v3725_v34 = vpack.c.bf16 %v3701_v9, %v3693_v0  ;;  %3891 = vmatprep.mubr.bf16.mxu0 %v9659_v31  ;;  %v10019_v21 = vld [vmem:[#allocation30_spill] sm:$0xff] }
 0x6d5   :  { %v3692_v49 = vsel %vm645_vm5, %v3410_v26, %v3604_v5  ;;  %v3707_v13 = vsel %vm645_vm5, %v8794_v3, %v3651_v40  ;;  %v3717_v17 = vsel %vm645_vm5, %v3533_v43, %v3677_v38  ;;  %v3734_v28 = vpack.c.bf16 %v3718_v30, %v3710_v27  ;;  %v3581_v44 = vpop.permute.xlu1 %3580  ;;  %v10015_v27 = vld [vmem:[#allocation35_spill] sm:$0xff] }
 0x6d6   :  { %v3724_v60 = vpack.c.bf16 %v3700_v6, %v3692_v49  ;;  %3900 = vmatprep.subr.bf16.mxu1 %v3726_v39  ;;  %v3715_v29 = vsel %vm645_vm5, %v3535_v8, %v3675_v4  ;;  %v3584_v6 = vsel %vm3582_vm3, %v5518_v36, %v5519_v11  ;;  %v10011_v12 = vpack.c.bf16 %v8968_v63, %v9114_v54  ;;  %v10018_v26 = vld [vmem:[#allocation19_spill] sm:$0xff]  ;;  %v10020_v39 = vld [vmem:[#allocation16_spill] sm:$0xff] }
 0x6d7   :  { %3901 = vmatpush1.bf16.msra.mxu1 %v3725_v34  ;;  %v3585_v3 = vsel %vm3582_vm3, %v9030_v1, %v5518_v36  ;;  %v10012_v40 = vrot.slane %v9089_v10, 4  ;;  %v3583_v4 = vsel %vm3582_vm3, %v5519_v11, %v3581_v44  ;;  %v10013_v46 = vunpack.i.l.bf16 %v8900_v57  ;;  %v10017_v11 = vld [vmem:[#allocation10_spill] sm:$0xff] }
 0x6d8   :  { %3859 = vmatprep.subr.bf16.mxu0 %v3724_v60  ;;  %3902 = vmatprep.subr.bf16.mxu1 %v3734_v28  ;;  %v3731_v61 = vpack.c.bf16 %v3715_v29, %v3707_v13  ;;  %v3740_v35 = vpack.c.bf16 %v3584_v6, %v3584_v6  ;;  %v3741_v1 = vpack.c.bf16 %v3583_v4, %v3583_v4  ;;  %v10021_v34 = vld [vmem:[#allocation34_spill] sm:$0xff]  ;;  %v10022_v13 = vld [vmem:[#allocation15_spill] sm:$0xff]  ;;  %v10024_v6 = vld [vmem:[#allocation29_spill] sm:$0xff]  ;;  %vm10041_vm12 = vcmask 130048  }
 0x6d9   :  { %3860 = vmatpush1.bf16.msra.mxu0 %v10011_v12  ;;  %v3709_v41 = vsel %vm645_vm5, %v8810_v62, %v10012_v40  ;;  %v3590_v38 = vsel %vm3582_vm3, %v3581_v44, %v10013_v46  ;;  %v3739_v45 = vpack.c.bf16 %v3585_v3, %v3585_v3  ;;  %v10023_v28 = vld [vmem:[#allocation42_spill] sm:$0xff]  ;;  %v10025_v12 = vld [vmem:[#allocation40_spill] sm:$0xff]  ;;  %v10026_v40 = vld [vmem:[#allocation39_spill] sm:$0xff] }
 0x6da   :  { %3861 = vmatprep.subr.bf16.mxu0 %v3732_v56  ;;  %v3733_v63 = vpack.c.bf16 %v3717_v17, %v3709_v41  ;;  %v3742_v54 = vpack.c.bf16 %v3590_v38, %v3590_v38  ;;  %v3772_v57 = vsel %vm713_vm10, %v3741_v1, 0  ;;  %vm10042_vm2 = vmmov %vm10041_vm12 }
 0x6db   :  { %v3766_v62 = vsel %vm713_vm10, %v3739_v45, 0  ;;  %vm10045_vm11 = vmmov %vm10042_vm2 }
 0x6dc   :  { %3903 = vmatpush1.bf16.msra.mxu1 %v3733_v63  ;;  %vm10046_vm3 = vmmov %vm10042_vm2 }
 0x6dd   :  { %3862 = vmatpush1.bf16.msra.mxu0 %v3731_v61  ;;  %4508 = vmatprep.subr.msk.bf16.mxu1 %vm713_vm10, %v3742_v54 }
 0x6de   :  { %4506 = vmatprep.subr.msk.bf16.mxu0 %vm713_vm10, %v3740_v35  ;;  %v1908_v7 = vpop.permute.xlu0 %1907  ;;  %vm10027_vm10 = vmmov %vm9994_vm6 }
 0x6df   :  { %v2013_v10 = vadd.f32 %v8172_v53, %v1908_v7  ;;  %v2015_v9 = vadd.f32 %v8174_v50, %v1908_v7  ;;  %v1972_v19 = vadd.f32 %v8168_v37, %v1908_v7  ;;  %v1974_v15 = vadd.f32 %v8170_v22, %v1908_v7 }
 0x6e0   :  { %3905 = vmatpush1.bf16.msra.mxu1 %v3772_v57  ;;  %v2054_v8 = vadd.f32 %v8176_v55, %v1908_v7  ;;  %v2095_v42 = vadd.f32 %v10014_v24, %v1908_v7  ;;  %v2056_v5 = vadd.f32 %v10015_v27, %v1908_v7  ;;  %v2097_v22 = vadd.f32 %v10016_v58, %v1908_v7 }
 0x6e1   :  { %3864 = vmatpush1.bf16.msra.mxu0 %v3766_v62  ;;  %v2103_v53 = vmul.f32 %v2013_v10, %v9908_v47  ;;  %v2104_v50 = vmul.f32 %v2015_v9, %v9910_v32  ;;  %v2101_v37 = vmul.f32 %v1972_v19, %v9907_v51  ;;  %v2102_v55 = vmul.f32 %v1974_v15, %v9909_v20 }
 0x6e2   :  { %v2105_v18 = vmul.f32 %v2054_v8, %v9911_v25  ;;  %v2107_v48 = vmul.f32 %v2095_v42, %v9912_v33  ;;  %v2106_v23 = vmul.f32 %v2056_v5, %v10017_v11  ;;  %v2108_v36 = vmul.f32 %v2097_v22, %v10018_v26  ;;  %v3748_v24 = vpop.permute.xlu0 %3747 }
 0x6e3   :  { %4509 = vmatmul.mubr.msk.bf16.vlgmr.msra.gmra.mrb[52].mxu1 %vm709_vm13, %v9100_v2  ;;  %v3960_v59 = vrot.slane %v2104_v50, 4  ;;  %v3957_v16 = vrot.slane %v2101_v37, 4  ;;  %v3958_v49 = vrot.slane %v2102_v55, 4 }
 0x6e4   :  { %4507 = vmatmul.mubr.msk.bf16.vlgmr.msra.gmra.mrb[52].mxu0 %vm709_vm13, %v9100_v2  ;;  %4111 = vmatprep.mubr.bf16.mxu1 %v9659_v31  ;;  %v3959_v2 = vrot.slane %v2103_v53, 4  ;;  %v3961_v14 = vrot.slane %v2105_v18, 4  ;;  %v3963_v0 = vrot.slane %v2107_v48, 4  ;;  %v3962_v43 = vrot.slane %v2106_v23, 4  ;;  %vm10028_vm13 = vmmov %vm9994_vm6  ;;  %v5520_v23 = vld [vmem:[%s9403_s16] sm:$0xff]  }
 0x6e5   :  { %4068 = vmatprep.mubr.bf16.mxu0 %v9659_v31  ;;  %v707_v52 = vpop.permute.xlu1 %706  ;;  %v3964_v1 = vrot.slane %v2108_v36, 4  ;;  %vm10033_vm6 = vmmov %vm10030_vm0 }
 0x6e6   :  { %v814_v60 = vadd.f32 %v10019_v21, %v707_v52  ;;  %v816_v30 = vadd.f32 %v10020_v39, %v707_v52  ;;  %v773_v56 = vadd.f32 %v10021_v34, %v707_v52  ;;  %v775_v17 = vadd.f32 %v10022_v13, %v707_v52 }
 0x6e7   :  { %v855_v29 = vadd.f32 %v10023_v28, %v707_v52  ;;  %v896_v44 = vadd.f32 %v10024_v6, %v707_v52  ;;  %v857_v3 = vadd.f32 %v10025_v12, %v707_v52  ;;  %v898_v41 = vadd.f32 %v10026_v40, %v707_v52 }
 0x6e8   :  { %v904_v4 = vmul.f32 %v814_v60, %v9908_v47  ;;  %v905_v46 = vmul.f32 %v816_v30, %v9910_v32  ;;  %v902_v38 = vmul.f32 %v773_v56, %v9907_v51  ;;  %v903_v63 = vmul.f32 %v775_v17, %v9909_v20 }
 0x6e9   :  { %v906_v54 = vmul.f32 %v855_v29, %v9911_v25  ;;  %v908_v61 = vmul.f32 %v896_v44, %v9912_v33  ;;  %v907_v35 = vmul.f32 %v857_v3, %v10017_v11  ;;  %v909_v15 = vmul.f32 %v898_v41, %v10018_v26 }
 0x6ea   :  { %v3975_v45 = vsel %vm645_vm5, %v904_v4, %v3959_v2  ;;  %v3976_v62 = vsel %vm645_vm5, %v905_v46, %v3960_v59  ;;  %v3973_v57 = vsel %vm645_vm5, %v902_v38, %v3957_v16  ;;  %v3974_v7 = vsel %vm645_vm5, %v903_v63, %v3958_v49 }
 0x6eb   :  { %v3977_v10 = vsel %vm645_vm5, %v906_v54, %v3961_v14  ;;  %v3979_v9 = vsel %vm645_vm5, %v908_v61, %v3963_v0  ;;  %v3978_v19 = vsel %vm645_vm5, %v907_v35, %v3962_v43  ;;  %v3980_v8 = vsel %vm645_vm5, %v909_v15, %v3964_v1  ;;  %v10039_v54 = vld [vmem:[#allocation6_spill] sm:$0xff]  ;;  %v10040_v61 = vld [vmem:[#allocation7_spill] sm:$0xff]  ;;  %v10043_v1 = vld [vmem:[#allocation8_spill] sm:$0xff] }
 0x6ec   :  { %vm4008_vm5 = vcmask 97280   ;;  %v5521_v35 = vld [vmem:[%s9404_s18] sm:$0xff]  }
 0x797   :  { %v3852_v42 = vpop.f32.mrb[48].mxu1 }
 0x798   :  { %v3853_v27 = vadd.f32 %v3852_v42, %v3748_v24  ;;  %v3854_v5 = vpop.f32.mrb[49].mxu1 }
 0x799   :  { %v3855_v53 = vadd.f32 %v3854_v5, %v3748_v24  ;;  %v3856_v50 = vpop.f32.mrb[50].mxu1 }
 0x79a   :  { %v3943_v37 = vmul.f32 %v3853_v27, %v9908_v47  ;;  %v3857_v58 = vpop.f32.mrb[51].mxu1 }
 0x79b   :  { %v3944_v22 = vmul.f32 %v3855_v53, %v9910_v32 }
 0x79c   :  { %v3983_v55 = vpack.c.bf16 %v3943_v37, %v3975_v45  ;;  %v10044_v45 = vld [vmem:[#allocation9_spill] sm:$0xff] }
 0x79d   :  { %v3984_v18 = vpack.c.bf16 %v3944_v22, %v3976_v62  ;;  %v3996_v62 = vpop.permute.xlu1 %3995 }
 0x79e   :  { %v4019_v48 = vsel %vm10027_vm10, %v3983_v55, 0 }
 0x79f   :  { %4513 = vmatprep.subr.msk.bf16.mxu1 %vm10028_vm13, %v3984_v18 }
 0x7a0   :  { %4080 = vmatpush1.bf16.msra.mxu1 %v4019_v48 }
 0x7a3   :  { %4514 = vmatmul.mubr.msk.bf16.vlgmr.msra.gmra.mrb[56].mxu1 %vm4008_vm5, %v5520_v23 }
 0x7a4   :  { %4197 = vmatprep.mubr.bf16.mxu1 %v9659_v31 }
 0x7a6   :  { %v3811_v47 = vpop.f32.mrb[48].mxu0 }
 0x7a7   :  { %v3812_v2 = vadd.f32 %v3811_v47, %v3748_v24  ;;  %v3813_v59 = vpop.f32.mrb[49].mxu0 }
 0x7a8   :  { %v3814_v32 = vadd.f32 %v3813_v59, %v3748_v24  ;;  %v3815_v16 = vpop.f32.mrb[50].mxu0 }
 0x7a9   :  { %v3941_v36 = vmul.f32 %v3812_v2, %v9907_v51  ;;  %v3816_v52 = vpop.f32.mrb[51].mxu0 }
 0x7aa   :  { %v3942_v49 = vmul.f32 %v3814_v32, %v9909_v20 }
 0x7ab   :  { %v3981_v14 = vpack.c.bf16 %v3941_v36, %v3973_v57  ;;  %v4001_v57 = vpop.permute.xlu0 %4000 }
 0x7ac   :  { %v3982_v0 = vpack.c.bf16 %v3942_v49, %v3974_v7  ;;  %v4215_v7 = vpop.permute.xlu1 %4214 }
 0x7ad   :  { %v4013_v43 = vsel %vm10029_vm8, %v3981_v14, 0 }
 0x7ae   :  { %4511 = vmatprep.subr.msk.bf16.mxu0 %vm10030_vm0, %v3982_v0 }
 0x7af   :  { %4037 = vmatpush1.bf16.msra.mxu0 %v4013_v43 }
 0x7b2   :  { %4512 = vmatmul.mubr.msk.bf16.vlgmr.msra.gmra.mrb[56].mxu0 %vm4008_vm5, %v5520_v23 }
 0x7b3   :  { %4154 = vmatprep.mubr.bf16.mxu0 %v9659_v31 }
 0x7b6   :  { %v3934_v60 = vpop.f32.mrb[52].mxu1 }
 0x7b7   :  { %v3893_v21 = vpop.f32.mrb[52].mxu0  ;;  %v3935_v30 = vadd.f32 %v3934_v60, %v3748_v24  ;;  %v3936_v51 = vpop.f32.mrb[53].mxu1 }
 0x7b8   :  { %v3894_v39 = vadd.f32 %v3893_v21, %v3748_v24  ;;  %v3895_v34 = vpop.f32.mrb[53].mxu0  ;;  %v3937_v13 = vadd.f32 %v3936_v51, %v3748_v24  ;;  %v3938_v17 = vpop.f32.mrb[54].mxu1 }
 0x7b9   :  { %v3896_v56 = vadd.f32 %v3895_v34, %v3748_v24  ;;  %v3897_v20 = vpop.f32.mrb[54].mxu0  ;;  %v3947_v29 = vmul.f32 %v3935_v30, %v9912_v33  ;;  %v3939_v44 = vpop.f32.mrb[55].mxu1  ;;  %v10036_v33 = vld [vmem:[#allocation4_spill] sm:$0xff] }
 0x7ba   :  { %v3945_v28 = vmul.f32 %v3894_v39, %v9911_v25  ;;  %v3898_v6 = vpop.f32.mrb[55].mxu0  ;;  %v3948_v3 = vmul.f32 %v3937_v13, %v10018_v26  ;;  %v10035_v25 = vld [vmem:[#allocation2_spill] sm:$0xff]  ;;  %v10038_v26 = vld [vmem:[#allocation5_spill] sm:$0xff] }
 0x7bb   :  { %v3946_v12 = vmul.f32 %v3896_v56, %v10017_v11  ;;  %v3987_v41 = vpack.c.bf16 %v3947_v29, %v3979_v9  ;;  %v10037_v11 = vld [vmem:[#allocation3_spill] sm:$0xff]  ;;  %v4524_v9 = vadd.f32 %v4215_v7, %v3996_v62 }
 0x7bc   :  { %v3985_v40 = vpack.c.bf16 %v3945_v28, %v3977_v10  ;;  %v3988_v46 = vpack.c.bf16 %v3948_v3, %v3980_v8  ;;  %v4220_v10 = vpop.permute.xlu0 %4219 }
 0x7bd   :  { %v3986_v4 = vpack.c.bf16 %v3946_v12, %v3978_v19  ;;  %v4031_v63 = vsel %vm10032_vm14, %v3987_v41, 0  ;;  %v4528_v8 = vadd.f32 %v4220_v10, %v4001_v57 }
 0x7be   :  { %v4025_v38 = vsel %vm10031_vm1, %v3985_v40, 0  ;;  %4517 = vmatprep.subr.msk.bf16.mxu1 %vm10034_vm9, %v3988_v46 }
 0x7bf   :  { %4515 = vmatprep.subr.msk.bf16.mxu0 %vm10033_vm6, %v3986_v4  ;;  %4166 = vmatpush1.bf16.msra.mxu1 %v4031_v63 }
 0x7c0   :  { %4123 = vmatpush1.bf16.msra.mxu0 %v4025_v38  ;;  %4273 = vmatprep.subr.bf16.mxu1 %v10036_v33 }
 0x7c1   :  { %4230 = vmatprep.subr.bf16.mxu0 %v10035_v25 }
 0x7c2   :  { %4518 = vmatmul.mubr.msk.bf16.vlgmr.msra.gmra.mrb[60].mxu1 %vm4008_vm5, %v5520_v23 }
 0x7c3   :  { %4516 = vmatmul.mubr.msk.bf16.vlgmr.msra.gmra.mrb[60].mxu0 %vm4008_vm5, %v5520_v23  ;;  %4274 = vmatpush1.bf16.msra.mxu1 %v10038_v26 }
 0x7c4   :  { %4231 = vmatpush1.bf16.msra.mxu0 %v10037_v11  ;;  %4262 = vmatprep.mubr.bf16.mxu0 %v9659_v31 }
 0x7c5   :  { %4305 = vmatprep.mubr.bf16.mxu1 %v9659_v31  ;;  %4316 = vmatprep.subr.bf16.mxu0 %v10039_v54 }
 0x7c6   :  { %4359 = vmatprep.subr.bf16.mxu1 %v10040_v61 }
 0x7ca   :  { %4521 = vmatmul.mubr.msk.bf16.vlgmr.msra.gmra.mrb[56].mxu1 %vm10042_vm2, %v5521_v35 }
 0x7cb   :  { %4520 = vmatmul.mubr.msk.bf16.vlgmr.msra.gmra.mrb[56].mxu0 %vm10041_vm12, %v5521_v35  ;;  %4360 = vmatpush1.bf16.msra.mxu1 %v10044_v45 }
 0x7cc   :  { %4317 = vmatpush1.bf16.msra.mxu0 %v10043_v1  ;;  %4348 = vmatprep.mubr.bf16.mxu0 %v9659_v31 }
 0x7cd   :  { %4391 = vmatprep.mubr.bf16.mxu1 %v9659_v31 }
 0x7d2   :  { %4523 = vmatmul.mubr.msk.bf16.vlgmr.msra.gmra.mrb[60].mxu1 %vm10046_vm3, %v5521_v35 }
 0x7d3   :  { %4522 = vmatmul.mubr.msk.bf16.vlgmr.msra.gmra.mrb[60].mxu0 %vm10045_vm11, %v5521_v35 }
 0x89d   :  { %v4307_v15 = vpop.f32.mrb[56].mxu1 }
 0x89e   :  { %v4264_v19 = vpop.f32.mrb[56].mxu0  ;;  %v4533_v42 = vadd.f32 %v4524_v9, %v4307_v15  ;;  %v4309_v5 = vpop.f32.mrb[57].mxu1 }
 0x89f   :  { %v4525_v24 = vadd.f32 %v4524_v9, %v4264_v19  ;;  %v4266_v27 = vpop.f32.mrb[57].mxu0  ;;  %v4535_v50 = vadd.f32 %v4524_v9, %v4309_v5  ;;  %v4311_v31 = vpop.f32.mrb[58].mxu1 }
 0x8a0   :  { %v4527_v53 = vadd.f32 %v4524_v9, %v4266_v27  ;;  %v4268_v37 = vpop.f32.mrb[58].mxu0  ;;  %v4420_v22 = vmax.f32 %v4533_v42, 0.0  ;;  %v4537_v18 = vadd.f32 %v4528_v8, %v4311_v31  ;;  %v4313_v23 = vpop.f32.mrb[59].mxu1 }
 0x8a1   :  { %v4418_v58 = vmax.f32 %v4525_v24, 0.0  ;;  %v4529_v55 = vadd.f32 %v4528_v8, %v4268_v37  ;;  %v4270_v48 = vpop.f32.mrb[59].mxu0  ;;  %v4421_v2 = vmax.f32 %v4535_v50, 0.0  ;;  %v4539_v32 = vadd.f32 %v4528_v8, %v4313_v23 }
 0x8a2   :  { %v4419_v47 = vmax.f32 %v4527_v53, 0.0  ;;  %v4531_v59 = vadd.f32 %v4528_v8, %v4270_v48  ;;  %4436 = vst [vmem:[%s9405_s20 + $0x10] sm:$0xff] %v4420_v22  ;;  %v4428_v36 = vmax.f32 %v4537_v18, 0.0 }
 0x8a3   :  { %4434 = vst [vmem:[%s9405_s20] sm:$0xff] %v4418_v58  ;;  %v4426_v16 = vmax.f32 %v4529_v55, 0.0  ;;  %4437 = vst [vmem:[%s9405_s20 + $0x18] sm:$0xff] %v4421_v2  ;;  %v4429_v49 = vmax.f32 %v4539_v32, 0.0 }
 0x8a4   :  { %4435 = vst [vmem:[%s9405_s20 + $0x8] sm:$0xff] %v4419_v47  ;;  %v4427_v52 = vmax.f32 %v4531_v59, 0.0  ;;  %4444 = vst [vmem:[%s9405_s20 + $0x50] sm:$0xff] %v4428_v36 }
 0x8a5   :  { %4442 = vst [vmem:[%s9405_s20 + $0x40] sm:$0xff] %v4426_v16  ;;  %4445 = vst [vmem:[%s9405_s20 + $0x58] sm:$0xff] %v4429_v49  ;;  %v4393_v0 = vpop.f32.mrb[60].mxu1 }
 0x8a6   :  { %4443 = vst [vmem:[%s9405_s20 + $0x48] sm:$0xff] %v4427_v52  ;;  %v4350_v14 = vpop.f32.mrb[60].mxu0  ;;  %v4549_v21 = vadd.f32 %v4524_v9, %v4393_v0  ;;  %v4395_v39 = vpop.f32.mrb[61].mxu1 }
 0x8a7   :  { %v4541_v43 = vadd.f32 %v4524_v9, %v4350_v14  ;;  %v4352_v60 = vpop.f32.mrb[61].mxu0  ;;  %v4551_v34 = vadd.f32 %v4524_v9, %v4395_v39  ;;  %v4397_v56 = vpop.f32.mrb[62].mxu1 }
 0x8a8   :  { %v4543_v30 = vadd.f32 %v4524_v9, %v4352_v60  ;;  %v4354_v51 = vpop.f32.mrb[62].mxu0  ;;  %v4424_v20 = vmax.f32 %v4549_v21, 0.0  ;;  %v4553_v28 = vadd.f32 %v4528_v8, %v4397_v56  ;;  %v4399_v6 = vpop.f32.mrb[63].mxu1 }
 0x8a9   :  { %v4422_v13 = vmax.f32 %v4541_v43, 0.0  ;;  %v4545_v17 = vadd.f32 %v4528_v8, %v4354_v51  ;;  %v4356_v29 = vpop.f32.mrb[63].mxu0  ;;  %v4425_v12 = vmax.f32 %v4551_v34, 0.0  ;;  %v4555_v40 = vadd.f32 %v4528_v8, %v4399_v6 }
 0x8aa   :  { %v4423_v44 = vmax.f32 %v4543_v30, 0.0  ;;  %v4547_v3 = vadd.f32 %v4528_v8, %v4356_v29  ;;  %4440 = vst [vmem:[%s9405_s20 + $0x30] sm:$0xff] %v4424_v20  ;;  %v4432_v4 = vmax.f32 %v4553_v28, 0.0 }
 0x8ab   :  { %4438 = vst [vmem:[%s9405_s20 + $0x20] sm:$0xff] %v4422_v13  ;;  %v4430_v41 = vmax.f32 %v4545_v17, 0.0  ;;  %4441 = vst [vmem:[%s9405_s20 + $0x38] sm:$0xff] %v4425_v12  ;;  %v4433_v38 = vmax.f32 %v4555_v40, 0.0 }
 0x8ac   :  { %4439 = vst [vmem:[%s9405_s20 + $0x28] sm:$0xff] %v4423_v44  ;;  %v4431_v46 = vmax.f32 %v4547_v3, 0.0  ;;  %4448 = vst [vmem:[%s9405_s20 + $0x70] sm:$0xff] %v4432_v4 }
 0x8ad   :  { %4446 = vst [vmem:[%s9405_s20 + $0x60] sm:$0xff] %v4430_v41  ;;  %4449 = vst [vmem:[%s9405_s20 + $0x78] sm:$0xff] %v4433_v38 }
 0x8ae   :  { %4447 = vst [vmem:[%s9405_s20 + $0x68] sm:$0xff] %v4431_v46 }

// kernel: basic_rfb_general.10
= control target key start
LH: loop header
LB: loop body
LE: loop exit
PB: predicated region body
PF: predicated region fallthrough
CT: control target
= control target key end

     0   :  { %v184_v1 = vmov 0   ;;  %vm46_vm0 = vcmask 130048   ;;  %v185_v7 = vmov 1983009808   ;;  %v149_v9 = vlaneseq  ;;  %s227_s1 = inlined_call_operand.vmem [shape: bf16[16,512], index: 1, kind: input, shape index: {}]   ;;  %s228_s2 = inlined_call_operand.vmem [shape: f32[4,1], index: 2, kind: input, shape index: {}]   ;;  %s229_s0 = inlined_call_operand.vmem [shape: bf16[4,16], index: 0, kind: input, shape index: {}]   ;;  %s230_s3 = inlined_call_operand.vmem [shape: bf16[4,512], index: 3, kind: output, shape index: {}]  }
   0x1   :  { %v178_v0 = vld [vmem:[%s227_s1 + $0x4] ss:$16 sps:$4 sm:$0xff]   ;;  %82 = vmatprep.mubr.bf16.mxu0 %v184_v1  ;;  %123 = vmatprep.mubr.bf16.mxu1 %v184_v1  ;;  %v180_v2 = vld [vmem:[%s227_s1 + $0xc] ss:$16 sps:$4 sm:$0xff]   ;;  %v182_v3 = vld [vmem:[%s227_s1] ss:$16 sps:$4 sm:$0xff]   ;;  %v147_v8 = vunpack.c.l.s4 %v185_v7 }
   0x2   :  { %177 = vset.pattern.permute.xlu0 %v184_v1  ;;  %50 = vmatprep.subr.bf16.mxu0 %v178_v0  ;;  %v183_v4 = vld [vmem:[%s227_s1 + $0x8] ss:$16 sps:$4 sm:$0xff]   ;;  %v20_v5 = vld [vmem:[%s228_s2] sm:$0xf]  ;;  %v150_v14 = vshrl.u32 %v149_v9, 7 }
   0x3   :  { %91 = vmatprep.subr.bf16.mxu1 %v180_v2  ;;  %51 = vmatpush1.bf16.msra.mxu0 %v182_v3  ;;  %v15_v6 = vld [vmem:[%s229_s0] sm:$0x3]  ;;  %v148_v13 = vunpack.c.0.s8 %v147_v8 }
   0x4   :  { %92 = vmatpush1.bf16.msra.mxu1 %v183_v4  ;;  %23 = vperm.xlu0 %177, %v20_v5  }
   0x5   :  { %v151_v28 = vsub.s32 %v148_v13, %v150_v14 }
   0x6   :  { %171 = vmatmul.mubr.msk.bf16.vlgmr.msra.gmra.mrb[0].mxu0 %vm46_vm0, %v15_v6 }
   0x7   :  { %172 = vmatmul.mubr.msk.bf16.vlgmr.msra.gmra.mrb[0].mxu1 %vm46_vm0, %v15_v6 }
  0x83   :  { %v24_v10 = vpop.permute.xlu0 %23 }
  0xd9   :  { %v84_v11 = vpop.f32.mrb[0].mxu0 }
  0xda   :  { %v125_v12 = vpop.f32.mrb[0].mxu1  ;;  %v85_v15 = vadd.f32 %v84_v11, %v24_v10  ;;  %v86_v17 = vpop.f32.mrb[1].mxu0 }
  0xdb   :  { %v126_v16 = vadd.f32 %v125_v12, %v24_v10  ;;  %v127_v18 = vpop.f32.mrb[1].mxu1  ;;  %v87_v19 = vadd.f32 %v86_v17, %v24_v10  ;;  %v88_v21 = vpop.f32.mrb[2].mxu0 }
  0xdc   :  { %v128_v20 = vadd.f32 %v127_v18, %v24_v10  ;;  %v129_v22 = vpop.f32.mrb[2].mxu1  ;;  %v132_v23 = vmax.f32 %v85_v15, 0.0  ;;  %v89_v25 = vpop.f32.mrb[3].mxu0 }
  0xdd   :  { %v134_v24 = vmax.f32 %v126_v16, 0.0  ;;  %v130_v26 = vpop.f32.mrb[3].mxu1  ;;  %v133_v27 = vmax.f32 %v87_v19, 0.0 }
  0xde   :  { %v135_v29 = vmax.f32 %v128_v20, 0.0 }
  0xdf   :  { %v173_v30 = vpack.c.bf16 %v133_v27, %v132_v23 }
  0xe0   :  { %v174_v31 = vpack.c.bf16 %v135_v29, %v134_v24 }
  0xe1   :  { %v152_v32 = vrot.slane %v173_v30, %v151_v28 }
  0xe2   :  { %v159_v33 = vrot.slane %v174_v31, %v151_v28 }
  0xe4   :  { %v160_v34 = vcombine.low %v152_v32, %v159_v33 }
  0xe6   :  { %162 = vst [vmem:[%s230_s3] sm:$0xff] %v160_v34 }

// kernel: basic_rfb_general.12
= control target key start
LH: loop header
LB: loop body
LE: loop exit
PB: predicated region body
PF: predicated region fallthrough
CT: control target
= control target key end

     0   :  { %v219_v1 = vmov 0   ;;  %vm62_vm0 = vcmask 1040384   ;;  %vm58_vm1 = vcmask 146432   ;;  %v220_v15 = vmov 1983009808   ;;  %s272_s1 = inlined_call_operand.vmem [shape: bf16[18,512], index: 1, kind: input, shape index: {}]   ;;  %s273_s2 = inlined_call_operand.vmem [shape: f32[4,1], index: 2, kind: input, shape index: {}]   ;;  %s274_s0 = inlined_call_operand.vmem [shape: bf16[4,18], index: 0, kind: input, shape index: {}]   ;;  %s275_s3 = inlined_call_operand.vmem [shape: bf16[4,512], index: 3, kind: output, shape index: {}]  }
   0x1   :  { %v209_v0 = vld [vmem:[%s272_s1 + $0x4] ss:$16 sps:$4 sm:$0xff]   ;;  %107 = vmatprep.mubr.bf16.mxu0 %v219_v1  ;;  %148 = vmatprep.mubr.bf16.mxu1 %v219_v1  ;;  %v211_v2 = vld [vmem:[%s272_s1 + $0xc] ss:$16 sps:$4 sm:$0xff]   ;;  %v213_v3 = vld [vmem:[%s272_s1] ss:$16 sps:$4 sm:$0xff]   ;;  %v172_v16 = vunpack.c.l.s4 %v220_v15  ;;  %v174_v17 = vlaneseq }
   0x2   :  { %208 = vset.pattern.permute.xlu0 %v219_v1  ;;  %75 = vmatprep.subr.bf16.mxu0 %v209_v0  ;;  %v214_v4 = vld [vmem:[%s272_s1 + $0x8] ss:$16 sps:$4 sm:$0xff]   ;;  %v20_v5 = vld [vmem:[%s272_s1 + $0x20] sm:$0x11] }
   0x3   :  { %116 = vmatprep.subr.bf16.mxu1 %v211_v2  ;;  %v197_v6 = vcombine.high %v20_v5, %v20_v5  ;;  %v21_v7 = vld [vmem:[%s272_s1 + $0x28] sm:$0x11]  ;;  %v196_v8 = vcombine.low %v20_v5, %v20_v5  ;;  %v22_v9 = vld [vmem:[%s273_s2] sm:$0xf]  ;;  %76 = vmatpush1.bf16.msra.mxu0 %v213_v3  ;;  %v173_v21 = vunpack.c.0.s8 %v172_v16  ;;  %v175_v22 = vshrl.u32 %v174_v17, 7 }
   0x4   :  { %117 = vmatpush1.bf16.msra.mxu1 %v214_v4  ;;  %v199_v10 = vcombine.high %v21_v7, %v21_v7  ;;  %v198_v11 = vcombine.low %v21_v7, %v21_v7  ;;  %25 = vperm.xlu0 %208, %v22_v9   ;;  %v15_v14 = vld [vmem:[%s274_s0] sm:$0x3] }
   0x5   :  { %200 = vmatprep.subr.msk.bf16.mxu0 %vm62_vm0, %v197_v6  ;;  %v64_v12 = vsel %vm62_vm0, %v196_v8, 0  ;;  %v176_v36 = vsub.s32 %v173_v21, %v175_v22 }
   0x6   :  { %202 = vmatprep.subr.msk.bf16.mxu1 %vm62_vm0, %v199_v10  ;;  %v70_v13 = vsel %vm62_vm0, %v198_v11, 0 }
   0x7   :  { %78 = vmatpush1.bf16.msra.mxu0 %v64_v12 }
   0x8   :  { %119 = vmatpush1.bf16.msra.mxu1 %v70_v13 }
   0xa   :  { %201 = vmatmul.mubr.msk.bf16.vlgmr.msra.gmra.mrb[0].mxu0 %vm58_vm1, %v15_v14 }
   0xb   :  { %203 = vmatmul.mubr.msk.bf16.vlgmr.msra.gmra.mrb[0].mxu1 %vm58_vm1, %v15_v14 }
  0x83   :  { %v26_v18 = vpop.permute.xlu0 %25 }
  0xdd   :  { %v109_v19 = vpop.f32.mrb[0].mxu0 }
  0xde   :  { %v150_v20 = vpop.f32.mrb[0].mxu1  ;;  %v110_v23 = vadd.f32 %v109_v19, %v26_v18  ;;  %v111_v25 = vpop.f32.mrb[1].mxu0 }
  0xdf   :  { %v151_v24 = vadd.f32 %v150_v20, %v26_v18  ;;  %v152_v26 = vpop.f32.mrb[1].mxu1  ;;  %v112_v27 = vadd.f32 %v111_v25, %v26_v18  ;;  %v113_v29 = vpop.f32.mrb[2].mxu0 }
  0xe0   :  { %v153_v28 = vadd.f32 %v152_v26, %v26_v18  ;;  %v154_v30 = vpop.f32.mrb[2].mxu1  ;;  %v157_v31 = vmax.f32 %v110_v23, 0.0  ;;  %v114_v33 = vpop.f32.mrb[3].mxu0 }
  0xe1   :  { %v159_v32 = vmax.f32 %v151_v24, 0.0  ;;  %v155_v34 = vpop.f32.mrb[3].mxu1  ;;  %v158_v35 = vmax.f32 %v112_v27, 0.0 }
  0xe2   :  { %v160_v37 = vmax.f32 %v153_v28, 0.0 }
  0xe3   :  { %v204_v38 = vpack.c.bf16 %v158_v35, %v157_v31 }
  0xe4   :  { %v205_v39 = vpack.c.bf16 %v160_v37, %v159_v32 }
  0xe5   :  { %v177_v40 = vrot.slane %v204_v38, %v176_v36 }
  0xe6   :  { %v184_v41 = vrot.slane %v205_v39, %v176_v36 }
  0xe8   :  { %v185_v42 = vcombine.low %v177_v40, %v184_v41 }
  0xea   :  { %187 = vst [vmem:[%s275_s3] sm:$0xff] %v185_v42 }

// kernel: basic_rfb_general.14
= control target key start
LH: loop header
LB: loop body
LE: loop exit
PB: predicated region body
PF: predicated region fallthrough
CT: control target
= control target key end

     0   :  { %v236_v1 = vmov 0   ;;  %vm62_vm0 = vcmask 1040384   ;;  %vm58_vm1 = vcmask 146432   ;;  %vm187_vm2 = vcmask 1041408   ;;  %s310_s1 = inlined_call_operand.vmem [shape: bf16[18,512], index: 1, kind: input, shape index: {}]   ;;  %s311_s2 = inlined_call_operand.vmem [shape: f32[3,1], index: 2, kind: input, shape index: {}]   ;;  %s312_s0 = inlined_call_operand.vmem [shape: bf16[3,18], index: 0, kind: input, shape index: {}]   ;;  %s313_s3 = inlined_call_operand.vmem [shape: bf16[3,512], index: 3, kind: output, shape index: {}]  }
   0x1   :  { %v226_v0 = vld [vmem:[%s310_s1 + $0x4] ss:$16 sps:$4 sm:$0xff]   ;;  %107 = vmatprep.mubr.bf16.mxu0 %v236_v1  ;;  %148 = vmatprep.mubr.bf16.mxu1 %v236_v1  ;;  %v228_v2 = vld [vmem:[%s310_s1 + $0xc] ss:$16 sps:$4 sm:$0xff]   ;;  %v230_v3 = vld [vmem:[%s310_s1] ss:$16 sps:$4 sm:$0xff]   ;;  %v174_v17 = vlaneseq }
   0x2   :  { %225 = vset.pattern.permute.xlu0 %v236_v1  ;;  %75 = vmatprep.subr.bf16.mxu0 %v226_v0  ;;  %v231_v4 = vld [vmem:[%s310_s1 + $0x8] ss:$16 sps:$4 sm:$0xff]   ;;  %v20_v5 = vld [vmem:[%s310_s1 + $0x20] sm:$0x11]  ;;  %vm188_vm3 = vsmask.f32 1280 }
   0x3   :  { %116 = vmatprep.subr.bf16.mxu1 %v228_v2  ;;  %v214_v6 = vcombine.high %v20_v5, %v20_v5  ;;  %v21_v7 = vld [vmem:[%s310_s1 + $0x28] sm:$0x11]  ;;  %v213_v8 = vcombine.low %v20_v5, %v20_v5  ;;  %v22_v9 = vld [vmem:[%s311_s2] sm:$0x7]  ;;  %76 = vmatpush1.bf16.msra.mxu0 %v230_v3  ;;  %vm190_vm4 = vcmask 1043458   ;;  %vm286_vm6 = vmand %vm187_vm2, %vm188_vm3  ;;  %vm194_vm8 = vcmask 1045508  }
   0x4   :  { %117 = vmatpush1.bf16.msra.mxu1 %v231_v4  ;;  %v216_v10 = vcombine.high %v21_v7, %v21_v7  ;;  %v215_v11 = vcombine.low %v21_v7, %v21_v7  ;;  %25 = vperm.xlu0 %225, %v22_v9   ;;  %v15_v14 = vld [vmem:[%s312_s0] sm:$0x3]  ;;  %vm191_vm5 = vsmask.f32 3328  ;;  %v237_v15 = vmov 1983009808  }
   0x5   :  { %217 = vmatprep.subr.msk.bf16.mxu0 %vm62_vm0, %v214_v6  ;;  %v64_v12 = vsel %vm62_vm0, %v213_v8, 0  ;;  %v172_v16 = vunpack.c.l.s4 %v237_v15  ;;  %vm290_vm7 = vmand %vm190_vm4, %vm191_vm5  ;;  %vm195_vm9 = vsmask.f32 5376  ;;  %v175_v24 = vshrl.u32 %v174_v17, 7  ;;  %v202_v44 = vld [vmem:[%s313_s3] sm:$0xff] }
   0x6   :  { %219 = vmatprep.subr.msk.bf16.mxu1 %vm62_vm0, %v216_v10  ;;  %v70_v13 = vsel %vm62_vm0, %v215_v11, 0  ;;  %vm193_vm10 = vmor %vm290_vm7, %vm286_vm6  ;;  %vm198_vm12 = vcmask 1047558   ;;  %vm199_vm13 = vsmask.f32 7424 }
   0x7   :  { %78 = vmatpush1.bf16.msra.mxu0 %v64_v12  ;;  %v173_v23 = vunpack.c.0.s8 %v172_v16  ;;  %vm196_vm11 = vmand %vm194_vm8, %vm195_vm9 }
   0x8   :  { %119 = vmatpush1.bf16.msra.mxu1 %v70_v13  ;;  %vm197_vm14 = vmor %vm196_vm11, %vm193_vm10 }
   0x9   :  { %v176_v38 = vsub.s32 %v173_v23, %v175_v24  ;;  %vm200_vm15 = vmand %vm198_vm12, %vm199_vm13 }
   0xa   :  { %218 = vmatmul.mubr.msk.bf16.vlgmr.msra.gmra.mrb[0].mxu0 %vm58_vm1, %v15_v14  ;;  %vm201_vm0 = vmor %vm200_vm15, %vm197_vm14 }
   0xb   :  { %220 = vmatmul.mubr.msk.bf16.vlgmr.msra.gmra.mrb[0].mxu1 %vm58_vm1, %v15_v14 }
  0x83   :  { %v26_v19 = vpop.permute.xlu0 %25 }
  0xdd   :  { %v109_v21 = vpop.f32.mrb[0].mxu0 }
  0xde   :  { %v150_v22 = vpop.f32.mrb[0].mxu1  ;;  %v110_v25 = vadd.f32 %v109_v21, %v26_v19  ;;  %v111_v27 = vpop.f32.mrb[1].mxu0 }
  0xdf   :  { %v151_v26 = vadd.f32 %v150_v22, %v26_v19  ;;  %v152_v28 = vpop.f32.mrb[1].mxu1  ;;  %v112_v29 = vadd.f32 %v111_v27, %v26_v19  ;;  %v113_v31 = vpop.f32.mrb[2].mxu0 }
  0xe0   :  { %v153_v30 = vadd.f32 %v152_v28, %v26_v19  ;;  %v154_v32 = vpop.f32.mrb[2].mxu1  ;;  %v157_v33 = vmax.f32 %v110_v25, 0.0  ;;  %v114_v35 = vpop.f32.mrb[3].mxu0 }
  0xe1   :  { %v159_v34 = vmax.f32 %v151_v26, 0.0  ;;  %v155_v36 = vpop.f32.mrb[3].mxu1  ;;  %v158_v37 = vmax.f32 %v112_v29, 0.0 }
  0xe2   :  { %v160_v39 = vmax.f32 %v153_v30, 0.0 }
  0xe3   :  { %v221_v40 = vpack.c.bf16 %v158_v37, %v157_v33 }
  0xe4   :  { %v222_v41 = vpack.c.bf16 %v160_v39, %v159_v34 }
  0xe5   :  { %v177_v42 = vrot.slane %v221_v40, %v176_v38 }
  0xe6   :  { %v184_v43 = vrot.slane %v222_v41, %v176_v38 }
  0xe8   :  { %v185_v45 = vcombine.low %v177_v42, %v184_v43 }
  0xea   :  { %v203_v46 = vsel %vm201_vm0, %v185_v45, %v202_v44 }
  0xeb   :  { %204 = vst [vmem:[%s313_s3] sm:$0xff] %v203_v46 }

// kernel: basic_rfb_general.15
= control target key start
LH: loop header
LB: loop body
LE: loop exit
PB: predicated region body
PF: predicated region fallthrough
CT: control target
= control target key end

     0   :  { %vm70_vm0 = vcmask 1044480   ;;  %vm71_vm1 = vcmask 1045504   ;;  %v231_v1 = vmov 65535   ;;  %v232_v3 = vmov 0   ;;  %s287_s1 = inlined_call_operand.vmem [shape: bf16[27,512], index: 1, kind: input, shape index: {}]   ;;  %s288_s2 = inlined_call_operand.vmem [shape: f32[4,1], index: 2, kind: input, shape index: {}]   ;;  %s289_s0 = inlined_call_operand.vmem [shape: bf16[4,27], index: 0, kind: input, shape index: {}]   ;;  %s290_s3 = inlined_call_operand.vmem [shape: bf16[4,512], index: 3, kind: output, shape index: {}]  }
   0x1   :  { %v219_v0 = vld [vmem:[%s287_s1 + $0x4] ss:$16 sps:$4 sm:$0xff]   ;;  %v72_v2 = vsel %vm70_vm0, 4294967295, %v231_v1  ;;  %118 = vmatprep.mubr.bf16.mxu0 %v232_v3  ;;  %159 = vmatprep.mubr.bf16.mxu1 %v232_v3  ;;  %v221_v4 = vld [vmem:[%s287_s1 + $0xc] ss:$16 sps:$4 sm:$0xff]   ;;  %vm66_vm2 = vcmask 220160   ;;  %v185_v20 = vlaneseq }
   0x2   :  { %218 = vset.pattern.permute.xlu0 %v232_v3  ;;  %86 = vmatprep.subr.bf16.mxu0 %v219_v0  ;;  %v223_v5 = vld [vmem:[%s287_s1] ss:$16 sps:$4 sm:$0xff]   ;;  %v224_v6 = vld [vmem:[%s287_s1 + $0x8] ss:$16 sps:$4 sm:$0xff]   ;;  %v73_v7 = vsel %vm71_vm1, %v72_v2, 0 }
   0x3   :  { %127 = vmatprep.subr.bf16.mxu1 %v221_v4  ;;  %v225_v8 = vld [vmem:[%s287_s1 + $0x24] ss:$16 sps:$4 sm:$0x3f]   ;;  %87 = vmatpush1.bf16.msra.mxu0 %v223_v5  ;;  %v227_v9 = vld [vmem:[%s287_s1 + $0x2c] ss:$16 sps:$4 sm:$0x3f]  }
   0x4   :  { %128 = vmatpush1.bf16.msra.mxu1 %v224_v6  ;;  %v78_v10 = vand.u32 %v225_v8, %v73_v7  ;;  %v229_v11 = vld [vmem:[%s287_s1 + $0x20] ss:$16 sps:$4 sm:$0x3f]   ;;  %v230_v12 = vld [vmem:[%s287_s1 + $0x28] ss:$16 sps:$4 sm:$0x3f]   ;;  %v84_v13 = vand.u32 %v227_v9, %v73_v7 }
   0x5   :  { %v24_v14 = vld [vmem:[%s288_s2] sm:$0xf]  ;;  %v75_v15 = vand.u32 %v229_v11, %v73_v7  ;;  %v81_v16 = vand.u32 %v230_v12, %v73_v7  ;;  %v233_v18 = vmov 1983009808   ;;  %v186_v25 = vshrl.u32 %v185_v20, 7 }
   0x6   :  { %88 = vmatprep.subr.bf16.mxu0 %v78_v10  ;;  %27 = vperm.xlu0 %218, %v24_v14   ;;  %v15_v17 = vld [vmem:[%s289_s0] sm:$0x3]  ;;  %v183_v19 = vunpack.c.l.s4 %v233_v18 }
   0x7   :  { %129 = vmatprep.subr.bf16.mxu1 %v84_v13  ;;  %89 = vmatpush1.bf16.msra.mxu0 %v75_v15 }
   0x8   :  { %130 = vmatpush1.bf16.msra.mxu1 %v81_v16  ;;  %v184_v24 = vunpack.c.0.s8 %v183_v19 }
   0xa   :  { %211 = vmatmul.mubr.msk.bf16.vlgmr.msra.gmra.mrb[0].mxu0 %vm66_vm2, %v15_v17  ;;  %v187_v39 = vsub.s32 %v184_v24, %v186_v25 }
   0xb   :  { %212 = vmatmul.mubr.msk.bf16.vlgmr.msra.gmra.mrb[0].mxu1 %vm66_vm2, %v15_v17 }
  0x85   :  { %v28_v21 = vpop.permute.xlu0 %27 }
  0xdd   :  { %v120_v22 = vpop.f32.mrb[0].mxu0 }
  0xde   :  { %v161_v23 = vpop.f32.mrb[0].mxu1  ;;  %v121_v26 = vadd.f32 %v120_v22, %v28_v21  ;;  %v122_v28 = vpop.f32.mrb[1].mxu0 }
  0xdf   :  { %v162_v27 = vadd.f32 %v161_v23, %v28_v21  ;;  %v163_v29 = vpop.f32.mrb[1].mxu1  ;;  %v123_v30 = vadd.f32 %v122_v28, %v28_v21  ;;  %v124_v32 = vpop.f32.mrb[2].mxu0 }
  0xe0   :  { %v164_v31 = vadd.f32 %v163_v29, %v28_v21  ;;  %v165_v33 = vpop.f32.mrb[2].mxu1  ;;  %v168_v34 = vmax.f32 %v121_v26, 0.0  ;;  %v125_v36 = vpop.f32.mrb[3].mxu0 }
  0xe1   :  { %v170_v35 = vmax.f32 %v162_v27, 0.0  ;;  %v166_v37 = vpop.f32.mrb[3].mxu1  ;;  %v169_v38 = vmax.f32 %v123_v30, 0.0 }
  0xe2   :  { %v171_v40 = vmax.f32 %v164_v31, 0.0 }
  0xe3   :  { %v213_v41 = vpack.c.bf16 %v169_v38, %v168_v34 }
  0xe4   :  { %v214_v42 = vpack.c.bf16 %v171_v40, %v170_v35 }
  0xe5   :  { %v188_v43 = vrot.slane %v213_v41, %v187_v39 }
  0xe6   :  { %v195_v44 = vrot.slane %v214_v42, %v187_v39 }
  0xe8   :  { %v196_v45 = vcombine.low %v188_v43, %v195_v44 }
  0xea   :  { %198 = vst [vmem:[%s290_s3] sm:$0xff] %v196_v45 }

// kernel: basic_rfb_general.16
= control target key start
LH: loop header
LB: loop body
LE: loop exit
PB: predicated region body
PF: predicated region fallthrough
CT: control target
= control target key end

     0   :  { %v249_v1 = vmov 0   ;;  %vm86_vm0 = vcmask 1041408   ;;  %vm82_vm1 = vcmask 293888   ;;  %v250_v19 = vmov 1983009808   ;;  %s314_s1 = inlined_call_operand.vmem [shape: bf16[36,512], index: 1, kind: input, shape index: {}]   ;;  %s315_s2 = inlined_call_operand.vmem [shape: f32[4,1], index: 2, kind: input, shape index: {}]   ;;  %s316_s0 = inlined_call_operand.vmem [shape: bf16[4,36], index: 0, kind: input, shape index: {}]   ;;  %s317_s3 = inlined_call_operand.vmem [shape: bf16[4,512], index: 3, kind: output, shape index: {}]  }
   0x1   :  { %v233_v0 = vld [vmem:[%s314_s1 + $0x4] ss:$16 sps:$4 sm:$0xff]   ;;  %131 = vmatprep.mubr.bf16.mxu0 %v249_v1  ;;  %172 = vmatprep.mubr.bf16.mxu1 %v249_v1  ;;  %v235_v2 = vld [vmem:[%s314_s1 + $0xc] ss:$16 sps:$4 sm:$0xff]   ;;  %v237_v3 = vld [vmem:[%s314_s1] ss:$16 sps:$4 sm:$0xff]   ;;  %v192_v20 = vunpack.c.l.s4 %v250_v19  ;;  %v194_v21 = vlaneseq }
   0x2   :  { %232 = vset.pattern.permute.xlu0 %v249_v1  ;;  %99 = vmatprep.subr.bf16.mxu0 %v233_v0  ;;  %v238_v4 = vld [vmem:[%s314_s1 + $0x8] ss:$16 sps:$4 sm:$0xff]   ;;  %v239_v5 = vld [vmem:[%s314_s1 + $0x24] ss:$16 sps:$4 sm:$0xff]   ;;  %v241_v6 = vld [vmem:[%s314_s1 + $0x2c] ss:$16 sps:$4 sm:$0xff]  }
   0x3   :  { %140 = vmatprep.subr.bf16.mxu1 %v235_v2  ;;  %100 = vmatpush1.bf16.msra.mxu0 %v237_v3  ;;  %v243_v7 = vld [vmem:[%s314_s1 + $0x20] ss:$16 sps:$4 sm:$0xff]   ;;  %v244_v8 = vld [vmem:[%s314_s1 + $0x28] ss:$16 sps:$4 sm:$0xff]   ;;  %v193_v23 = vunpack.c.0.s8 %v192_v20  ;;  %v195_v24 = vshrl.u32 %v194_v21, 7 }
   0x4   :  { %141 = vmatpush1.bf16.msra.mxu1 %v238_v4  ;;  %101 = vmatprep.subr.bf16.mxu0 %v239_v5  ;;  %v24_v9 = vld [vmem:[%s314_s1 + $0x40] sm:$0x33]  ;;  %v25_v10 = vld [vmem:[%s314_s1 + $0x48] sm:$0x33] }
   0x5   :  { %142 = vmatprep.subr.bf16.mxu1 %v241_v6  ;;  %v221_v11 = vcombine.high %v24_v9, %v24_v9  ;;  %v223_v12 = vcombine.high %v25_v10, %v25_v10  ;;  %v220_v13 = vcombine.low %v24_v9, %v24_v9  ;;  %v222_v14 = vcombine.low %v25_v10, %v25_v10  ;;  %v26_v15 = vld [vmem:[%s315_s2] sm:$0xf] }
   0x6   :  { %29 = vperm.xlu0 %232, %v26_v15   ;;  %v15_v18 = vld [vmem:[%s316_s0] sm:$0x3]  ;;  %v196_v32 = vsub.s32 %v193_v23, %v195_v24 }
   0x7   :  { %102 = vmatpush1.bf16.msra.mxu0 %v243_v7  ;;  %v88_v16 = vsel %vm86_vm0, %v220_v13, 0  ;;  %v94_v17 = vsel %vm86_vm0, %v222_v14, 0 }
   0x8   :  { %143 = vmatpush1.bf16.msra.mxu1 %v244_v8  ;;  %224 = vmatprep.subr.msk.bf16.mxu0 %vm86_vm0, %v221_v11 }
   0x9   :  { %226 = vmatprep.subr.msk.bf16.mxu1 %vm86_vm0, %v223_v12 }
   0xb   :  { %104 = vmatpush1.bf16.msra.mxu0 %v88_v16 }
   0xc   :  { %145 = vmatpush1.bf16.msra.mxu1 %v94_v17 }
   0xe   :  { %225 = vmatmul.mubr.msk.bf16.vlgmr.msra.gmra.mrb[0].mxu0 %vm82_vm1, %v15_v18 }
   0xf   :  { %227 = vmatmul.mubr.msk.bf16.vlgmr.msra.gmra.mrb[0].mxu1 %vm82_vm1, %v15_v18 }
  0x85   :  { %v30_v22 = vpop.permute.xlu0 %29 }
  0xe1   :  { %v133_v25 = vpop.f32.mrb[0].mxu0 }
  0xe2   :  { %v174_v26 = vpop.f32.mrb[0].mxu1  ;;  %v134_v27 = vadd.f32 %v133_v25, %v30_v22  ;;  %v135_v29 = vpop.f32.mrb[1].mxu0 }
  0xe3   :  { %v175_v28 = vadd.f32 %v174_v26, %v30_v22  ;;  %v176_v30 = vpop.f32.mrb[1].mxu1  ;;  %v136_v31 = vadd.f32 %v135_v29, %v30_v22  ;;  %v137_v34 = vpop.f32.mrb[2].mxu0 }
  0xe4   :  { %v177_v33 = vadd.f32 %v176_v30, %v30_v22  ;;  %v178_v35 = vpop.f32.mrb[2].mxu1  ;;  %v138_v36 = vpop.f32.mrb[3].mxu0 }
  0xe5   :  { %v179_v37 = vpop.f32.mrb[3].mxu1  ;;  %v228_v38 = vpack.c.bf16 %v136_v31, %v134_v27 }
  0xe6   :  { %v229_v39 = vpack.c.bf16 %v177_v33, %v175_v28 }
  0xe7   :  { %v197_v40 = vrot.slane %v228_v38, %v196_v32 }
  0xe8   :  { %v204_v41 = vrot.slane %v229_v39, %v196_v32 }
  0xea   :  { %v205_v42 = vcombine.low %v197_v40, %v204_v41 }
  0xec   :  { %207 = vst [vmem:[%s317_s3] sm:$0xff] %v205_v42 }

// kernel: basic_rfb_general.17
= control target key start
LH: loop header
LB: loop body
LE: loop exit
PB: predicated region body
PF: predicated region fallthrough
CT: control target
= control target key end

     0   :  { %vm67_vm0 = vcmask 1045504   ;;  %v384_v1 = vmov 0   ;;  %vm63_vm1 = vcmask 97280   ;;  %vm209_vm2 = vcmask 130048   ;;  %s490_s2 = inlined_call_operand.vmem [shape: bf16[12,512], index: 2, kind: input, shape index: {}]   ;;  %s491_s0 = inlined_call_operand.vmem [shape: bf16[16,12], index: 0, kind: input, shape index: {}]   ;;  %s492_s3 = inlined_call_operand.vmem [shape: bf16[16,512], index: 3, kind: input, shape index: {}]   ;;  %s493_s1 = inlined_call_operand.vmem [shape: bf16[16,16], index: 1, kind: input, shape index: {}]   ;;  %s494_s5 = inlined_call_operand.vmem [shape: f32[16,1], index: 5, kind: input, shape index: {}]   ;;  %s495_s4 = inlined_call_operand.vmem [shape: f32[16,1], index: 4, kind: input, shape index: {}]   ;;  %s496_s6 = inlined_call_operand.vmem [shape: f32[16,512], index: 6, kind: output, shape index: {}]  }
   0x1   :  { %v370_v0 = vld [vmem:[%s490_s2 + $0x4] ss:$16 sps:$4 sm:$0x3f]   ;;  %112 = vmatprep.mubr.bf16.mxu0 %v384_v1  ;;  %155 = vmatprep.mubr.bf16.mxu1 %v384_v1  ;;  %v372_v2 = vld [vmem:[%s490_s2 + $0xc] ss:$16 sps:$4 sm:$0x3f]  }
   0x2   :  { %369 = vset.pattern.permute.xlu1 %v384_v1  ;;  %368 = vset.pattern.permute.xlu0 %v384_v1  ;;  %v374_v3 = vld [vmem:[%s490_s2] ss:$16 sps:$4 sm:$0x3f]   ;;  %v375_v4 = vld [vmem:[%s490_s2 + $0x8] ss:$16 sps:$4 sm:$0x3f]  }
   0x3   :  { %332 = vmatprep.subr.msk.bf16.mxu0 %vm67_vm0, %v370_v0  ;;  %334 = vmatprep.subr.msk.bf16.mxu1 %vm67_vm0, %v372_v2  ;;  %v376_v5 = vld [vmem:[%s491_s0] sm:$0xff]   ;;  %v69_v6 = vsel %vm67_vm0, %v374_v3, 0  ;;  %v75_v7 = vsel %vm67_vm0, %v375_v4, 0  ;;  %v380_v10 = vld [vmem:[%s492_s3 + $0x8] ss:$16 sps:$4 sm:$0xff]  }
   0x4   :  { %v377_v8 = vld [vmem:[%s492_s3] ss:$16 sps:$4 sm:$0xff]   ;;  %81 = vmatpush1.bf16.msra.mxu0 %v69_v6  ;;  %124 = vmatpush1.bf16.msra.mxu1 %v75_v7  ;;  %v379_v9 = vld [vmem:[%s492_s3 + $0x4] ss:$16 sps:$4 sm:$0xff]   ;;  %v382_v11 = vld [vmem:[%s492_s3 + $0xc] ss:$16 sps:$4 sm:$0xff]  }
   0x5   :  { %213 = vmatprep.subr.bf16.mxu0 %v379_v9  ;;  %v172_v12 = vld [vmem:[%s494_s5] sm:$0xff]  ;;  %256 = vmatprep.subr.bf16.mxu1 %v382_v11  ;;  %v173_v14 = vld [vmem:[%s494_s5 + $0x8] sm:$0xff] }
   0x6   :  { %v30_v13 = vld [vmem:[%s495_s4] sm:$0xff]  ;;  %176 = vperm.xlu1 %369, %v172_v12   ;;  %v31_v15 = vld [vmem:[%s495_s4 + $0x8] sm:$0xff] }
   0x7   :  { %333 = vmatmul.mubr.msk.bf16.vlgmr.msra.gmra.mrb[0].mxu0 %vm63_vm1, %v376_v5  ;;  %335 = vmatmul.mubr.msk.bf16.vlgmr.msra.gmra.mrb[0].mxu1 %vm63_vm1, %v376_v5  ;;  %v383_v16 = vld [vmem:[%s493_s1] sm:$0xff]  }
   0x8   :  { %214 = vmatpush1.bf16.msra.mxu0 %v377_v8  ;;  %257 = vmatpush1.bf16.msra.mxu1 %v380_v10 }
   0x9   :  { %245 = vmatprep.mubr.bf16.mxu0 %v384_v1  ;;  %288 = vmatprep.mubr.bf16.mxu1 %v384_v1 }
   0xa   :  { %34 = vperm.xlu0 %368, %v30_v13   ;;  %181 = vperm.xlu1 %369, %v173_v14  }
   0xe   :  { %39 = vperm.xlu0 %368, %v31_v15  }
  0x13   :  { %341 = vmatmul.mubr.msk.bf16.vlgmr.msra.gmra.mrb[0].mxu0 %vm209_vm2, %v383_v16  ;;  %342 = vmatmul.mubr.msk.bf16.vlgmr.msra.gmra.mrb[0].mxu1 %vm209_vm2, %v383_v16 }
  0x85   :  { %v177_v17 = vpop.permute.xlu1 %176 }
  0x89   :  { %v35_v18 = vpop.permute.xlu0 %34  ;;  %v182_v20 = vpop.permute.xlu1 %181 }
  0x8a   :  { %v343_v19 = vadd.f32 %v177_v17, %v35_v18 }
  0x8d   :  { %v40_v21 = vpop.permute.xlu0 %39 }
  0x8e   :  { %v347_v24 = vadd.f32 %v182_v20, %v40_v21 }
  0xe6   :  { %v247_v22 = vpop.f32.mrb[0].mxu0  ;;  %v290_v23 = vpop.f32.mrb[0].mxu1 }
  0xe7   :  { %v344_v25 = vadd.f32 %v343_v19, %v247_v22  ;;  %v352_v26 = vadd.f32 %v343_v19, %v290_v23  ;;  %v249_v27 = vpop.f32.mrb[1].mxu0  ;;  %v292_v28 = vpop.f32.mrb[1].mxu1 }
  0xe8   :  { %v346_v29 = vadd.f32 %v343_v19, %v249_v27  ;;  %v354_v30 = vadd.f32 %v343_v19, %v292_v28  ;;  %v251_v31 = vpop.f32.mrb[2].mxu0  ;;  %v294_v32 = vpop.f32.mrb[2].mxu1 }
  0xe9   :  { %v307_v33 = vmax.f32 %v344_v25, 0.0  ;;  %v309_v34 = vmax.f32 %v352_v26, 0.0  ;;  %v348_v35 = vadd.f32 %v347_v24, %v251_v31  ;;  %v356_v36 = vadd.f32 %v347_v24, %v294_v32  ;;  %v253_v37 = vpop.f32.mrb[3].mxu0  ;;  %v296_v38 = vpop.f32.mrb[3].mxu1 }
  0xea   :  { %v308_v39 = vmax.f32 %v346_v29, 0.0  ;;  %v310_v40 = vmax.f32 %v354_v30, 0.0  ;;  %v350_v41 = vadd.f32 %v347_v24, %v253_v37  ;;  %v358_v42 = vadd.f32 %v347_v24, %v296_v38 }
  0xeb   :  { %315 = vst [vmem:[%s496_s6] sm:$0xff] %v307_v33  ;;  %317 = vst [vmem:[%s496_s6 + $0x10] sm:$0xff] %v309_v34  ;;  %v311_v43 = vmax.f32 %v348_v35, 0.0  ;;  %v313_v44 = vmax.f32 %v356_v36, 0.0 }
  0xec   :  { %316 = vst [vmem:[%s496_s6 + $0x8] sm:$0xff] %v308_v39  ;;  %318 = vst [vmem:[%s496_s6 + $0x18] sm:$0xff] %v310_v40  ;;  %v312_v45 = vmax.f32 %v350_v41, 0.0  ;;  %v314_v46 = vmax.f32 %v358_v42, 0.0 }
  0xed   :  { %319 = vst [vmem:[%s496_s6 + $0x20] sm:$0xff] %v311_v43  ;;  %321 = vst [vmem:[%s496_s6 + $0x30] sm:$0xff] %v313_v44 }
  0xee   :  { %320 = vst [vmem:[%s496_s6 + $0x28] sm:$0xff] %v312_v45  ;;  %322 = vst [vmem:[%s496_s6 + $0x38] sm:$0xff] %v314_v46 }

</bundles_post_ra>
